<compile_context>
chip_gen: v5e
topology: v5e:2x2
jax: 0.10.0
libtpu: 0.0.40
codegen_flags: <defaults>
</compile_context>

<pallas_src>
import functools
import math

import jax
import jax.numpy as jnp
from jax import lax
from jax.experimental import pallas as pl
from jax.experimental.pallas import tpu as pltpu


# ----------------------------------------------------------------------------
# helpers
# ----------------------------------------------------------------------------
def _layernorm_padded(x, w, b, e_real, eps=1e-5):
    """Layernorm over the last (padded) axis. Padded lanes of x are zero, statistics use
    the real width e_real, and zero-padded w/b keep the padded output lanes at 0."""
    inv_e = 1.0 / float(e_real)
    mean = jnp.sum(x, axis=-1, keepdims=True) * inv_e
    var = jnp.sum(x * x, axis=-1, keepdims=True) * inv_e - mean * mean
    return (x - mean) * lax.rsqrt(var + eps) * w + b


def _pick_block_b(total_b, rows_per_elem, target_rows=256, cap=8):
    """Batch block: grid length >= 2 when possible (v7x has two TensorCores), enough
    matmul rows per step to keep the MXU busy, bounded python unroll."""
    want = max(1, min(total_b // 2 if total_b >= 2 else 1, cap,
                      -(-target_rows // rows_per_elem)))
    bb = want
    while total_b % bb:
        bb -= 1
    return max(bb, 1)


# ----------------------------------------------------------------------------
# Fused kernel: 1-layer transformer encoder + mixer + cosine/Gaussian kernel scoring
# ----------------------------------------------------------------------------
def tkl_fused_kernel(qe_ref, de_ref, qmcol_ref, qrow_ref, dmcol_ref, drow_ref, qidf_ref,
                     wqkv_ref, bqkv_ref, wo_ref, bo_ref, ln1w_ref, ln1b_ref,
                     ff1_ref, ff1b_ref, ff2_ref, ff2b_ref, ln2w_ref, ln2b_ref,
                     mu_ref, inv2s2_ref, kmult_ref, dense_ref,
                     mixer_ref, satp_ref,
                     out_ref, *, num_heads, head_pad, emb_dim, n_kernels):
    Bb, Q, Ep = qe_ref.shape
    Dl = de_ref.shape[1]
    H, HP, E, K = num_heads, head_pad, emb_dim, n_kernels
    hd = E // H
    scale = 1.0 / math.sqrt(hd)
    NQ, ND = Bb * Q, Bb * Dl

    qmcol = qmcol_ref[...]                                   # (Bb, Q, 1)
    dmcol = dmcol_ref[...]                                   # (Bb, Dl, 1)

    # masked, lane-padded input slab: queries stacked on top of docs
    xq = (qe_ref[...] * qmcol).reshape(NQ, Ep)
    xd = (de_ref[...] * dmcol).reshape(ND, Ep)
    x2d = jnp.concatenate([xq, xd], axis=0)                  # (N, Ep)
    mcol = jnp.concatenate([qmcol.reshape(NQ, 1), dmcol.reshape(ND, 1)], axis=0)

    # fused QKV projection, head-padded columns (lane-dense, head slices lane-aligned)
    qkv = jnp.dot(x2d, wqkv_ref[...],
                  preferred_element_type=jnp.float32) + bqkv_ref[...]     # (N, 3*H*HP)

    # per-sequence attention; outputs stay in registers (no VMEM scratch)
    def attend(row0, seq_len, bias_row):
        heads = []
        for h in range(H):
            qh = qkv[row0:row0 + seq_len, h * HP:(h + 1) * HP]
            kh = qkv[row0:row0 + seq_len, (H + h) * HP:(H + h + 1) * HP]
            vh = qkv[row0:row0 + seq_len, (2 * H + h) * HP:(2 * H + h + 1) * HP]
            s = lax.dot_general(qh, kh, (((1,), (1,)), ((), ())),
                                preferred_element_type=jnp.float32) * scale
            s = s + bias_row
            s = s - jnp.max(s, axis=-1, keepdims=True)
            p = jnp.exp(s)
            p = p * pl.reciprocal(jnp.sum(p, axis=-1, keepdims=True), approx=True)
            heads.append(jnp.dot(p, vh, preferred_element_type=jnp.float32))
        return jnp.concatenate(heads, axis=1)                # (seq_len, H*HP)

    ctx_rows = []
    for b in range(Bb):                                      # query sequences
        bias = jnp.where(qrow_ref[b] > 0.0, 0.0, -1e30)      # (1, Q) key-padding bias
        ctx_rows.append(attend(b * Q, Q, bias))
    for b in range(Bb):                                      # document sequences
        bias = jnp.where(drow_ref[b] > 0.0, 0.0, -1e30)      # (1, Dl)
        ctx_rows.append(attend(NQ + b * Dl, Dl, bias))
    ctx = jnp.concatenate(ctx_rows, axis=0)                  # (N, H*HP)

    attn = jnp.dot(ctx, wo_ref[...], preferred_element_type=jnp.float32) + bo_ref[...]
    h1 = _layernorm_padded(x2d + attn, ln1w_ref[...], ln1b_ref[...], E)
    ff = jnp.dot(h1, ff1_ref[...], preferred_element_type=jnp.float32) + ff1b_ref[...]
    ff = jnp.maximum(ff, 0.0)                                # relu
    ff = jnp.dot(ff, ff2_ref[...], preferred_element_type=jnp.float32) + ff2b_ref[...]
    h2 = _layernorm_padded(h1 + ff, ln2w_ref[...], ln2b_ref[...], E)

    mix = mixer_ref[0]
    out2d = (mix * x2d + (1.0 - mix) * h2) * mcol            # (N, Ep), padded lanes = 0

    # ---------------- kernel pooling ----------------
    # cosine norms for the whole slab (rsqrt -> EUP); padded lanes contribute 0
    qn = out2d[:NQ] * lax.rsqrt(jnp.sum(out2d[:NQ] * out2d[:NQ], -1, keepdims=True) + 1e-26)
    dn = out2d[NQ:] * lax.rsqrt(jnp.sum(out2d[NQ:] * out2d[NQ:], -1, keepdims=True) + 1e-26)

    # saturation terms for the whole batch block
    w10, w11, b1s = satp_ref[0], satp_ref[1], satp_ref[2]
    w20, w21, b2s = satp_ref[3], satp_ref[4], satp_ref[5]
    w30, w31, b3s = satp_ref[6], satp_ref[7], satp_ref[8]
    dense_sum = satp_ref[9]
    doclen = jnp.sum(dmcol, axis=1, keepdims=True)           # (Bb, 1, 1)
    sig = jax.nn.sigmoid(qidf_ref[...] * 0.5)                # (Bb, Q, 1)
    sat1m = (sig * w10 + doclen * w11 + b1s) * qmcol         # query mask folded in
    sat2 = 1.0 / (sig * w20 + doclen * w21 + b2s)
    sat3m = (sig * w30 + doclen * w31 + b3s) * qmcol

    mu_sub = mu_ref[...]                                     # (K*Q, 1) pre-repeated
    inv2s2 = inv2s2_ref[...]                                 # (K*Q, 1)
    kmult = kmult_ref[...]                                   # (K*Q, 1)
    dense = dense_ref[...]                                   # (K*Q, 1)

    scores = []
    for b in range(Bb):
        cos = lax.dot_general(qn[b * Q:(b + 1) * Q], dn[b * Dl:(b + 1) * Dl],
                              (((1,), (1,)), ((), ())),
                              preferred_element_type=jnp.float32)         # (Q, Dl)
        # fold the doc mask ONCE: sentinel far from every mu so exp underflows to 0
        # (holds for |mu| <= 1, sigma = 0.1; revisit if sigma is ever made very large)
        cos = jnp.where(drow_ref[b] > 0.0, cos, 1e4)
        cos_rep = jnp.tile(cos, (K, 1))                                   # (K*Q, Dl)
        diff = cos_rep - mu_sub
        rk = jnp.exp(-diff * diff * inv2s2)                               # ONE exp / b
        pkq = jnp.sum(rk, axis=-1, keepdims=True)                         # (K*Q, 1)
        x = jnp.maximum(pkq * kmult, 1e-10)
        powed = jnp.power(x, jnp.tile(sat2[b], (K, 1)))                   # (K*Q, 1)
        sb = (jnp.sum(dense * jnp.tile(sat1m[b], (K, 1)) * powed)
              - dense_sum * jnp.sum(sat3m[b]))
        scores.append(sb)

    # TODO(synk): the (1,1,block_b) store is lane-sparse for small B; for production batch
    # sizes raise block_b toward 128 (while keeping the grid >= 2 steps for v7x).
    out_ref[...] = jnp.concatenate(
        [jnp.full((1, 1, 1), s, jnp.float32) for s in scores], axis=2)


# ----------------------------------------------------------------------------
# One-time parameter preparation (padding / transposition hoisted out of the hot path)
# ----------------------------------------------------------------------------
def prepare_padded_params(p, mu, sigma, *, num_heads, q_len,
                          e_pad=128, head_pad=128, ff_pad=128):
    E = p["ln1_w"].shape[0]
    FF = p["ff1_w"].shape[0]
    K = mu.shape[0]
    H = num_heads
    hd = E // H
    f32 = jnp.float32

    # fused QKV: column block for (kind, head) at offset (kind*H + h)*head_pad
    wqkv_p = jnp.zeros((e_pad, 3 * H * head_pad), f32)
    bqkv_p = jnp.zeros((1, 3 * H * head_pad), f32)
    for kind in range(3):                                    # q, k, v
        w_t = p["wqkv"][kind * E:(kind + 1) * E].T           # (E_in, E_out)
        b_k = p["bqkv"][kind * E:(kind + 1) * E]
        for h in range(H):
            off = (kind * H + h) * head_pad
            wqkv_p = wqkv_p.at[:E, off:off + hd].set(w_t[:, h * hd:(h + 1) * hd])
            bqkv_p = bqkv_p.at[0, off:off + hd].set(b_k[h * hd:(h + 1) * hd])

    wo_t = p["wo"].T                                         # (E_in(ctx), E_out)
    wo_p = jnp.zeros((H * head_pad, e_pad), f32)
    for h in range(H):
        wo_p = wo_p.at[h * head_pad:h * head_pad + hd, :E].set(wo_t[h * hd:(h + 1) * hd, :])
    bo_p = jnp.zeros((1, e_pad), f32).at[0, :E].set(p["bo"])

    def pad_row(v, n):
        return jnp.zeros((1, n), f32).at[0, :v.shape[0]].set(v.astype(f32))

    ff1_p = jnp.zeros((e_pad, ff_pad), f32).at[:E, :FF].set(p["ff1_w"].T)
    ff2_p = jnp.zeros((ff_pad, e_pad), f32).at[:FF, :E].set(p["ff2_w"].T)

    rep = lambda v: jnp.repeat(v.astype(f32), q_len).reshape(K * q_len, 1)
    satp = jnp.concatenate(
        [p["sat_w1"], p["sat_b1"], p["sat_w2"], p["sat_b2"],
         p["sat_w3"], p["sat_b3"], jnp.sum(p["dense_w"]).reshape(1)]).astype(f32)

    return {
        "wqkv_p": wqkv_p, "bqkv_p": bqkv_p, "wo_p": wo_p, "bo_p": bo_p,
        "ln1w_p": pad_row(p["ln1_w"], e_pad), "ln1b_p": pad_row(p["ln1_b"], e_pad),
        "ff1_p": ff1_p, "ff1b_p": pad_row(p["ff1_b"], ff_pad),
        "ff2_p": ff2_p, "ff2b_p": pad_row(p["ff2_b"], e_pad),
        "ln2w_p": pad_row(p["ln2_w"], e_pad), "ln2b_p": pad_row(p["ln2_b"], e_pad),
        "mixer": p["mixer"].astype(f32),
        "mu_sub": rep(mu),
        "inv2s2_sub": rep(1.0 / (2.0 * sigma * sigma)),      # precomputed on host
        "kmult_sub": rep(p["kernel_mult"]),
        "dense_sub": rep(p["dense_w"]),
        "satp": satp,
        "num_heads": H, "emb_dim": E, "n_kernels": K,
        "e_pad": e_pad, "head_pad": head_pad,
    }


# ----------------------------------------------------------------------------
# Forward wrapper
# ----------------------------------------------------------------------------
def get_positional_features(dim, max_len, min_ts=1.0, max_ts=1.0e4):
    t = jnp.arange(max_len, dtype=jnp.float32)
    nts = dim // 2
    r = jnp.arange(nts, dtype=jnp.float32)
    log_inc = math.log(max_ts / min_ts) / float(nts - 1)
    inv_ts = min_ts * jnp.exp(r * -log_inc)
    scaled = t[:, None] * inv_ts[None, :]
    sinusoids = jnp.concatenate([jnp.sin(scaled), jnp.cos(scaled)], axis=1)
    if dim % 2 != 0:
        sinusoids = jnp.concatenate(
            [sinusoids, jnp.zeros((max_len, 1), jnp.float32)], axis=1)
    return sinusoids[None]                                   # (1, max_len, dim)


def tkl_forward(q_emb, d_emb, q_mask, d_mask, q_idf, d_idf, pp, *,
                block_b=None, use_pos_encoding=True):
    del d_idf                                                # unused by the PyTorch forward too
    B, Q, E = q_emb.shape
    Dl = d_emb.shape[1]
    H = pp["num_heads"]
    Ep, HP, K = pp["e_pad"], pp["head_pad"], pp["n_kernels"]

    if use_pos_encoding:
        pos = get_positional_features(E, 30)
        q_emb = q_emb + pos[:, :Q, :]
        d_emb = d_emb + pos[:, :Dl, :]                       # use_diff_posencoding=False

    # pad the embedding dim to 128 lanes; the padded lanes stay exactly zero in-kernel
    q_emb_p = jnp.pad(q_emb, ((0, 0), (0, 0), (0, Ep - E)))
    d_emb_p = jnp.pad(d_emb, ((0, 0), (0, 0), (0, Ep - E)))

    if block_b is None:
        block_b = _pick_block_b(B, Q + Dl)
    grid = (B // block_b,)

    def full(shape):
        return pl.BlockSpec(shape, lambda *_: (0,) * len(shape))
    smem = pl.BlockSpec(memory_space=pltpu.MemorySpace.SMEM)

    in_specs = [
        pl.BlockSpec((block_b, Q, Ep), lambda i: (i, 0, 0)),
        pl.BlockSpec((block_b, Dl, Ep), lambda i: (i, 0, 0)),
        pl.BlockSpec((block_b, Q, 1), lambda i: (i, 0, 0)),
        pl.BlockSpec((block_b, 1, Q), lambda i: (i, 0, 0)),
        pl.BlockSpec((block_b, Dl, 1), lambda i: (i, 0, 0)),
        pl.BlockSpec((block_b, 1, Dl), lambda i: (i, 0, 0)),
        pl.BlockSpec((block_b, Q, 1), lambda i: (i, 0, 0)),
        full(pp["wqkv_p"].shape), full(pp["bqkv_p"].shape),
        full(pp["wo_p"].shape), full(pp["bo_p"].shape),
        full(pp["ln1w_p"].shape), full(pp["ln1b_p"].shape),
        full(pp["ff1_p"].shape), full(pp["ff1b_p"].shape),
        full(pp["ff2_p"].shape), full(pp["ff2b_p"].shape),
        full(pp["ln2w_p"].shape), full(pp["ln2b_p"].shape),
        full(pp["mu_sub"].shape), full(pp["inv2s2_sub"].shape),
        full(pp["kmult_sub"].shape), full(pp["dense_sub"].shape),
        smem, smem,
    ]
    out = pl.pallas_call(
        functools.partial(tkl_fused_kernel, num_heads=H, head_pad=HP,
                          emb_dim=E, n_kernels=K),
        grid=grid,
        in_specs=in_specs,
        out_specs=pl.BlockSpec((1, 1, block_b), lambda i: (i, 0, 0)),
        out_shape=jax.ShapeDtypeStruct((B // block_b, 1, block_b), jnp.float32),
        compiler_params=pltpu.CompilerParams(dimension_semantics=("parallel",)),
    )(q_emb_p, d_emb_p,
      q_mask.reshape(B, Q, 1), q_mask.reshape(B, 1, Q),
      d_mask.reshape(B, Dl, 1), d_mask.reshape(B, 1, Dl),
      q_idf,
      pp["wqkv_p"], pp["bqkv_p"], pp["wo_p"], pp["bo_p"],
      pp["ln1w_p"], pp["ln1b_p"],
      pp["ff1_p"], pp["ff1b_p"], pp["ff2_p"], pp["ff2b_p"],
      pp["ln2w_p"], pp["ln2b_p"],
      pp["mu_sub"], pp["inv2s2_sub"], pp["kmult_sub"], pp["dense_sub"],
      pp["mixer"], pp["satp"])
    return out.reshape(B)


# ----------------------------------------------------------------------------
# Parameters + pure-JAX reference (mirrors the PyTorch forward) for correctness check
# ----------------------------------------------------------------------------
def init_params(key, E, FF, K):
    ks = jax.random.split(key, 12)
    u = lambda k, s, a, b: jax.random.uniform(k, s, jnp.float32, a, b)
    lim_e, lim_ff = 1.0 / math.sqrt(E), 1.0 / math.sqrt(FF)
    return {
        "wqkv": u(ks[0], (3 * E, E), -lim_e, lim_e),
        "bqkv": u(ks[1], (3 * E,), -lim_e, lim_e),
        "wo": u(ks[2], (E, E), -lim_e, lim_e),
        "bo": u(ks[3], (E,), -lim_e, lim_e),
        "ln1_w": jnp.ones((E,), jnp.float32), "ln1_b": jnp.zeros((E,), jnp.float32),
        "ff1_w": u(ks[4], (FF, E), -lim_e, lim_e),
        "ff1_b": u(ks[5], (FF,), -lim_e, lim_e),
        "ff2_w": u(ks[6], (E, FF), -lim_ff, lim_ff),
        "ff2_b": u(ks[7], (E,), -lim_ff, lim_ff),
        "ln2_w": jnp.ones((E,), jnp.float32), "ln2_b": jnp.zeros((E,), jnp.float32),
        "mixer": jnp.array([0.5], jnp.float32),
        # saturation linears: weight ~ U(-0.02, 0.02), bias = 10  (as in __init__)
        "sat_w1": u(ks[8], (2,), -0.02, 0.02), "sat_b1": jnp.array([10.0], jnp.float32),
        "sat_w2": u(ks[9], (2,), -0.02, 0.02), "sat_b2": jnp.array([10.0], jnp.float32),
        "sat_w3": u(ks[10], (2,), -0.02, 0.02), "sat_b3": jnp.array([10.0], jnp.float32),
        "dense_w": u(ks[11], (K,), -0.014, 0.014),
        "kernel_mult": jnp.ones((K,), jnp.float32),
    }


def ref_forward(q_emb, d_emb, q_mask, d_mask, q_idf, p, mu, sigma, *, num_heads,
                use_pos_encoding=True):
    E = q_emb.shape[-1]
    if use_pos_encoding:
        pos = get_positional_features(E, 30)
        q_emb = q_emb + pos[:, :q_emb.shape[1], :]
        d_emb = d_emb + pos[:, :d_emb.shape[1], :]

    def ln(x, w, b):
        m = x.mean(-1, keepdims=True)
        v = ((x - m) ** 2).mean(-1, keepdims=True)
        return (x - m) / jnp.sqrt(v + 1e-5) * w + b

    def rep(x, mask):
        B, S, _ = x.shape
        hd = E // num_heads
        x0 = x * mask[..., None]
        qkv = jnp.einsum("bse,fe->bsf", x0, p["wqkv"]) + p["bqkv"]
        q, k, v = qkv[..., :E], qkv[..., E:2 * E], qkv[..., 2 * E:]
        q = q.reshape(B, S, num_heads, hd)
        k = k.reshape(B, S, num_heads, hd)
        v = v.reshape(B, S, num_heads, hd)
        s = jnp.einsum("bqhd,bkhd->bhqk", q, k) / math.sqrt(hd)
        s = jnp.where(mask[:, None, None, :] > 0, s, -1e30)
        s = s - s.max(-1, keepdims=True)
        a = jnp.exp(s)
        a = a / a.sum(-1, keepdims=True)
        ctx = jnp.einsum("bhqk,bkhd->bqhd", a, v).reshape(B, S, E)
        attn = jnp.einsum("bse,fe->bsf", ctx, p["wo"]) + p["bo"]
        h1 = ln(x0 + attn, p["ln1_w"], p["ln1_b"])
        ff = jnp.maximum(jnp.einsum("bse,fe->bsf", h1, p["ff1_w"]) + p["ff1_b"], 0)
        ff = jnp.einsum("bsf,ef->bse", ff, p["ff2_w"]) + p["ff2_b"]
        h2 = ln(h1 + ff, p["ln2_w"], p["ln2_b"])
        mix = p["mixer"][0]
        return (mix * x0 + (1.0 - mix) * h2) * mask[..., None]

    qc, dc = rep(q_emb, q_mask), rep(d_emb, d_mask)
    qn = qc / (jnp.linalg.norm(qc, axis=-1, keepdims=True) + 1e-13)
    dn = dc / (jnp.linalg.norm(dc, axis=-1, keepdims=True) + 1e-13)
    cos = jnp.einsum("bqe,bde->bqd", qn, dn)
    rk = jnp.exp(-(cos[..., None] - mu) ** 2 / (2 * sigma ** 2))
    pkq = (rk * d_mask[:, None, :, None]).sum(2)                    # (B,Q,K)
    dl = d_mask.sum(1)                                              # (B,)
    sat_inf = jnp.concatenate(
        [jax.nn.sigmoid(q_idf / 2),
         jnp.broadcast_to(dl[:, None, None], q_idf.shape)], -1)      # (B,Q,2)
    sat1 = sat_inf @ p["sat_w1"][:, None] + p["sat_b1"]
    sat2 = 1.0 / (sat_inf @ p["sat_w2"][:, None] + p["sat_b2"])
    sat3 = sat_inf @ p["sat_w3"][:, None] + p["sat_b3"]
    lpk = sat1 * jnp.maximum(pkq * p["kernel_mult"], 1e-10) ** sat2 - sat3
    per_kernel = (lpk * q_mask[..., None]).sum(1)                   # (B,K)
    return per_kernel @ p["dense_w"]                                # (B,)


# ----------------------------------------------------------------------------
if __name__ == "__main__":
    B, Q, Dl, E, H, FF = 2, 8, 16, 32, 2, 64
    mu = jnp.array([1.0, 0.9, 0.7, 0.5, 0.3, 0.1, -0.1, -0.3, -0.5, -0.7, -0.9],
                   jnp.float32)
    sigma = jnp.full((11,), 0.1, jnp.float32)
    K = mu.shape[0]

    key = jax.random.PRNGKey(0)
    kp, kq, kd, ki1, ki2 = jax.random.split(key, 5)
    params = init_params(kp, E, FF, K)

    q_emb = jax.random.normal(kq, (B, Q, E), jnp.float32)
    d_emb = jax.random.normal(kd, (B, Dl, E), jnp.float32)
    q_mask = jnp.array([[1] * 6 + [0] * 2, [1] * 8], jnp.float32)
    d_mask = jnp.array([[1] * 12 + [0] * 4, [1] * 16], jnp.float32)
    q_idf = jax.random.uniform(ki1, (B, Q, 1), jnp.float32, 0.0, 5.0)
    d_idf = jax.random.uniform(ki2, (B, Dl, 1), jnp.float32, 0.0, 5.0)

    # one-time weight padding / transposition (hoisted out of the per-call hot path)
    pp = prepare_padded_params(params, mu, sigma, num_heads=H, q_len=Q)

    score = tkl_forward(q_emb, d_emb, q_mask, d_mask, q_idf, d_idf, pp)
    score = jax.block_until_ready(score)

    ref = ref_forward(q_emb, d_emb, q_mask, d_mask, q_idf,
                      params, mu, sigma, num_heads=H)
    assert jnp.all(jnp.isfinite(score))
    assert jnp.allclose(score, ref, rtol=1e-2, atol=1e-2), (score, ref)
    print("KERNEL_OK")
</pallas_src>

<mosaic_0001>
module attributes {stable_mosaic.version = 11 : i64} {
  func.func @tkl_fused_kernel(%arg0: i32, %arg1: memref<1x8x128xf32, #tpu.memory_space<vmem>>, %arg2: memref<1x16x128xf32, #tpu.memory_space<vmem>>, %arg3: memref<1x8x1xf32, #tpu.memory_space<vmem>>, %arg4: memref<1x1x8xf32, #tpu.memory_space<vmem>>, %arg5: memref<1x16x1xf32, #tpu.memory_space<vmem>>, %arg6: memref<1x1x16xf32, #tpu.memory_space<vmem>>, %arg7: memref<1x8x1xf32, #tpu.memory_space<vmem>>, %arg8: memref<128x768xf32, #tpu.memory_space<vmem>>, %arg9: memref<1x768xf32, #tpu.memory_space<vmem>>, %arg10: memref<256x128xf32, #tpu.memory_space<vmem>>, %arg11: memref<1x128xf32, #tpu.memory_space<vmem>>, %arg12: memref<1x128xf32, #tpu.memory_space<vmem>>, %arg13: memref<1x128xf32, #tpu.memory_space<vmem>>, %arg14: memref<128x128xf32, #tpu.memory_space<vmem>>, %arg15: memref<1x128xf32, #tpu.memory_space<vmem>>, %arg16: memref<128x128xf32, #tpu.memory_space<vmem>>, %arg17: memref<1x128xf32, #tpu.memory_space<vmem>>, %arg18: memref<1x128xf32, #tpu.memory_space<vmem>>, %arg19: memref<1x128xf32, #tpu.memory_space<vmem>>, %arg20: memref<88x1xf32, #tpu.memory_space<vmem>>, %arg21: memref<88x1xf32, #tpu.memory_space<vmem>>, %arg22: memref<88x1xf32, #tpu.memory_space<vmem>>, %arg23: memref<88x1xf32, #tpu.memory_space<vmem>>, %arg24: memref<1xf32, #tpu.memory_space<smem>>, %arg25: memref<10xf32, #tpu.memory_space<smem>>, %arg26: memref<1x1x1xf32, #tpu.memory_space<vmem>>) attributes {dimension_semantics = [#tpu.dimension_semantics<parallel>], iteration_bounds = array<i64: 2>, scalar_prefetch = 0 : i64, scratch_operands = 0 : i64, tpu.core_type = #tpu.core_type<tc>, window_params = [{transform_indices = @transform_0, window_bounds = array<i64: 1, 8, 128>}, {transform_indices = @transform_1, window_bounds = array<i64: 1, 16, 128>}, {transform_indices = @transform_2, window_bounds = array<i64: 1, 8, 1>}, {transform_indices = @transform_3, window_bounds = array<i64: 1, 1, 8>}, {transform_indices = @transform_4, window_bounds = array<i64: 1, 16, 1>}, {transform_indices = @transform_5, window_bounds = array<i64: 1, 1, 16>}, {transform_indices = @transform_6, window_bounds = array<i64: 1, 8, 1>}, {pipeline_mode = #tpu.pipeline_mode<synchronous>, transform_indices = @transform_7, window_bounds = array<i64: 128, 768>}, {pipeline_mode = #tpu.pipeline_mode<synchronous>, transform_indices = @transform_8, window_bounds = array<i64: 1, 768>}, {pipeline_mode = #tpu.pipeline_mode<synchronous>, transform_indices = @transform_9, window_bounds = array<i64: 256, 128>}, {pipeline_mode = #tpu.pipeline_mode<synchronous>, transform_indices = @transform_10, window_bounds = array<i64: 1, 128>}, {pipeline_mode = #tpu.pipeline_mode<synchronous>, transform_indices = @transform_11, window_bounds = array<i64: 1, 128>}, {pipeline_mode = #tpu.pipeline_mode<synchronous>, transform_indices = @transform_12, window_bounds = array<i64: 1, 128>}, {pipeline_mode = #tpu.pipeline_mode<synchronous>, transform_indices = @transform_13, window_bounds = array<i64: 128, 128>}, {pipeline_mode = #tpu.pipeline_mode<synchronous>, transform_indices = @transform_14, window_bounds = array<i64: 1, 128>}, {pipeline_mode = #tpu.pipeline_mode<synchronous>, transform_indices = @transform_15, window_bounds = array<i64: 128, 128>}, {pipeline_mode = #tpu.pipeline_mode<synchronous>, transform_indices = @transform_16, window_bounds = array<i64: 1, 128>}, {pipeline_mode = #tpu.pipeline_mode<synchronous>, transform_indices = @transform_17, window_bounds = array<i64: 1, 128>}, {pipeline_mode = #tpu.pipeline_mode<synchronous>, transform_indices = @transform_18, window_bounds = array<i64: 1, 128>}, {pipeline_mode = #tpu.pipeline_mode<synchronous>, transform_indices = @transform_19, window_bounds = array<i64: 88, 1>}, {pipeline_mode = #tpu.pipeline_mode<synchronous>, transform_indices = @transform_20, window_bounds = array<i64: 88, 1>}, {pipeline_mode = #tpu.pipeline_mode<synchronous>, transform_indices = @transform_21, window_bounds = array<i64: 88, 1>}, {pipeline_mode = #tpu.pipeline_mode<synchronous>, transform_indices = @transform_22, window_bounds = array<i64: 88, 1>}, {transform_indices = @transform_23, window_bounds = array<i64: 1>}, {transform_indices = @transform_24, window_bounds = array<i64: 10>}, {transform_indices = @transform_25, window_bounds = array<i64: 1, 1, 1>}]} {
    %c0 = arith.constant 0 : index
    %c0_0 = arith.constant 0 : index
    %c0_1 = arith.constant 0 : index
    %0 = vector.load %arg3[%c0, %c0_0, %c0_1] : memref<1x8x1xf32, #tpu.memory_space<vmem>>, vector<1x8x1xf32>
    %c0_2 = arith.constant 0 : index
    %c0_3 = arith.constant 0 : index
    %c0_4 = arith.constant 0 : index
    %1 = vector.load %arg5[%c0_2, %c0_3, %c0_4] : memref<1x16x1xf32, #tpu.memory_space<vmem>>, vector<1x16x1xf32>
    %c0_5 = arith.constant 0 : index
    %c0_6 = arith.constant 0 : index
    %c0_7 = arith.constant 0 : index
    %2 = vector.load %arg1[%c0_5, %c0_6, %c0_7] : memref<1x8x128xf32, #tpu.memory_space<vmem>>, vector<1x8x128xf32>
    %3 = vector.broadcast %0 : vector<1x8x1xf32> to vector<1x8x128xf32>
    %4 = arith.mulf %2, %3 : vector<1x8x128xf32>
    %5 = vector.shape_cast %4 : vector<1x8x128xf32> to vector<8x128xf32>
    %c0_8 = arith.constant 0 : index
    %c0_9 = arith.constant 0 : index
    %c0_10 = arith.constant 0 : index
    %6 = vector.load %arg2[%c0_8, %c0_9, %c0_10] : memref<1x16x128xf32, #tpu.memory_space<vmem>>, vector<1x16x128xf32>
    %7 = vector.broadcast %1 : vector<1x16x1xf32> to vector<1x16x128xf32>
    %8 = arith.mulf %6, %7 : vector<1x16x128xf32>
    %9 = vector.shape_cast %8 : vector<1x16x128xf32> to vector<16x128xf32>
    %10 = tpu.concatenate %5, %9 in 0 : vector<8x128xf32>, vector<16x128xf32> -> vector<24x128xf32>
    %11 = vector.shape_cast %0 : vector<1x8x1xf32> to vector<8x1xf32>
    %12 = vector.shape_cast %1 : vector<1x16x1xf32> to vector<16x1xf32>
    %13 = tpu.concatenate %11, %12 in 0 : vector<8x1xf32>, vector<16x1xf32> -> vector<24x1xf32>
    %c0_11 = arith.constant 0 : index
    %c0_12 = arith.constant 0 : index
    %14 = vector.load %arg8[%c0_11, %c0_12] : memref<128x768xf32, #tpu.memory_space<vmem>>, vector<128x768xf32>
    %cst = arith.constant dense<0.000000e+00> : vector<24x768xf32>
    %15 = tpu.matmul %10, %14, %cst {dimension_numbers = #tpu.dot_dimension_numbers<[1], [0], [0], [1], [0, 0, 1, 1], [], []>} : vector<24x128xf32>, vector<128x768xf32>, vector<24x768xf32> -> vector<24x768xf32>
    %c0_13 = arith.constant 0 : index
    %c0_14 = arith.constant 0 : index
    %16 = vector.load %arg9[%c0_13, %c0_14] : memref<1x768xf32, #tpu.memory_space<vmem>>, vector<1x768xf32>
    %17 = vector.broadcast %16 : vector<1x768xf32> to vector<24x768xf32>
    %18 = arith.addf %15, %17 : vector<24x768xf32>
    %c0_15 = arith.constant 0 : index
    %c0_16 = arith.constant 0 : index
    %c0_17 = arith.constant 0 : index
    %19 = vector.load %arg4[%c0_15, %c0_16, %c0_17] : memref<1x1x8xf32, #tpu.memory_space<vmem>>, vector<1x1x8xf32>
    %20 = vector.shape_cast %19 : vector<1x1x8xf32> to vector<1x8xf32>
    %cst_18 = arith.constant 0.000000e+00 : f32
    %21 = vector.broadcast %cst_18 : f32 to vector<1x8xf32>
    %22 = arith.cmpf ogt, %20, %21 : vector<1x8xf32>
    %cst_19 = arith.constant 0.000000e+00 : f32
    %cst_20 = arith.constant -1.000000e+30 : f32
    %23 = vector.broadcast %cst_19 : f32 to vector<1x8xf32>
    %24 = vector.broadcast %cst_20 : f32 to vector<1x8xf32>
    %25 = arith.select %22, %23, %24 : vector<1x8xi1>, vector<1x8xf32>
    %26 = vector.extract_strided_slice %18 {offsets = [0, 0], sizes = [8, 128], strides = [1, 1]} : vector<24x768xf32> to vector<8x128xf32>
    %27 = vector.extract_strided_slice %18 {offsets = [0, 256], sizes = [8, 128], strides = [1, 1]} : vector<24x768xf32> to vector<8x128xf32>
    %28 = vector.extract_strided_slice %18 {offsets = [0, 512], sizes = [8, 128], strides = [1, 1]} : vector<24x768xf32> to vector<8x128xf32>
    %cst_21 = arith.constant dense<0.000000e+00> : vector<8x8xf32>
    %29 = tpu.matmul %26, %27, %cst_21 {dimension_numbers = #tpu.dot_dimension_numbers<[1], [1], [0], [0], [0, 0, 1, 0], [], []>} : vector<8x128xf32>, vector<8x128xf32>, vector<8x8xf32> -> vector<8x8xf32>
    %cst_22 = arith.constant 2.500000e-01 : f32
    %30 = vector.broadcast %cst_22 : f32 to vector<8x8xf32>
    %31 = arith.mulf %29, %30 : vector<8x8xf32>
    %32 = vector.broadcast %25 : vector<1x8xf32> to vector<8x8xf32>
    %33 = arith.addf %31, %32 : vector<8x8xf32>
    %cst_23 = arith.constant dense<0xFF800000> : vector<8xf32>
    %34 = vector.multi_reduction <maximumf>, %33, %cst_23 [1] : vector<8x8xf32> to vector<8xf32>
    %35 = vector.shape_cast %34 : vector<8xf32> to vector<8x1xf32>
    %36 = vector.broadcast %35 : vector<8x1xf32> to vector<8x8xf32>
    %37 = arith.subf %33, %36 : vector<8x8xf32>
    %38 = math.exp %37 : vector<8x8xf32>
    %cst_24 = arith.constant dense<0.000000e+00> : vector<8xf32>
    %39 = vector.multi_reduction <add>, %38, %cst_24 [1] : vector<8x8xf32> to vector<8xf32>
    %40 = vector.shape_cast %39 : vector<8xf32> to vector<8x1xf32>
    %41 = tpu.reciprocal %40 {approx = true} : vector<8x1xf32> -> vector<8x1xf32>
    %42 = vector.broadcast %41 : vector<8x1xf32> to vector<8x8xf32>
    %43 = arith.mulf %38, %42 : vector<8x8xf32>
    %cst_25 = arith.constant dense<0.000000e+00> : vector<8x128xf32>
    %44 = tpu.matmul %43, %28, %cst_25 {dimension_numbers = #tpu.dot_dimension_numbers<[1], [0], [0], [1], [0, 0, 1, 1], [], []>} : vector<8x8xf32>, vector<8x128xf32>, vector<8x128xf32> -> vector<8x128xf32>
    %45 = vector.extract_strided_slice %18 {offsets = [0, 128], sizes = [8, 128], strides = [1, 1]} : vector<24x768xf32> to vector<8x128xf32>
    %46 = vector.extract_strided_slice %18 {offsets = [0, 384], sizes = [8, 128], strides = [1, 1]} : vector<24x768xf32> to vector<8x128xf32>
    %47 = vector.extract_strided_slice %18 {offsets = [0, 640], sizes = [8, 128], strides = [1, 1]} : vector<24x768xf32> to vector<8x128xf32>
    %cst_26 = arith.constant dense<0.000000e+00> : vector<8x8xf32>
    %48 = tpu.matmul %45, %46, %cst_26 {dimension_numbers = #tpu.dot_dimension_numbers<[1], [1], [0], [0], [0, 0, 1, 0], [], []>} : vector<8x128xf32>, vector<8x128xf32>, vector<8x8xf32> -> vector<8x8xf32>
    %cst_27 = arith.constant 2.500000e-01 : f32
    %49 = vector.broadcast %cst_27 : f32 to vector<8x8xf32>
    %50 = arith.mulf %48, %49 : vector<8x8xf32>
    %51 = vector.broadcast %25 : vector<1x8xf32> to vector<8x8xf32>
    %52 = arith.addf %50, %51 : vector<8x8xf32>
    %cst_28 = arith.constant dense<0xFF800000> : vector<8xf32>
    %53 = vector.multi_reduction <maximumf>, %52, %cst_28 [1] : vector<8x8xf32> to vector<8xf32>
    %54 = vector.shape_cast %53 : vector<8xf32> to vector<8x1xf32>
    %55 = vector.broadcast %54 : vector<8x1xf32> to vector<8x8xf32>
    %56 = arith.subf %52, %55 : vector<8x8xf32>
    %57 = math.exp %56 : vector<8x8xf32>
    %cst_29 = arith.constant dense<0.000000e+00> : vector<8xf32>
    %58 = vector.multi_reduction <add>, %57, %cst_29 [1] : vector<8x8xf32> to vector<8xf32>
    %59 = vector.shape_cast %58 : vector<8xf32> to vector<8x1xf32>
    %60 = tpu.reciprocal %59 {approx = true} : vector<8x1xf32> -> vector<8x1xf32>
    %61 = vector.broadcast %60 : vector<8x1xf32> to vector<8x8xf32>
    %62 = arith.mulf %57, %61 : vector<8x8xf32>
    %cst_30 = arith.constant dense<0.000000e+00> : vector<8x128xf32>
    %63 = tpu.matmul %62, %47, %cst_30 {dimension_numbers = #tpu.dot_dimension_numbers<[1], [0], [0], [1], [0, 0, 1, 1], [], []>} : vector<8x8xf32>, vector<8x128xf32>, vector<8x128xf32> -> vector<8x128xf32>
    %64 = tpu.concatenate %44, %63 in 1 : vector<8x128xf32>, vector<8x128xf32> -> vector<8x256xf32>
    %c0_31 = arith.constant 0 : index
    %c0_32 = arith.constant 0 : index
    %c0_33 = arith.constant 0 : index
    %65 = vector.load %arg6[%c0_31, %c0_32, %c0_33] : memref<1x1x16xf32, #tpu.memory_space<vmem>>, vector<1x1x16xf32>
    %66 = vector.shape_cast %65 : vector<1x1x16xf32> to vector<1x16xf32>
    %cst_34 = arith.constant 0.000000e+00 : f32
    %67 = vector.broadcast %cst_34 : f32 to vector<1x16xf32>
    %68 = arith.cmpf ogt, %66, %67 : vector<1x16xf32>
    %cst_35 = arith.constant 0.000000e+00 : f32
    %cst_36 = arith.constant -1.000000e+30 : f32
    %69 = vector.broadcast %cst_35 : f32 to vector<1x16xf32>
    %70 = vector.broadcast %cst_36 : f32 to vector<1x16xf32>
    %71 = arith.select %68, %69, %70 : vector<1x16xi1>, vector<1x16xf32>
    %72 = vector.extract_strided_slice %18 {offsets = [8, 0], sizes = [16, 128], strides = [1, 1]} : vector<24x768xf32> to vector<16x128xf32>
    %73 = vector.extract_strided_slice %18 {offsets = [8, 256], sizes = [16, 128], strides = [1, 1]} : vector<24x768xf32> to vector<16x128xf32>
    %74 = vector.extract_strided_slice %18 {offsets = [8, 512], sizes = [16, 128], strides = [1, 1]} : vector<24x768xf32> to vector<16x128xf32>
    %cst_37 = arith.constant dense<0.000000e+00> : vector<16x16xf32>
    %75 = tpu.matmul %72, %73, %cst_37 {dimension_numbers = #tpu.dot_dimension_numbers<[1], [1], [0], [0], [0, 0, 1, 0], [], []>} : vector<16x128xf32>, vector<16x128xf32>, vector<16x16xf32> -> vector<16x16xf32>
    %cst_38 = arith.constant 2.500000e-01 : f32
    %76 = vector.broadcast %cst_38 : f32 to vector<16x16xf32>
    %77 = arith.mulf %75, %76 : vector<16x16xf32>
    %78 = vector.broadcast %71 : vector<1x16xf32> to vector<16x16xf32>
    %79 = arith.addf %77, %78 : vector<16x16xf32>
    %cst_39 = arith.constant dense<0xFF800000> : vector<16xf32>
    %80 = vector.multi_reduction <maximumf>, %79, %cst_39 [1] : vector<16x16xf32> to vector<16xf32>
    %81 = vector.shape_cast %80 : vector<16xf32> to vector<16x1xf32>
    %82 = vector.broadcast %81 : vector<16x1xf32> to vector<16x16xf32>
    %83 = arith.subf %79, %82 : vector<16x16xf32>
    %84 = math.exp %83 : vector<16x16xf32>
    %cst_40 = arith.constant dense<0.000000e+00> : vector<16xf32>
    %85 = vector.multi_reduction <add>, %84, %cst_40 [1] : vector<16x16xf32> to vector<16xf32>
    %86 = vector.shape_cast %85 : vector<16xf32> to vector<16x1xf32>
    %87 = tpu.reciprocal %86 {approx = true} : vector<16x1xf32> -> vector<16x1xf32>
    %88 = vector.broadcast %87 : vector<16x1xf32> to vector<16x16xf32>
    %89 = arith.mulf %84, %88 : vector<16x16xf32>
    %cst_41 = arith.constant dense<0.000000e+00> : vector<16x128xf32>
    %90 = tpu.matmul %89, %74, %cst_41 {dimension_numbers = #tpu.dot_dimension_numbers<[1], [0], [0], [1], [0, 0, 1, 1], [], []>} : vector<16x16xf32>, vector<16x128xf32>, vector<16x128xf32> -> vector<16x128xf32>
    %91 = vector.extract_strided_slice %18 {offsets = [8, 128], sizes = [16, 128], strides = [1, 1]} : vector<24x768xf32> to vector<16x128xf32>
    %92 = vector.extract_strided_slice %18 {offsets = [8, 384], sizes = [16, 128], strides = [1, 1]} : vector<24x768xf32> to vector<16x128xf32>
    %93 = vector.extract_strided_slice %18 {offsets = [8, 640], sizes = [16, 128], strides = [1, 1]} : vector<24x768xf32> to vector<16x128xf32>
    %cst_42 = arith.constant dense<0.000000e+00> : vector<16x16xf32>
    %94 = tpu.matmul %91, %92, %cst_42 {dimension_numbers = #tpu.dot_dimension_numbers<[1], [1], [0], [0], [0, 0, 1, 0], [], []>} : vector<16x128xf32>, vector<16x128xf32>, vector<16x16xf32> -> vector<16x16xf32>
    %cst_43 = arith.constant 2.500000e-01 : f32
    %95 = vector.broadcast %cst_43 : f32 to vector<16x16xf32>
    %96 = arith.mulf %94, %95 : vector<16x16xf32>
    %97 = vector.broadcast %71 : vector<1x16xf32> to vector<16x16xf32>
    %98 = arith.addf %96, %97 : vector<16x16xf32>
    %cst_44 = arith.constant dense<0xFF800000> : vector<16xf32>
    %99 = vector.multi_reduction <maximumf>, %98, %cst_44 [1] : vector<16x16xf32> to vector<16xf32>
    %100 = vector.shape_cast %99 : vector<16xf32> to vector<16x1xf32>
    %101 = vector.broadcast %100 : vector<16x1xf32> to vector<16x16xf32>
    %102 = arith.subf %98, %101 : vector<16x16xf32>
    %103 = math.exp %102 : vector<16x16xf32>
    %cst_45 = arith.constant dense<0.000000e+00> : vector<16xf32>
    %104 = vector.multi_reduction <add>, %103, %cst_45 [1] : vector<16x16xf32> to vector<16xf32>
    %105 = vector.shape_cast %104 : vector<16xf32> to vector<16x1xf32>
    %106 = tpu.reciprocal %105 {approx = true} : vector<16x1xf32> -> vector<16x1xf32>
    %107 = vector.broadcast %106 : vector<16x1xf32> to vector<16x16xf32>
    %108 = arith.mulf %103, %107 : vector<16x16xf32>
    %cst_46 = arith.constant dense<0.000000e+00> : vector<16x128xf32>
    %109 = tpu.matmul %108, %93, %cst_46 {dimension_numbers = #tpu.dot_dimension_numbers<[1], [0], [0], [1], [0, 0, 1, 1], [], []>} : vector<16x16xf32>, vector<16x128xf32>, vector<16x128xf32> -> vector<16x128xf32>
    %110 = tpu.concatenate %90, %109 in 1 : vector<16x128xf32>, vector<16x128xf32> -> vector<16x256xf32>
    %111 = tpu.concatenate %64, %110 in 0 : vector<8x256xf32>, vector<16x256xf32> -> vector<24x256xf32>
    %c0_47 = arith.constant 0 : index
    %c0_48 = arith.constant 0 : index
    %112 = vector.load %arg10[%c0_47, %c0_48] : memref<256x128xf32, #tpu.memory_space<vmem>>, vector<256x128xf32>
    %cst_49 = arith.constant dense<0.000000e+00> : vector<24x128xf32>
    %113 = tpu.matmul %111, %112, %cst_49 {dimension_numbers = #tpu.dot_dimension_numbers<[1], [0], [0], [1], [0, 0, 1, 1], [], []>} : vector<24x256xf32>, vector<256x128xf32>, vector<24x128xf32> -> vector<24x128xf32>
    %c0_50 = arith.constant 0 : index
    %c0_51 = arith.constant 0 : index
    %114 = vector.load %arg11[%c0_50, %c0_51] : memref<1x128xf32, #tpu.memory_space<vmem>>, vector<1x128xf32>
    %115 = vector.broadcast %114 : vector<1x128xf32> to vector<24x128xf32>
    %116 = arith.addf %113, %115 : vector<24x128xf32>
    %117 = arith.addf %10, %116 : vector<24x128xf32>
    %c0_52 = arith.constant 0 : index
    %c0_53 = arith.constant 0 : index
    %118 = vector.load %arg12[%c0_52, %c0_53] : memref<1x128xf32, #tpu.memory_space<vmem>>, vector<1x128xf32>
    %c0_54 = arith.constant 0 : index
    %c0_55 = arith.constant 0 : index
    %119 = vector.load %arg13[%c0_54, %c0_55] : memref<1x128xf32, #tpu.memory_space<vmem>>, vector<1x128xf32>
    %cst_56 = arith.constant dense<0.000000e+00> : vector<24xf32>
    %120 = vector.multi_reduction <add>, %117, %cst_56 [1] : vector<24x128xf32> to vector<24xf32>
    %121 = vector.shape_cast %120 : vector<24xf32> to vector<24x1xf32>
    %cst_57 = arith.constant 3.125000e-02 : f32
    %122 = vector.broadcast %cst_57 : f32 to vector<24x1xf32>
    %123 = arith.mulf %121, %122 : vector<24x1xf32>
    %124 = arith.mulf %117, %117 : vector<24x128xf32>
    %cst_58 = arith.constant dense<0.000000e+00> : vector<24xf32>
    %125 = vector.multi_reduction <add>, %124, %cst_58 [1] : vector<24x128xf32> to vector<24xf32>
    %126 = vector.shape_cast %125 : vector<24xf32> to vector<24x1xf32>
    %cst_59 = arith.constant 3.125000e-02 : f32
    %127 = vector.broadcast %cst_59 : f32 to vector<24x1xf32>
    %128 = arith.mulf %126, %127 : vector<24x1xf32>
    %129 = arith.mulf %123, %123 : vector<24x1xf32>
    %130 = arith.subf %128, %129 : vector<24x1xf32>
    %131 = vector.broadcast %123 : vector<24x1xf32> to vector<24x128xf32>
    %132 = arith.subf %117, %131 : vector<24x128xf32>
    %cst_60 = arith.constant 9.99999974E-6 : f32
    %133 = vector.broadcast %cst_60 : f32 to vector<24x1xf32>
    %134 = arith.addf %130, %133 : vector<24x1xf32>
    %135 = math.rsqrt %134 : vector<24x1xf32>
    %136 = vector.broadcast %135 : vector<24x1xf32> to vector<24x128xf32>
    %137 = arith.mulf %132, %136 : vector<24x128xf32>
    %138 = vector.broadcast %118 : vector<1x128xf32> to vector<24x128xf32>
    %139 = arith.mulf %137, %138 : vector<24x128xf32>
    %140 = vector.broadcast %119 : vector<1x128xf32> to vector<24x128xf32>
    %141 = arith.addf %139, %140 : vector<24x128xf32>
    %c0_61 = arith.constant 0 : index
    %c0_62 = arith.constant 0 : index
    %142 = vector.load %arg14[%c0_61, %c0_62] : memref<128x128xf32, #tpu.memory_space<vmem>>, vector<128x128xf32>
    %cst_63 = arith.constant dense<0.000000e+00> : vector<24x128xf32>
    %143 = tpu.matmul %141, %142, %cst_63 {dimension_numbers = #tpu.dot_dimension_numbers<[1], [0], [0], [1], [0, 0, 1, 1], [], []>} : vector<24x128xf32>, vector<128x128xf32>, vector<24x128xf32> -> vector<24x128xf32>
    %c0_64 = arith.constant 0 : index
    %c0_65 = arith.constant 0 : index
    %144 = vector.load %arg15[%c0_64, %c0_65] : memref<1x128xf32, #tpu.memory_space<vmem>>, vector<1x128xf32>
    %145 = vector.broadcast %144 : vector<1x128xf32> to vector<24x128xf32>
    %146 = arith.addf %143, %145 : vector<24x128xf32>
    %cst_66 = arith.constant 0.000000e+00 : f32
    %147 = vector.broadcast %cst_66 : f32 to vector<24x128xf32>
    %148 = arith.maximumf %146, %147 : vector<24x128xf32>
    %c0_67 = arith.constant 0 : index
    %c0_68 = arith.constant 0 : index
    %149 = vector.load %arg16[%c0_67, %c0_68] : memref<128x128xf32, #tpu.memory_space<vmem>>, vector<128x128xf32>
    %cst_69 = arith.constant dense<0.000000e+00> : vector<24x128xf32>
    %150 = tpu.matmul %148, %149, %cst_69 {dimension_numbers = #tpu.dot_dimension_numbers<[1], [0], [0], [1], [0, 0, 1, 1], [], []>} : vector<24x128xf32>, vector<128x128xf32>, vector<24x128xf32> -> vector<24x128xf32>
    %c0_70 = arith.constant 0 : index
    %c0_71 = arith.constant 0 : index
    %151 = vector.load %arg17[%c0_70, %c0_71] : memref<1x128xf32, #tpu.memory_space<vmem>>, vector<1x128xf32>
    %152 = vector.broadcast %151 : vector<1x128xf32> to vector<24x128xf32>
    %153 = arith.addf %150, %152 : vector<24x128xf32>
    %154 = arith.addf %141, %153 : vector<24x128xf32>
    %c0_72 = arith.constant 0 : index
    %c0_73 = arith.constant 0 : index
    %155 = vector.load %arg18[%c0_72, %c0_73] : memref<1x128xf32, #tpu.memory_space<vmem>>, vector<1x128xf32>
    %c0_74 = arith.constant 0 : index
    %c0_75 = arith.constant 0 : index
    %156 = vector.load %arg19[%c0_74, %c0_75] : memref<1x128xf32, #tpu.memory_space<vmem>>, vector<1x128xf32>
    %cst_76 = arith.constant dense<0.000000e+00> : vector<24xf32>
    %157 = vector.multi_reduction <add>, %154, %cst_76 [1] : vector<24x128xf32> to vector<24xf32>
    %158 = vector.shape_cast %157 : vector<24xf32> to vector<24x1xf32>
    %cst_77 = arith.constant 3.125000e-02 : f32
    %159 = vector.broadcast %cst_77 : f32 to vector<24x1xf32>
    %160 = arith.mulf %158, %159 : vector<24x1xf32>
    %161 = arith.mulf %154, %154 : vector<24x128xf32>
    %cst_78 = arith.constant dense<0.000000e+00> : vector<24xf32>
    %162 = vector.multi_reduction <add>, %161, %cst_78 [1] : vector<24x128xf32> to vector<24xf32>
    %163 = vector.shape_cast %162 : vector<24xf32> to vector<24x1xf32>
    %cst_79 = arith.constant 3.125000e-02 : f32
    %164 = vector.broadcast %cst_79 : f32 to vector<24x1xf32>
    %165 = arith.mulf %163, %164 : vector<24x1xf32>
    %166 = arith.mulf %160, %160 : vector<24x1xf32>
    %167 = arith.subf %165, %166 : vector<24x1xf32>
    %168 = vector.broadcast %160 : vector<24x1xf32> to vector<24x128xf32>
    %169 = arith.subf %154, %168 : vector<24x128xf32>
    %cst_80 = arith.constant 9.99999974E-6 : f32
    %170 = vector.broadcast %cst_80 : f32 to vector<24x1xf32>
    %171 = arith.addf %167, %170 : vector<24x1xf32>
    %172 = math.rsqrt %171 : vector<24x1xf32>
    %173 = vector.broadcast %172 : vector<24x1xf32> to vector<24x128xf32>
    %174 = arith.mulf %169, %173 : vector<24x128xf32>
    %175 = vector.broadcast %155 : vector<1x128xf32> to vector<24x128xf32>
    %176 = arith.mulf %174, %175 : vector<24x128xf32>
    %177 = vector.broadcast %156 : vector<1x128xf32> to vector<24x128xf32>
    %178 = arith.addf %176, %177 : vector<24x128xf32>
    %c0_81 = arith.constant 0 : index
    %179 = memref.load %arg24[%c0_81] : memref<1xf32, #tpu.memory_space<smem>>
    %180 = vector.broadcast %179 : f32 to vector<24x128xf32>
    %181 = arith.mulf %180, %10 : vector<24x128xf32>
    %cst_82 = arith.constant 1.000000e+00 : f32
    %182 = arith.subf %cst_82, %179 : f32
    %183 = vector.broadcast %182 : f32 to vector<24x128xf32>
    %184 = arith.mulf %183, %178 : vector<24x128xf32>
    %185 = arith.addf %181, %184 : vector<24x128xf32>
    %186 = vector.broadcast %13 : vector<24x1xf32> to vector<24x128xf32>
    %187 = arith.mulf %185, %186 : vector<24x128xf32>
    %188 = vector.extract_strided_slice %187 {offsets = [0, 0], sizes = [8, 128], strides = [1, 1]} : vector<24x128xf32> to vector<8x128xf32>
    %189 = vector.extract_strided_slice %187 {offsets = [0, 0], sizes = [8, 128], strides = [1, 1]} : vector<24x128xf32> to vector<8x128xf32>
    %190 = vector.extract_strided_slice %187 {offsets = [0, 0], sizes = [8, 128], strides = [1, 1]} : vector<24x128xf32> to vector<8x128xf32>
    %191 = arith.mulf %189, %190 : vector<8x128xf32>
    %cst_83 = arith.constant dense<0.000000e+00> : vector<8xf32>
    %192 = vector.multi_reduction <add>, %191, %cst_83 [1] : vector<8x128xf32> to vector<8xf32>
    %193 = vector.shape_cast %192 : vector<8xf32> to vector<8x1xf32>
    %cst_84 = arith.constant 9.99999988E-27 : f32
    %194 = vector.broadcast %cst_84 : f32 to vector<8x1xf32>
    %195 = arith.addf %193, %194 : vector<8x1xf32>
    %196 = math.rsqrt %195 : vector<8x1xf32>
    %197 = vector.broadcast %196 : vector<8x1xf32> to vector<8x128xf32>
    %198 = arith.mulf %188, %197 : vector<8x128xf32>
    %199 = vector.extract_strided_slice %187 {offsets = [8, 0], sizes = [16, 128], strides = [1, 1]} : vector<24x128xf32> to vector<16x128xf32>
    %200 = vector.extract_strided_slice %187 {offsets = [8, 0], sizes = [16, 128], strides = [1, 1]} : vector<24x128xf32> to vector<16x128xf32>
    %201 = vector.extract_strided_slice %187 {offsets = [8, 0], sizes = [16, 128], strides = [1, 1]} : vector<24x128xf32> to vector<16x128xf32>
    %202 = arith.mulf %200, %201 : vector<16x128xf32>
    %cst_85 = arith.constant dense<0.000000e+00> : vector<16xf32>
    %203 = vector.multi_reduction <add>, %202, %cst_85 [1] : vector<16x128xf32> to vector<16xf32>
    %204 = vector.shape_cast %203 : vector<16xf32> to vector<16x1xf32>
    %cst_86 = arith.constant 9.99999988E-27 : f32
    %205 = vector.broadcast %cst_86 : f32 to vector<16x1xf32>
    %206 = arith.addf %204, %205 : vector<16x1xf32>
    %207 = math.rsqrt %206 : vector<16x1xf32>
    %208 = vector.broadcast %207 : vector<16x1xf32> to vector<16x128xf32>
    %209 = arith.mulf %199, %208 : vector<16x128xf32>
    %c0_87 = arith.constant 0 : index
    %210 = memref.load %arg25[%c0_87] : memref<10xf32, #tpu.memory_space<smem>>
    %c1 = arith.constant 1 : index
    %211 = memref.load %arg25[%c1] : memref<10xf32, #tpu.memory_space<smem>>
    %c2 = arith.constant 2 : index
    %212 = memref.load %arg25[%c2] : memref<10xf32, #tpu.memory_space<smem>>
    %c3 = arith.constant 3 : index
    %213 = memref.load %arg25[%c3] : memref<10xf32, #tpu.memory_space<smem>>
    %c4 = arith.constant 4 : index
    %214 = memref.load %arg25[%c4] : memref<10xf32, #tpu.memory_space<smem>>
    %c5 = arith.constant 5 : index
    %215 = memref.load %arg25[%c5] : memref<10xf32, #tpu.memory_space<smem>>
    %c6 = arith.constant 6 : index
    %216 = memref.load %arg25[%c6] : memref<10xf32, #tpu.memory_space<smem>>
    %c7 = arith.constant 7 : index
    %217 = memref.load %arg25[%c7] : memref<10xf32, #tpu.memory_space<smem>>
    %c8 = arith.constant 8 : index
    %218 = memref.load %arg25[%c8] : memref<10xf32, #tpu.memory_space<smem>>
    %c9 = arith.constant 9 : index
    %219 = memref.load %arg25[%c9] : memref<10xf32, #tpu.memory_space<smem>>
    %cst_88 = arith.constant dense<0.000000e+00> : vector<1x1xf32>
    %220 = vector.multi_reduction <add>, %1, %cst_88 [1] : vector<1x16x1xf32> to vector<1x1xf32>
    %221 = vector.shape_cast %220 : vector<1x1xf32> to vector<1x1x1xf32>
    %c0_89 = arith.constant 0 : index
    %c0_90 = arith.constant 0 : index
    %c0_91 = arith.constant 0 : index
    %222 = vector.load %arg7[%c0_89, %c0_90, %c0_91] : memref<1x8x1xf32, #tpu.memory_space<vmem>>, vector<1x8x1xf32>
    %cst_92 = arith.constant 5.000000e-01 : f32
    %223 = vector.broadcast %cst_92 : f32 to vector<1x8x1xf32>
    %224 = arith.mulf %222, %223 : vector<1x8x1xf32>
    %225 = arith.negf %224 : vector<1x8x1xf32>
    %226 = math.exp %225 : vector<1x8x1xf32>
    %cst_93 = arith.constant 1.000000e+00 : f32
    %227 = vector.broadcast %cst_93 : f32 to vector<1x8x1xf32>
    %228 = arith.addf %227, %226 : vector<1x8x1xf32>
    %229 = arith.divf %227, %228 : vector<1x8x1xf32>
    %230 = vector.broadcast %210 : f32 to vector<1x8x1xf32>
    %231 = arith.mulf %229, %230 : vector<1x8x1xf32>
    %232 = vector.broadcast %211 : f32 to vector<1x1x1xf32>
    %233 = arith.mulf %221, %232 : vector<1x1x1xf32>
    %234 = vector.broadcast %233 : vector<1x1x1xf32> to vector<1x8x1xf32>
    %235 = arith.addf %231, %234 : vector<1x8x1xf32>
    %236 = vector.broadcast %212 : f32 to vector<1x8x1xf32>
    %237 = arith.addf %235, %236 : vector<1x8x1xf32>
    %238 = arith.mulf %237, %0 : vector<1x8x1xf32>
    %239 = vector.broadcast %213 : f32 to vector<1x8x1xf32>
    %240 = arith.mulf %229, %239 : vector<1x8x1xf32>
    %241 = vector.broadcast %214 : f32 to vector<1x1x1xf32>
    %242 = arith.mulf %221, %241 : vector<1x1x1xf32>
    %243 = vector.broadcast %242 : vector<1x1x1xf32> to vector<1x8x1xf32>
    %244 = arith.addf %240, %243 : vector<1x8x1xf32>
    %245 = vector.broadcast %215 : f32 to vector<1x8x1xf32>
    %246 = arith.addf %244, %245 : vector<1x8x1xf32>
    %cst_94 = arith.constant 1.000000e+00 : f32
    %247 = vector.broadcast %cst_94 : f32 to vector<1x8x1xf32>
    %248 = arith.divf %247, %246 : vector<1x8x1xf32>
    %249 = vector.broadcast %216 : f32 to vector<1x8x1xf32>
    %250 = arith.mulf %229, %249 : vector<1x8x1xf32>
    %251 = vector.broadcast %217 : f32 to vector<1x1x1xf32>
    %252 = arith.mulf %221, %251 : vector<1x1x1xf32>
    %253 = vector.broadcast %252 : vector<1x1x1xf32> to vector<1x8x1xf32>
    %254 = arith.addf %250, %253 : vector<1x8x1xf32>
    %255 = vector.broadcast %218 : f32 to vector<1x8x1xf32>
    %256 = arith.addf %254, %255 : vector<1x8x1xf32>
    %257 = arith.mulf %256, %0 : vector<1x8x1xf32>
    %c0_95 = arith.constant 0 : index
    %c0_96 = arith.constant 0 : index
    %258 = vector.load %arg20[%c0_95, %c0_96] : memref<88x1xf32, #tpu.memory_space<vmem>>, vector<88x1xf32>
    %c0_97 = arith.constant 0 : index
    %c0_98 = arith.constant 0 : index
    %259 = vector.load %arg21[%c0_97, %c0_98] : memref<88x1xf32, #tpu.memory_space<vmem>>, vector<88x1xf32>
    %c0_99 = arith.constant 0 : index
    %c0_100 = arith.constant 0 : index
    %260 = vector.load %arg22[%c0_99, %c0_100] : memref<88x1xf32, #tpu.memory_space<vmem>>, vector<88x1xf32>
    %c0_101 = arith.constant 0 : index
    %c0_102 = arith.constant 0 : index
    %261 = vector.load %arg23[%c0_101, %c0_102] : memref<88x1xf32, #tpu.memory_space<vmem>>, vector<88x1xf32>
    %cst_103 = arith.constant dense<0.000000e+00> : vector<8x16xf32>
    %262 = tpu.matmul %198, %209, %cst_103 {dimension_numbers = #tpu.dot_dimension_numbers<[1], [1], [0], [0], [0, 0, 1, 0], [], []>} : vector<8x128xf32>, vector<16x128xf32>, vector<8x16xf32> -> vector<8x16xf32>
    %c0_104 = arith.constant 0 : index
    %c0_105 = arith.constant 0 : index
    %c0_106 = arith.constant 0 : index
    %263 = vector.load %arg6[%c0_104, %c0_105, %c0_106] : memref<1x1x16xf32, #tpu.memory_space<vmem>>, vector<1x1x16xf32>
    %264 = vector.shape_cast %263 : vector<1x1x16xf32> to vector<1x16xf32>
    %cst_107 = arith.constant 0.000000e+00 : f32
    %265 = vector.broadcast %cst_107 : f32 to vector<1x16xf32>
    %266 = arith.cmpf ogt, %264, %265 : vector<1x16xf32>
    %cst_108 = arith.constant 1.000000e+04 : f32
    %267 = vector.shape_cast %266 : vector<1x16xi1> to vector<1x16xi1>
    %268 = vector.broadcast %267 : vector<1x16xi1> to vector<8x16xi1>
    %269 = vector.broadcast %cst_108 : f32 to vector<8x16xf32>
    %270 = arith.select %268, %262, %269 : vector<8x16xi1>, vector<8x16xf32>
    %271 = tpu.concatenate %270, %270, %270, %270, %270, %270, %270, %270, %270, %270, %270 in 0 : vector<8x16xf32>, vector<8x16xf32>, vector<8x16xf32>, vector<8x16xf32>, vector<8x16xf32>, vector<8x16xf32>, vector<8x16xf32>, vector<8x16xf32>, vector<8x16xf32>, vector<8x16xf32>, vector<8x16xf32> -> vector<88x16xf32>
    %272 = vector.broadcast %258 : vector<88x1xf32> to vector<88x16xf32>
    %273 = arith.subf %271, %272 : vector<88x16xf32>
    %cst_109 = arith.constant 0.000000e+00 : f32
    %274 = vector.broadcast %cst_109 : f32 to vector<88x16xf32>
    %275 = arith.subf %274, %273 : vector<88x16xf32>
    %276 = arith.mulf %275, %273 : vector<88x16xf32>
    %277 = vector.broadcast %259 : vector<88x1xf32> to vector<88x16xf32>
    %278 = arith.mulf %276, %277 : vector<88x16xf32>
    %279 = math.exp %278 : vector<88x16xf32>
    %cst_110 = arith.constant dense<0.000000e+00> : vector<88xf32>
    %280 = vector.multi_reduction <add>, %279, %cst_110 [1] : vector<88x16xf32> to vector<88xf32>
    %281 = vector.shape_cast %280 : vector<88xf32> to vector<88x1xf32>
    %282 = arith.mulf %281, %260 : vector<88x1xf32>
    %cst_111 = arith.constant 1.000000e-10 : f32
    %283 = vector.broadcast %cst_111 : f32 to vector<88x1xf32>
    %284 = arith.maximumf %282, %283 : vector<88x1xf32>
    %285 = vector.shape_cast %248 : vector<1x8x1xf32> to vector<8x1xf32>
    %286 = tpu.concatenate %285, %285, %285, %285, %285, %285, %285, %285, %285, %285, %285 in 0 : vector<8x1xf32>, vector<8x1xf32>, vector<8x1xf32>, vector<8x1xf32>, vector<8x1xf32>, vector<8x1xf32>, vector<8x1xf32>, vector<8x1xf32>, vector<8x1xf32>, vector<8x1xf32>, vector<8x1xf32> -> vector<88x1xf32>
    %287 = math.powf %284, %286 : vector<88x1xf32>
    %288 = vector.shape_cast %238 : vector<1x8x1xf32> to vector<8x1xf32>
    %289 = tpu.concatenate %288, %288, %288, %288, %288, %288, %288, %288, %288, %288, %288 in 0 : vector<8x1xf32>, vector<8x1xf32>, vector<8x1xf32>, vector<8x1xf32>, vector<8x1xf32>, vector<8x1xf32>, vector<8x1xf32>, vector<8x1xf32>, vector<8x1xf32>, vector<8x1xf32>, vector<8x1xf32> -> vector<88x1xf32>
    %290 = arith.mulf %261, %289 : vector<88x1xf32>
    %291 = arith.mulf %290, %287 : vector<88x1xf32>
    %292 = vector.shape_cast %291 : vector<88x1xf32> to vector<1x88x1xf32>
    %cst_112 = arith.constant dense<0.000000e+00> : vector<1xf32>
    %293 = vector.multi_reduction <add>, %292, %cst_112 [1, 2] : vector<1x88x1xf32> to vector<1xf32>
    %294 = vector.shape_cast %293 : vector<1xf32> to vector<1x1x1xf32>
    %295 = vector.extract %294[0, 0, 0] : f32 from vector<1x1x1xf32>
    %296 = vector.shape_cast %257 : vector<1x8x1xf32> to vector<8x1xf32>
    %297 = vector.shape_cast %296 : vector<8x1xf32> to vector<1x8x1xf32>
    %cst_113 = arith.constant dense<0.000000e+00> : vector<1xf32>
    %298 = vector.multi_reduction <add>, %297, %cst_113 [1, 2] : vector<1x8x1xf32> to vector<1xf32>
    %299 = vector.shape_cast %298 : vector<1xf32> to vector<1x1x1xf32>
    %300 = vector.extract %299[0, 0, 0] : f32 from vector<1x1x1xf32>
    %301 = arith.mulf %219, %300 : f32
    %302 = arith.subf %295, %301 : f32
    %303 = vector.broadcast %302 : f32 to vector<1x1x1xf32>
    %c0_114 = arith.constant 0 : index
    %c0_115 = arith.constant 0 : index
    %c0_116 = arith.constant 0 : index
    %304 = vector.load %arg26[%c0_114, %c0_115, %c0_116] : memref<1x1x1xf32, #tpu.memory_space<vmem>>, vector<1x1x1xf32>
    tpu.vector_store %arg26[%c0_114, %c0_115, %c0_116], %303 {strides = array<i32>} : memref<1x1x1xf32, #tpu.memory_space<vmem>>, vector<1x1x1xf32>,
    return
  }
  func.func @transform_0(%arg0: i32) -> (i32, i32, i32) {
    %c0_i32 = arith.constant 0 : i32
    %c0_i32_0 = arith.constant 0 : i32
    %c0_i32_1 = arith.constant 0 : i32
    return %arg0, %c0_i32, %c0_i32_0 : i32, i32, i32
  }
  func.func @transform_1(%arg0: i32) -> (i32, i32, i32) {
    %c0_i32 = arith.constant 0 : i32
    %c0_i32_0 = arith.constant 0 : i32
    %c0_i32_1 = arith.constant 0 : i32
    return %arg0, %c0_i32, %c0_i32_0 : i32, i32, i32
  }
  func.func @transform_2(%arg0: i32) -> (i32, i32, i32) {
    %c0_i32 = arith.constant 0 : i32
    %c0_i32_0 = arith.constant 0 : i32
    %c0_i32_1 = arith.constant 0 : i32
    return %arg0, %c0_i32, %c0_i32_0 : i32, i32, i32
  }
  func.func @transform_3(%arg0: i32) -> (i32, i32, i32) {
    %c0_i32 = arith.constant 0 : i32
    %c0_i32_0 = arith.constant 0 : i32
    %c0_i32_1 = arith.constant 0 : i32
    return %arg0, %c0_i32, %c0_i32_0 : i32, i32, i32
  }
  func.func @transform_4(%arg0: i32) -> (i32, i32, i32) {
    %c0_i32 = arith.constant 0 : i32
    %c0_i32_0 = arith.constant 0 : i32
    %c0_i32_1 = arith.constant 0 : i32
    return %arg0, %c0_i32, %c0_i32_0 : i32, i32, i32
  }
  func.func @transform_5(%arg0: i32) -> (i32, i32, i32) {
    %c0_i32 = arith.constant 0 : i32
    %c0_i32_0 = arith.constant 0 : i32
    %c0_i32_1 = arith.constant 0 : i32
    return %arg0, %c0_i32, %c0_i32_0 : i32, i32, i32
  }
  func.func @transform_6(%arg0: i32) -> (i32, i32, i32) {
    %c0_i32 = arith.constant 0 : i32
    %c0_i32_0 = arith.constant 0 : i32
    %c0_i32_1 = arith.constant 0 : i32
    return %arg0, %c0_i32, %c0_i32_0 : i32, i32, i32
  }
  func.func @transform_7(%arg0: i32) -> (i32, i32) {
    %c0_i32 = arith.constant 0 : i32
    %c0_i32_0 = arith.constant 0 : i32
    %c0_i32_1 = arith.constant 0 : i32
    return %c0_i32, %c0_i32_0 : i32, i32
  }
  func.func @transform_8(%arg0: i32) -> (i32, i32) {
    %c0_i32 = arith.constant 0 : i32
    %c0_i32_0 = arith.constant 0 : i32
    %c0_i32_1 = arith.constant 0 : i32
    return %c0_i32, %c0_i32_0 : i32, i32
  }
  func.func @transform_9(%arg0: i32) -> (i32, i32) {
    %c0_i32 = arith.constant 0 : i32
    %c0_i32_0 = arith.constant 0 : i32
    %c0_i32_1 = arith.constant 0 : i32
    return %c0_i32, %c0_i32_0 : i32, i32
  }
  func.func @transform_10(%arg0: i32) -> (i32, i32) {
    %c0_i32 = arith.constant 0 : i32
    %c0_i32_0 = arith.constant 0 : i32
    %c0_i32_1 = arith.constant 0 : i32
    return %c0_i32, %c0_i32_0 : i32, i32
  }
  func.func @transform_11(%arg0: i32) -> (i32, i32) {
    %c0_i32 = arith.constant 0 : i32
    %c0_i32_0 = arith.constant 0 : i32
    %c0_i32_1 = arith.constant 0 : i32
    return %c0_i32, %c0_i32_0 : i32, i32
  }
  func.func @transform_12(%arg0: i32) -> (i32, i32) {
    %c0_i32 = arith.constant 0 : i32
    %c0_i32_0 = arith.constant 0 : i32
    %c0_i32_1 = arith.constant 0 : i32
    return %c0_i32, %c0_i32_0 : i32, i32
  }
  func.func @transform_13(%arg0: i32) -> (i32, i32) {
    %c0_i32 = arith.constant 0 : i32
    %c0_i32_0 = arith.constant 0 : i32
    %c0_i32_1 = arith.constant 0 : i32
    return %c0_i32, %c0_i32_0 : i32, i32
  }
  func.func @transform_14(%arg0: i32) -> (i32, i32) {
    %c0_i32 = arith.constant 0 : i32
    %c0_i32_0 = arith.constant 0 : i32
    %c0_i32_1 = arith.constant 0 : i32
    return %c0_i32, %c0_i32_0 : i32, i32
  }
  func.func @transform_15(%arg0: i32) -> (i32, i32) {
    %c0_i32 = arith.constant 0 : i32
    %c0_i32_0 = arith.constant 0 : i32
    %c0_i32_1 = arith.constant 0 : i32
    return %c0_i32, %c0_i32_0 : i32, i32
  }
  func.func @transform_16(%arg0: i32) -> (i32, i32) {
    %c0_i32 = arith.constant 0 : i32
    %c0_i32_0 = arith.constant 0 : i32
    %c0_i32_1 = arith.constant 0 : i32
    return %c0_i32, %c0_i32_0 : i32, i32
  }
  func.func @transform_17(%arg0: i32) -> (i32, i32) {
    %c0_i32 = arith.constant 0 : i32
    %c0_i32_0 = arith.constant 0 : i32
    %c0_i32_1 = arith.constant 0 : i32
    return %c0_i32, %c0_i32_0 : i32, i32
  }
  func.func @transform_18(%arg0: i32) -> (i32, i32) {
    %c0_i32 = arith.constant 0 : i32
    %c0_i32_0 = arith.constant 0 : i32
    %c0_i32_1 = arith.constant 0 : i32
    return %c0_i32, %c0_i32_0 : i32, i32
  }
  func.func @transform_19(%arg0: i32) -> (i32, i32) {
    %c0_i32 = arith.constant 0 : i32
    %c0_i32_0 = arith.constant 0 : i32
    %c0_i32_1 = arith.constant 0 : i32
    return %c0_i32, %c0_i32_0 : i32, i32
  }
  func.func @transform_20(%arg0: i32) -> (i32, i32) {
    %c0_i32 = arith.constant 0 : i32
    %c0_i32_0 = arith.constant 0 : i32
    %c0_i32_1 = arith.constant 0 : i32
    return %c0_i32, %c0_i32_0 : i32, i32
  }
  func.func @transform_21(%arg0: i32) -> (i32, i32) {
    %c0_i32 = arith.constant 0 : i32
    %c0_i32_0 = arith.constant 0 : i32
    %c0_i32_1 = arith.constant 0 : i32
    return %c0_i32, %c0_i32_0 : i32, i32
  }
  func.func @transform_22(%arg0: i32) -> (i32, i32) {
    %c0_i32 = arith.constant 0 : i32
    %c0_i32_0 = arith.constant 0 : i32
    %c0_i32_1 = arith.constant 0 : i32
    return %c0_i32, %c0_i32_0 : i32, i32
  }
  func.func @transform_23(%arg0: i32) -> i32 {
    %c0_i32 = arith.constant 0 : i32
    %c0_i32_0 = arith.constant 0 : i32
    return %c0_i32 : i32
  }
  func.func @transform_24(%arg0: i32) -> i32 {
    %c0_i32 = arith.constant 0 : i32
    %c0_i32_0 = arith.constant 0 : i32
    return %c0_i32 : i32
  }
  func.func @transform_25(%arg0: i32) -> (i32, i32, i32) {
    %c0_i32 = arith.constant 0 : i32
    %c0_i32_0 = arith.constant 0 : i32
    %c0_i32_1 = arith.constant 0 : i32
    return %arg0, %c0_i32, %c0_i32_0 : i32, i32, i32
  }
}

</mosaic_0001>

<bundles_post_ra>
// kernel: tpu_custom_call.1
= control target key start
LH: loop header
LB: loop body
LE: loop exit
PB: predicated region body
PF: predicated region fallthrough
CT: control target
= control target key end

     0   :  { %s5993_s0 = inlined_call_operand.vmem [shape: f32[2,8,128], index: 0, kind: input, shape index: {}]   ;;  %s5994_s1 = inlined_call_operand.vmem [shape: f32[2,16,128], index: 1, kind: input, shape index: {}]   ;;  %s5995_s2 = inlined_call_operand.vmem [shape: f32[2,8,1], index: 2, kind: input, shape index: {}]   ;;  %s5996_s3 = inlined_call_operand.vmem [shape: f32[2,1,8], index: 3, kind: input, shape index: {}]   ;;  %s5997_s4 = inlined_call_operand.vmem [shape: f32[2,16,1], index: 4, kind: input, shape index: {}]   ;;  %s5998_s5 = inlined_call_operand.vmem [shape: f32[2,1,16], index: 5, kind: input, shape index: {}]   ;;  %s5999_s6 = inlined_call_operand.vmem [shape: f32[2,8,1], index: 6, kind: input, shape index: {}]   ;;  %s6000_s7 = inlined_call_operand.hbm [shape: f32[128,768], index: 7, kind: input, shape index: {}]   ;;  %s6001_s8 = inlined_call_operand.vmem [shape: f32[1,768], index: 8, kind: input, shape index: {}]   ;;  %s6002_s9 = inlined_call_operand.hbm [shape: f32[256,128], index: 9, kind: input, shape index: {}]   ;;  %s6003_s10 = inlined_call_operand.vmem [shape: f32[1,128], index: 10, kind: input, shape index: {}]   ;;  %s6004_s11 = inlined_call_operand.vmem [shape: f32[1,128], index: 11, kind: input, shape index: {}]   ;;  %s6005_s12 = inlined_call_operand.vmem [shape: f32[1,128], index: 12, kind: input, shape index: {}]   ;;  %s6006_s13 = inlined_call_operand.vmem [shape: f32[128,128], index: 13, kind: input, shape index: {}]   ;;  %s6007_s14 = inlined_call_operand.vmem [shape: f32[1,128], index: 14, kind: input, shape index: {}]   ;;  %s6008_s15 = inlined_call_operand.vmem [shape: f32[128,128], index: 15, kind: input, shape index: {}]   ;;  %s6009_s16 = inlined_call_operand.vmem [shape: f32[1,128], index: 16, kind: input, shape index: {}]   ;;  %s6010_s17 = inlined_call_operand.vmem [shape: f32[1,128], index: 17, kind: input, shape index: {}]   ;;  %s6011_s18 = inlined_call_operand.vmem [shape: f32[1,128], index: 18, kind: input, shape index: {}]   ;;  %s6012_s19 = inlined_call_operand.vmem [shape: f32[88,1], index: 19, kind: input, shape index: {}]   ;;  %s6013_s20 = inlined_call_operand.vmem [shape: f32[88,1], index: 20, kind: input, shape index: {}]   ;;  %s6014_s21 = inlined_call_operand.vmem [shape: f32[88,1], index: 21, kind: input, shape index: {}]   ;;  %s6015_s22 = inlined_call_operand.vmem [shape: f32[88,1], index: 22, kind: input, shape index: {}]   ;;  %s6016_s23 = inlined_call_operand.<no memory space> [shape: f32[1], index: 23, kind: input, shape index: {}]   ;;  %s6017_s24 = inlined_call_operand.vmem [shape: f32[10], index: 24, kind: input, shape index: {}]   ;;  %s6018_s25 = inlined_call_operand.vmem [shape: f32[2,1,1], index: 25, kind: output, shape index: {}]  }
   0x1   :  { %6037 = sst [smem:[#allocation13_spill]] %s5993_s0 }
   0x2   :  { %6038 = sst [smem:[#allocation14_spill]] %s5994_s1 }
   0x3   :  { %6039 = sst [smem:[#allocation15_spill]] %s5995_s2 }
   0x4   :  { %6040 = sst [smem:[#allocation16_spill]] %s5996_s3 }
   0x5   :  { %6041 = sst [smem:[#allocation17_spill]] %s5997_s4 }
   0x6   :  { %6042 = sst [smem:[#allocation18_spill]] %s5998_s5 }
   0x7   :  { %6043 = sst [smem:[#allocation19_spill]] %s5999_s6 }
   0x8   :  { %6044 = sst [smem:[#allocation20_spill]] %s6000_s7 }
   0x9   :  { %6045 = sst [smem:[#allocation21_spill]] %s6001_s8 }
   0xa   :  { %6046 = sst [smem:[#allocation22_spill]] %s6002_s9 }
   0xb   :  { %30 = sst [smem:[#allocation2]] %s6016_s23 }
   0xc   :  { %31 = vsyncpa [#allocation4], 0 }
   0xd   :  { %32 = vsyncpa [#allocation7], 0 }
   0xe   :  { %33 = vsyncpa [#allocation5], 0  ;;  %s4034_s6 = smov 0  }
   0xf LB: > { %6047 = sst [smem:[#allocation12_spill]] %s3889_s6  ;;  %s4043_s1 = sadd.s32 4294967295, %s3889_s6   ;;  %s3889_s6 = sphi %s4034_s6, %s39_s6  }
  0x10   : > { %s6048_s3 = sld [smem:[#allocation20_spill]]  ;;  %p2496_p0 = scmp.ge.s32.totalorder %s3889_s6, 1 }
  0x11   : > { %p630_p1 = scmp.lt.s32.totalorder %s3889_s6, 3  ;;  %p3669_p2 = scmp.eq.s32.totalorder %s4043_s1, 0 }
  0x12   : > { %s3891_s8 = smov [#allocation3]   ;;  %s6050_s9 = sld [smem:[#allocation22_spill]] }
  0x13   : > { %p4048_p3 = pnand %p2496_p0, %p630_p1  ;;  %s643_s27 = sshll.u32 %s3891_s8, 4  ;;  %s644_s27 = int_to_ptr.vmem [resolvable:$true] %s643_s27 }
  0x14   : > { %s3892_s29 = smov [#allocation6]   ;;  %s3893_s30 = smov 768  }
  0x15   : > { %p3659_p4 = pneg %p4048_p3  ;;  %s660_s2 = sshll.u32 %s3892_s29, 4  ;;  %s661_s2 = int_to_ptr.vmem [resolvable:$true] %s660_s2 }
  0x16   : > { %s641_s26 = sshll.u32 %s6048_s3, 4  ;;  %s3894_s7 = smov 48   ;;  %s642_s26 = int_to_ptr.hbm [resolvable:$true] %s641_s26 }
  0x17   : > { %p4059_p5 = pnand %p3669_p2, %p3659_p4  ;;  %s715_s4 = sshll.u32 %s6017_s24, 4  ;;  %s716_s4 = int_to_ptr.vmem [resolvable:$true] %s715_s4 }
  0x18   : > { %s658_s5 = sshll.u32 %s6050_s9, 4  ;;  %s3895_s28 = smov 128   ;;  %s659_s5 = int_to_ptr.hbm [resolvable:$true] %s658_s5 }
  0x19   : > { %3662 = dma.hbm_to_vmem [thread:$0]  (!%p4059_p5), %s642_s26, 12288, %s644_s27, [#allocation4], %s3893_s30, %s3893_s30, %s3894_s7  }
  0x1a   : > { %s3896_s9 = smov 8   ;;  %s3897_s6 = smov [#allocation8]  }
  0x1b   : > { %3665 = dma.hbm_to_vmem [thread:$0]  (!%p4059_p5), %s659_s5, 4096, %s661_s2, [#allocation7], %s3895_s28, %s3895_s28, %s3896_s9  }
  0x1c   : > { %3668 = dma.vmem_to_smem (!%p4059_p5), %s716_s4, 16, %s3897_s6, [#allocation5]  }
  0x1d   : > { %777 = sbr.rel (%p4048_p3) target bundleno = 2388 (0x954), region = 120 }
  0x22   : > { %3876 = dma.done.wait (%p3669_p2), [#allocation4], 12288  }
  0x23   : > { %3878 = vsyncadd (%p3669_p2), [#allocation4], 4294955008 }
  0x24   : > { %3880 = dma.done.wait (%p3669_p2), [#allocation7], 4096  }
  0x25   : > { %3882 = vsyncadd (%p3669_p2), [#allocation7], 4294963200 }
  0x26   : > { %3884 = dma.done.wait (%p3669_p2), [#allocation5], 16  }
  0x27   : > { %3886 = vsyncadd (%p3669_p2), [#allocation5], 4294967280 }
  0x28   : > { %794 = sfence }
  0x29   : > { %p878_p6 = scmp.lt.s32.totalorder %s4043_s1, 1  ;;  %v1023_v0 = vld [vmem:[#allocation3 + $0x2d0] sm:$0xff]  ;;  %v3898_v1 = vmov 0   ;;  %v1024_v2 = vld [vmem:[#allocation3 + $0x2d8] sm:$0xff]  ;;  %v1017_v3 = vld [vmem:[#allocation3 + $0x2a0] sm:$0xff]  ;;  %s6052_s5 = sld [smem:[#allocation15_spill]] }
  0x2a   : > { %3693 = vset.pattern.permute.xlu0 %v3898_v1  ;;  %3694 = vset.pattern.permute.xlu1 %v3898_v1  ;;  %v1018_v4 = vld [vmem:[#allocation3 + $0x2a8] sm:$0xff]  ;;  %v1011_v5 = vld [vmem:[#allocation3 + $0x270] sm:$0xff]  ;;  %v1012_v6 = vld [vmem:[#allocation3 + $0x278] sm:$0xff]  ;;  %vm6020_vm0 = vcmask 7168   ;;  %s6053_s30 = sld [smem:[#allocation17_spill]]  ;;  %vm1227_vm2 = vcmask 64512  }
  0x2b   : > { %s6233_s1 = smov (!%p878_p6, %s4043_s1), 1  ;;  %1043 = vmatpush.msra.mxu0 %v1023_v0  ;;  %1069 = vmatpush.msra.mxu1 %v1024_v2  ;;  %v1025_v7 = vld [vmem:[#allocation3 + $0x2e0] sm:$0xff]  ;;  %v1026_v8 = vld [vmem:[#allocation3 + $0x2e8] sm:$0xff]  ;;  %v1019_v9 = vld [vmem:[#allocation3 + $0x2b0] sm:$0xff]  ;;  %s6054_s4 = sld [smem:[#allocation13_spill]]  ;;  %vm1351_vm4 = vcmask 130048  }
  0x2c   : > { %3695 = vset.pattern.permute.xlu2 %v3898_v1  ;;  %s4094_s6 = sshll.u32 %s6233_s1, 3  ;;  %s2530_s26 = sshll.u32 %s6233_s1, 4  ;;  %v1005_v10 = vld [vmem:[#allocation3 + $0x240] sm:$0xff]  ;;  %v1006_v11 = vld [vmem:[#allocation3 + $0x248] sm:$0xff]  ;;  %1095 = vmatpush.msra.mxu2 %v1025_v7  ;;  %v999_v13 = vld [vmem:[#allocation3 + $0x210] sm:$0xff] }
  0x2d   : > { %1044 = vmatpush.msra.mxu0 %v1017_v3  ;;  %1070 = vmatpush.msra.mxu1 %v1018_v4  ;;  %v1020_v14 = vld [vmem:[#allocation3 + $0x2b8] sm:$0xff]  ;;  %v1013_v17 = vld [vmem:[#allocation3 + $0x280] sm:$0xff]  ;;  %v1014_v21 = vld [vmem:[#allocation3 + $0x288] sm:$0xff]  ;;  %s6055_s27 = sld [smem:[#allocation14_spill]] }
  0x2e   : > { %1121 = vmatpush.msra.mxu3 %v1026_v8  ;;  %1096 = vmatpush.msra.mxu2 %v1019_v9  ;;  %v1000_v20 = vld [vmem:[#allocation3 + $0x218] sm:$0xff]  ;;  %v993_v23 = vld [vmem:[#allocation3 + $0x1e0] sm:$0xff]  ;;  %v1007_v24 = vld [vmem:[#allocation3 + $0x250] sm:$0xff]  ;;  %s6056_s2 = sld [smem:[#allocation21_spill]] }
  0x2f   : > { %s4101_s0 = scalar_lea.vmem %s6052_s5, %s4094_s6  ;;  %1045 = vmatpush.msra.mxu0 %v1011_v5  ;;  %1071 = vmatpush.msra.mxu1 %v1012_v6  ;;  %v994_v25 = vld [vmem:[#allocation3 + $0x1e8] sm:$0xff]  ;;  %v1008_v26 = vld [vmem:[#allocation3 + $0x258] sm:$0xff]  ;;  %v987_v27 = vld [vmem:[#allocation3 + $0x1b0] sm:$0xff]  ;;  %s6057_s3 = sld [smem:[#allocation16_spill]] }
  0x30   : > { %v909_v12 = vld [vmem:[%s4101_s0] sm:$0xff]  ;;  %s898_s7 = scalar_lea.vmem %s6053_s30, %s2530_s26  ;;  %1122 = vmatpush.msra.mxu3 %v1020_v14  ;;  %1097 = vmatpush.msra.mxu2 %v1013_v17  ;;  %v988_v29 = vld [vmem:[#allocation3 + $0x1b8] sm:$0xff]  ;;  %v1002_v31 = vld [vmem:[#allocation3 + $0x228] sm:$0xff]  ;;  %s6058_s9 = sld [smem:[#allocation18_spill]] }
  0x31   : > { %915 = vperm.xlu0 %3693, %v909_v12   ;;  %v910_v15 = vld [vmem:[%s898_s7] sm:$0xff]  ;;  %v911_v16 = vld [vmem:[%s898_s7 + $0x8] sm:$0xff]  ;;  %1046 = vmatpush.msra.mxu0 %v1005_v10  ;;  %v995_v33 = vld [vmem:[#allocation3 + $0x1f0] sm:$0xff]  ;;  %s881_s28 = scalar_lea.vmem %s6054_s4, %s4094_s6  ;;  %s4373_s4 = sld [smem:[#allocation2]] }
  0x32   : > { %v1902_v18 = vsel %vm6020_vm0, %v910_v15, 0.0  ;;  %928 = vperm.xlu1 %3694, %v911_v16   ;;  %v1903_v19 = vsel %vm6020_vm0, %v911_v16, 0.0  ;;  %1072 = vmatpush.msra.mxu1 %v1006_v11  ;;  %v1001_v28 = vld [vmem:[#allocation3 + $0x220] sm:$0xff]  ;;  %v982_v32 = vld [vmem:[#allocation3 + $0x188] sm:$0xff]  ;;  %v975_v34 = vld [vmem:[#allocation3 + $0x150] sm:$0xff]  ;;  %s2526_s30 = sld [smem:[#allocation8 + $0x9]] }
  0x33   : > { %v4111_v22 = vadd.f32 %v1903_v19, %v1902_v18  ;;  %1047 = vmatpush.msra.mxu0 %v999_v13  ;;  %1123 = vmatpush.msra.mxu3 %v1014_v21  ;;  %v981_v30 = vld [vmem:[#allocation3 + $0x180] sm:$0xff]  ;;  %v996_v35 = vld [vmem:[#allocation3 + $0x1f8] sm:$0xff]  ;;  %v990_v39 = vld [vmem:[#allocation3 + $0x1c8] sm:$0xff]  ;;  %s886_s5 = scalar_lea.vmem %s6055_s27, %s2530_s26  ;;  %s2523_s27 = sld [smem:[#allocation8 + $0x6]] }
  0x34   : > { %1073 = vmatpush.msra.mxu1 %v1000_v20  ;;  %1098 = vmatpush.msra.mxu2 %v1007_v24  ;;  %v976_v36 = vld [vmem:[#allocation3 + $0x158] sm:$0xff]  ;;  %v989_v37 = vld [vmem:[#allocation3 + $0x1c0] sm:$0xff]  ;;  %v970_v40 = vld [vmem:[#allocation3 + $0x128] sm:$0xff]  ;;  %s2525_s26 = sld [smem:[#allocation8 + $0x8]] }
  0x35   : > { %1048 = vmatpush.msra.mxu0 %v993_v23  ;;  %1124 = vmatpush.msra.mxu3 %v1008_v26  ;;  %v969_v38 = vld [vmem:[#allocation3 + $0x120] sm:$0xff]  ;;  %v983_v41 = vld [vmem:[#allocation3 + $0x190] sm:$0xff]  ;;  %v984_v43 = vld [vmem:[#allocation3 + $0x198] sm:$0xff]  ;;  %s893_s8 = scalar_lea.vmem %s6057_s3, %s6233_s1 }
  0x36   : > { %1074 = vmatpush.msra.mxu1 %v994_v25  ;;  %1099 = vmatpush.msra.mxu2 %v1001_v28  ;;  %v963_v42 = vld [vmem:[#allocation3 + $0xf0] sm:$0xff]  ;;  %v964_v44 = vld [vmem:[#allocation3 + $0xf8] sm:$0xff]  ;;  %v977_v45 = vld [vmem:[#allocation3 + $0x160] sm:$0xff]  ;;  %s901_s23 = scalar_lea.vmem %s6058_s9, %s6233_s1  ;;  %s2521_s9 = sld [smem:[#allocation8 + $0x4]] }
  0x37   : > { %1049 = vmatpush.msra.mxu0 %v987_v27  ;;  %1125 = vmatpush.msra.mxu3 %v1002_v31  ;;  %v957_v46 = vld [vmem:[#allocation3 + $0xc0] sm:$0xff]  ;;  %v958_v47 = vld [vmem:[#allocation3 + $0xc8] sm:$0xff]  ;;  %v951_v49 = vld [vmem:[#allocation3 + $0x90] sm:$0xff] }
  0x38   : > { %1075 = vmatpush.msra.mxu1 %v988_v29  ;;  %1100 = vmatpush.msra.mxu2 %v995_v33  ;;  %v978_v48 = vld [vmem:[#allocation3 + $0x168] sm:$0xff]  ;;  %v952_v50 = vld [vmem:[#allocation3 + $0x98] sm:$0xff]  ;;  %v971_v51 = vld [vmem:[#allocation3 + $0x130] sm:$0xff] }
  0x39   : > { %923 = vperm.xlu0 %3693, %v910_v15   ;;  %1050 = vmatpush.msra.mxu0 %v981_v30  ;;  %v972_v52 = vld [vmem:[#allocation3 + $0x138] sm:$0xff]  ;;  %v945_v53 = vld [vmem:[#allocation3 + $0x60] sm:$0xff]  ;;  %v946_v55 = vld [vmem:[#allocation3 + $0x68] sm:$0xff] }
  0x3a   : > { %1076 = vmatpush.msra.mxu1 %v982_v32  ;;  %1126 = vmatpush.msra.mxu3 %v996_v35  ;;  %v965_v54 = vld [vmem:[#allocation3 + $0x100] sm:$0xff]  ;;  %v966_v56 = vld [vmem:[#allocation3 + $0x108] sm:$0xff]  ;;  %v959_v57 = vld [vmem:[#allocation3 + $0xd0] sm:$0xff] }
  0x3b   : > { %1051 = vmatpush.msra.mxu0 %v975_v34  ;;  %1101 = vmatpush.msra.mxu2 %v989_v37  ;;  %v939_v58 = vld [vmem:[#allocation3 + $0x30] sm:$0xff]  ;;  %v960_v59 = vld [vmem:[#allocation3 + $0xd8] sm:$0xff]  ;;  %v953_v61 = vld [vmem:[#allocation3 + $0xa0] sm:$0xff] }
  0x3c   : > { %1077 = vmatpush.msra.mxu1 %v976_v36  ;;  %1127 = vmatpush.msra.mxu3 %v990_v39  ;;  %v940_v60 = vld [vmem:[#allocation3 + $0x38] sm:$0xff]  ;;  %v933_v62 = vld [vmem:[#allocation3] sm:$0xff]  ;;  %v954_v63 = vld [vmem:[#allocation3 + $0xa8] sm:$0xff] }
  0x3d   : > { %1052 = vmatpush.msra.mxu0 %v969_v38  ;;  %1102 = vmatpush.msra.mxu2 %v983_v41  ;;  %v934_v0 = vld [vmem:[#allocation3 + $0x8] sm:$0xff]  ;;  %v1027_v2 = vld [vmem:[#allocation3 + $0x2f0] sm:$0xff]  ;;  %v1028_v3 = vld [vmem:[#allocation3 + $0x2f8] sm:$0xff] }
  0x3e   : > { %1078 = vmatpush.msra.mxu1 %v970_v40  ;;  %1128 = vmatpush.msra.mxu3 %v984_v43  ;;  %v947_v4 = vld [vmem:[#allocation3 + $0x70] sm:$0xff]  ;;  %v948_v5 = vld [vmem:[#allocation3 + $0x78] sm:$0xff]  ;;  %v1021_v6 = vld [vmem:[#allocation3 + $0x2c0] sm:$0xff] }
  0x3f   : > { %1053 = vmatpush.msra.mxu0 %v963_v42  ;;  %1103 = vmatpush.msra.mxu2 %v977_v45  ;;  %v1022_v7 = vld [vmem:[#allocation3 + $0x2c8] sm:$0xff]  ;;  %v941_v8 = vld [vmem:[#allocation3 + $0x40] sm:$0xff]  ;;  %v1015_v10 = vld [vmem:[#allocation3 + $0x290] sm:$0xff] }
  0x40   : > { %1079 = vmatpush.msra.mxu1 %v964_v44  ;;  %1129 = vmatpush.msra.mxu3 %v978_v48  ;;  %v942_v9 = vld [vmem:[#allocation3 + $0x48] sm:$0xff]  ;;  %v1016_v11 = vld [vmem:[#allocation3 + $0x298] sm:$0xff]  ;;  %v935_v12 = vld [vmem:[#allocation3 + $0x10] sm:$0xff] }
  0x41   : > { %1054 = vmatpush.msra.mxu0 %v957_v46  ;;  %1104 = vmatpush.msra.mxu2 %v971_v51  ;;  %v936_v13 = vld [vmem:[#allocation3 + $0x18] sm:$0xff]  ;;  %v1009_v14 = vld [vmem:[#allocation3 + $0x260] sm:$0xff]  ;;  %v1010_v15 = vld [vmem:[#allocation3 + $0x268] sm:$0xff] }
  0x42   : > { %1080 = vmatpush.msra.mxu1 %v958_v47  ;;  %1130 = vmatpush.msra.mxu3 %v972_v52  ;;  %v1003_v16 = vld [vmem:[#allocation3 + $0x230] sm:$0xff]  ;;  %v1004_v17 = vld [vmem:[#allocation3 + $0x238] sm:$0xff]  ;;  %v997_v18 = vld [vmem:[#allocation3 + $0x200] sm:$0xff] }
  0x43   : > { %1055 = vmatpush.msra.mxu0 %v951_v49  ;;  %1105 = vmatpush.msra.mxu2 %v965_v54  ;;  %v998_v19 = vld [vmem:[#allocation3 + $0x208] sm:$0xff]  ;;  %v991_v20 = vld [vmem:[#allocation3 + $0x1d0] sm:$0xff]  ;;  %v992_v21 = vld [vmem:[#allocation3 + $0x1d8] sm:$0xff] }
  0x44   : > { %1081 = vmatpush.msra.mxu1 %v952_v50  ;;  %1131 = vmatpush.msra.mxu3 %v966_v56  ;;  %v985_v23 = vld [vmem:[#allocation3 + $0x1a0] sm:$0xff]  ;;  %v986_v24 = vld [vmem:[#allocation3 + $0x1a8] sm:$0xff]  ;;  %v979_v25 = vld [vmem:[#allocation3 + $0x170] sm:$0xff] }
  0x45   : > { %1056 = vmatpush.msra.mxu0 %v945_v53  ;;  %1106 = vmatpush.msra.mxu2 %v959_v57  ;;  %v980_v26 = vld [vmem:[#allocation3 + $0x178] sm:$0xff]  ;;  %v973_v27 = vld [vmem:[#allocation3 + $0x140] sm:$0xff]  ;;  %v974_v28 = vld [vmem:[#allocation3 + $0x148] sm:$0xff] }
  0x46   : > { %1082 = vmatpush.msra.mxu1 %v946_v55  ;;  %1132 = vmatpush.msra.mxu3 %v960_v59  ;;  %v967_v29 = vld [vmem:[#allocation3 + $0x110] sm:$0xff]  ;;  %v968_v30 = vld [vmem:[#allocation3 + $0x118] sm:$0xff]  ;;  %v961_v31 = vld [vmem:[#allocation3 + $0xe0] sm:$0xff] }
  0x47   : > { %1057 = vmatpush.msra.mxu0 %v939_v58  ;;  %1107 = vmatpush.msra.mxu2 %v953_v61  ;;  %v962_v32 = vld [vmem:[#allocation3 + $0xe8] sm:$0xff]  ;;  %v955_v33 = vld [vmem:[#allocation3 + $0xb0] sm:$0xff]  ;;  %v956_v34 = vld [vmem:[#allocation3 + $0xb8] sm:$0xff] }
  0x48   : > { %1083 = vmatpush.msra.mxu1 %v940_v60  ;;  %1133 = vmatpush.msra.mxu3 %v954_v63  ;;  %v949_v35 = vld [vmem:[#allocation3 + $0x80] sm:$0xff]  ;;  %v950_v36 = vld [vmem:[#allocation3 + $0x88] sm:$0xff]  ;;  %v943_v37 = vld [vmem:[#allocation3 + $0x50] sm:$0xff] }
  0x49   : > { %1058 = vmatpush.msra.mxu0 %v933_v62  ;;  %1108 = vmatpush.msra.mxu2 %v947_v4  ;;  %v944_v38 = vld [vmem:[#allocation3 + $0x58] sm:$0xff]  ;;  %v937_v39 = vld [vmem:[#allocation3 + $0x20] sm:$0xff]  ;;  %v938_v40 = vld [vmem:[#allocation3 + $0x28] sm:$0xff] }
  0x4a   : > { %1084 = vmatpush.msra.mxu1 %v934_v0  ;;  %1134 = vmatpush.msra.mxu3 %v948_v5  ;;  %v912_v41 = vld [vmem:[%s881_s28] sm:$0xff]  ;;  %v920_v48 = vld [vmem:[%s886_s5 + $0x8] sm:$0xff] }
  0x4b   : > { %1147 = vmatpush.msrb.mxu0 %v1027_v2  ;;  %1109 = vmatpush.msra.mxu2 %v941_v8  ;;  %v919_v44 = vld [vmem:[%s886_s5] sm:$0xff]  ;;  %s2524_s5 = sld [smem:[#allocation8 + $0x7]] }
  0x4c   : > { %1173 = vmatpush.msrb.mxu1 %v1028_v3  ;;  %1135 = vmatpush.msra.mxu3 %v942_v9  ;;  %v1029_v52 = vld [vmem:[%s6056_s2] sm:$0x3f] }
  0x4d   : > { %1148 = vmatpush.msrb.mxu0 %v1021_v6  ;;  %1110 = vmatpush.msra.mxu2 %v935_v12  ;;  %v1033_v53 = vperm.slane %v1029_v52, 2  ;;  %v1034_v54 = vperm.slane %v1029_v52, 3  ;;  %v1031_v55 = vperm.slane %v1029_v52, 0  ;;  %v1032_v63 = vperm.slane %v1029_v52, 1 }
  0x4e   : > { %1174 = vmatpush.msrb.mxu1 %v1022_v7  ;;  %1136 = vmatpush.msra.mxu3 %v936_v13  ;;  %v4158_v6 = vperm.slane %v1029_v52, 4  ;;  %v1036_v7 = vperm.slane %v1029_v52, 5 }
  0x4f   : > { %1149 = vmatpush.msrb.mxu0 %v1015_v10 }
  0x50   : > { %1175 = vmatpush.msrb.mxu1 %v1016_v11 }
  0x51   : > { %1150 = vmatpush.msrb.mxu0 %v1009_v14 }
  0x52   : > { %1176 = vmatpush.msrb.mxu1 %v1010_v15 }
  0x53   : > { %1151 = vmatpush.msrb.mxu0 %v1003_v16 }
  0x54   : > { %1177 = vmatpush.msrb.mxu1 %v1004_v17 }
  0x55   : > { %1152 = vmatpush.msrb.mxu0 %v997_v18 }
  0x56   : > { %1178 = vmatpush.msrb.mxu1 %v998_v19 }
  0x57   : > { %1153 = vmatpush.msrb.mxu0 %v991_v20 }
  0x58   : > { %1179 = vmatpush.msrb.mxu1 %v992_v21 }
  0x59   : > { %1154 = vmatpush.msrb.mxu0 %v985_v23 }
  0x5a   : > { %1180 = vmatpush.msrb.mxu1 %v986_v24 }
  0x5b   : > { %1155 = vmatpush.msrb.mxu0 %v979_v25 }
  0x5c   : > { %1181 = vmatpush.msrb.mxu1 %v980_v26 }
  0x5d   : > { %1156 = vmatpush.msrb.mxu0 %v973_v27 }
  0x5e   : > { %1182 = vmatpush.msrb.mxu1 %v974_v28 }
  0x5f   : > { %1157 = vmatpush.msrb.mxu0 %v967_v29  ;;  %v1199_v29 = vld [vmem:[%s893_s8] sm:$0x1] }
  0x60   : > { %1183 = vmatpush.msrb.mxu1 %v968_v30  ;;  %vm1200_vm1 = vcmp.gt.f32.partialorder %v1199_v29, 0.0  ;;  %v3899_v30 = vmov -1e+30  }
  0x61   : > { %1158 = vmatpush.msrb.mxu0 %v961_v31  ;;  %v1201_v31 = vsel %vm1200_vm1, 0.0, %v3899_v30 }
  0x62   : > { %1184 = vmatpush.msrb.mxu1 %v962_v32  ;;  %v1224_v32 = vperm.slane %v1201_v31, 0 }
  0x63   : > { %1159 = vmatpush.msrb.mxu0 %v955_v33 }
  0x64   : > { %1185 = vmatpush.msrb.mxu1 %v956_v34 }
  0x65   : > { %1160 = vmatpush.msrb.mxu0 %v949_v35 }
  0x66   : > { %1186 = vmatpush.msrb.mxu1 %v950_v36 }
  0x67   : > { %1161 = vmatpush.msrb.mxu0 %v943_v37 }
  0x68   : > { %1187 = vmatpush.msrb.mxu1 %v944_v38 }
  0x69   : > { %1162 = vmatpush.msrb.mxu0 %v937_v39 }
  0x6a   : > { %1188 = vmatpush.msrb.mxu1 %v938_v40 }
  0xa3   : > { %v4117_v42 = vpop.permute.xlu0 %915 }
  0xa4   : > { %v4120_v43 = vmul.f32 %v4117_v42, %v912_v41  ;;  %v4140_v47 = vpop.permute.xlu1 %928  ;;  %v4175_v41 = vld [vmem:[%s901_s23] sm:$0x1]  ;;  %s1835_s23 = ssub.f32 1.0, %s4373_s4 }
  0xa5   : > { %v4143_v49 = vmul.f32 %v4140_v47, %v920_v48  ;;  %vm1319_vm3 = vcmp.gt.f32.partialorder %v4175_v41, 0.0 }
  0xa6   : > { %1059 = vmatmul.f32.vlgmr.msra.gmra.mxu0 %v4120_v43  ;;  %1085 = vmatmul.f32.vlgmr.msra.gmra.mxu1 %v4120_v43  ;;  %v1320_v48 = vsel %vm1319_vm3, 0.0, %v3899_v30 }
  0xa7   : > { %1111 = vmatmul.f32.vlgmr.msra.gmra.mxu2 %v4120_v43  ;;  %1137 = vmatmul.f32.vlgmr.msra.gmra.mxu3 %v4120_v43  ;;  %v1347_v52 = vperm.slane %v1320_v48, 0 }
  0xab   : > { %v4131_v45 = vpop.permute.xlu0 %923 }
  0xac   : > { %v4134_v46 = vmul.f32 %v4131_v45, %v919_v44 }
  0xae   : > { %1062 = vmatmul.f32.gmra.mxu0 %v4134_v46  ;;  %1088 = vmatmul.f32.gmra.mxu1 %v4134_v46 }
  0xaf   : > { %1114 = vmatmul.f32.gmra.mxu2 %v4134_v46  ;;  %1140 = vmatmul.f32.gmra.mxu3 %v4134_v46 }
  0xb6   : > { %1065 = vmatmul.f32.gmra.mxu0 %v4143_v49  ;;  %1091 = vmatmul.f32.gmra.mxu1 %v4143_v49 }
  0xb7   : > { %1117 = vmatmul.f32.gmra.mxu2 %v4143_v49  ;;  %1143 = vmatmul.f32.gmra.mxu3 %v4143_v49 }
  0xbe   : > { %1163 = vmatmul.f32.vlgmr.msrb.gmra.mxu0 %v4120_v43  ;;  %1189 = vmatmul.f32.vlgmr.msrb.gmra.mxu1 %v4120_v43 }
  0xc6   : > { %1166 = vmatmul.f32.gmra.mxu0 %v4134_v46  ;;  %1192 = vmatmul.f32.gmra.mxu1 %v4134_v46 }
  0xce   : > { %1169 = vmatmul.f32.gmra.mxu0 %v4143_v49  ;;  %1195 = vmatmul.f32.gmra.mxu1 %v4143_v49 }
 0x123   : > { %v1060_v50 = vpop.f32.mrf.mxu0  ;;  %v1086_v51 = vpop.f32.mrf.mxu1 }
 0x124   : > { %v1061_v62 = vadd.f32 %v1060_v50, %v1031_v55  ;;  %v1087_v5 = vadd.f32 %v1086_v51, %v1032_v63 }
 0x12a   : > { %v1112_v56 = vpop.f32.mrf.mxu2  ;;  %v1138_v57 = vpop.f32.mrf.mxu3 }
 0x12b   : > { %v1113_v58 = vadd.f32 %v1112_v56, %v1033_v53  ;;  %v1139_v59 = vadd.f32 %v1138_v57, %v1034_v54  ;;  %v1063_v60 = vpop.f32.mrf.mxu0  ;;  %v1089_v61 = vpop.f32.mrf.mxu1 }
 0x12c   : > { %v1064_v18 = vadd.f32 %v1063_v60, %v1031_v55  ;;  %v1090_v19 = vadd.f32 %v1089_v61, %v1032_v63 }
 0x12d   : > { %1217 = vmatpush.xpose.msrb.mxu2 %v1113_v58 }
 0x130   : > { %1218 = vmatmul.f32.vlgmr.msrb.gmra.mxu2 %v1061_v62 }
 0x131   : > { %1277 = vmatpush.xpose.msra.mxu2 %v1139_v59 }
 0x132   : > { %v1115_v0 = vpop.f32.mrf.mxu2  ;;  %v1141_v2 = vpop.f32.mrf.mxu3 }
 0x133   : > { %v1066_v3 = vpop.f32.mrf.mxu0  ;;  %v1092_v4 = vpop.f32.mrf.mxu1  ;;  %v1116_v16 = vadd.f32 %v1115_v0, %v1033_v53  ;;  %v1142_v17 = vadd.f32 %v1141_v2, %v1034_v54 }
 0x134   : > { %v1067_v24 = vadd.f32 %v1066_v3, %v1031_v55  ;;  %v1093_v25 = vadd.f32 %v1092_v4, %v1032_v63 }
 0x138   : > { %1278 = vmatmul.f32.vlgmr.msra.gmra.mxu2 %v1087_v5 }
 0x13a   : > { %v1118_v8 = vpop.f32.mrf.mxu2  ;;  %v1144_v9 = vpop.f32.mrf.mxu3 }
 0x13b   : > { %v1119_v10 = vadd.f32 %v1118_v8, %v1033_v53  ;;  %v1145_v11 = vadd.f32 %v1144_v9, %v1034_v54  ;;  %v1164_v12 = vpop.f32.mrf.mxu0  ;;  %v1190_v13 = vpop.f32.mrf.mxu1 }
 0x13c   : > { %v1165_v14 = vadd.f32 %v1164_v12, %v4158_v6  ;;  %v1191_v15 = vadd.f32 %v1190_v13, %v1036_v7 }
 0x13d   : > { %1335 = vmatpush.xpose.msrb.mxu2 %v1119_v10  ;;  %1417 = vmatpush.xpose.msra.mxu0 %v1145_v11 }
 0x13e   : > { %1257 = vmatpush.msrb.mxu3 %v1165_v14 }
 0x140   : > { %1313 = vmatpush.msra.mxu3 %v1191_v15 }
 0x141   : > { %1336 = vmatpush.xpose.msrb.mxu2 %v1116_v16  ;;  %1418 = vmatpush.xpose.msra.mxu0 %v1142_v17 }
 0x143   : > { %v1167_v20 = vpop.f32.mrf.mxu0  ;;  %v1193_v21 = vpop.f32.mrf.mxu1 }
 0x144   : > { %v4162_v23 = vadd.f32 %v1167_v20, %v4158_v6  ;;  %1337 = vmatmul.f32.vlgmr.msrb.gmra.mxu2 %v1064_v18  ;;  %1419 = vmatmul.f32.vlgmr.msra.gmra.mxu0 %v1090_v19  ;;  %v1194_v28 = vadd.f32 %v1193_v21, %v1036_v7 }
 0x14b   : > { %v1196_v26 = vpop.f32.mrf.mxu1  ;;  %v4173_v40 = vpop.f32.mrf.mxu0 }
 0x14c   : > { %v1197_v27 = vadd.f32 %v1196_v26, %v1036_v7  ;;  %1340 = vmatmul.f32.gmra.mxu2 %v1067_v24  ;;  %1422 = vmatmul.f32.gmra.mxu0 %v1093_v25  ;;  %v1171_v48 = vadd.f32 %v4173_v40, %v4158_v6  ;;  %v1510_v40 = vld [vmem:[#allocation6 + $0xe8] sm:$0xff] }
 0x14e   : > { %1472 = vmatpush.msra.mxu1 %v1197_v27 }
 0x150   : > { %1473 = vmatpush.msra.mxu1 %v1194_v28 }
 0x1b3   : > { %v1219_v33 = vpop.f32.mrf.mxu2 }
 0x1b4   : > { %v1222_v34 = vmul.f32 0.25, %v1219_v33 }
 0x1b6   : > { %v1226_v35 = vadd.f32 %v1224_v32, %v1222_v34 }
 0x1b8   : > { %v1228_v36 = vsel %vm1227_vm2, %v1226_v35, -inf }
 0x1b9   : > { %1229 = vmax.xlane.f32.xlu1 %v1228_v36 }
 0x1bb   : > { %v1279_v37 = vpop.f32.mrf.mxu2 }
 0x1bc   : > { %v1282_v38 = vmul.f32 0.25, %v1279_v37 }
 0x1be   : > { %v1283_v39 = vadd.f32 %v1282_v38, %v1224_v32 }
 0x1c0   : > { %v1284_v44 = vsel %vm1227_vm2, %v1283_v39, -inf }
 0x1c1   : > { %1285 = vmax.xlane.f32.xlu2 %v1284_v44  ;;  %v1420_v50 = vpop.f32.mrf.mxu0 }
 0x1c2   : > { %v1426_v55 = vmul.f32 0.25, %v1420_v50 }
 0x1c4   : > { %v1428_v59 = vadd.f32 %v1426_v55, %v1347_v52  ;;  %v1494_v55 = vld [vmem:[#allocation6 + $0x68] sm:$0xff] }
 0x1c6   : > { %v1430_v0 = vsel %vm1351_vm4, %v1428_v59, -inf }
 0x1c7   : > { %v1338_v51 = vpop.f32.mrf.mxu2 }
 0x1c8   : > { %v1344_v53 = vmul.f32 0.25, %v1338_v51  ;;  %v1496_v51 = vld [vmem:[#allocation6 + $0x78] sm:$0xff] }
 0x1c9   : > { %v1423_v60 = vpop.f32.mrf.mxu0  ;;  %1517 = vmatpush.msra.mxu2 %v1496_v51 }
 0x1ca   : > { %v1349_v54 = vadd.f32 %v1347_v52, %v1344_v53  ;;  %v1427_v62 = vmul.f32 0.25, %v1423_v60  ;;  %v1508_v60 = vld [vmem:[#allocation6 + $0xd8] sm:$0xff] }
 0x1cc   : > { %v1352_v56 = vsel %vm1351_vm4, %v1349_v54, -inf  ;;  %v1429_v2 = vadd.f32 %v1427_v62, %v1347_v52  ;;  %v1507_v62 = vld [vmem:[#allocation6 + $0xd0] sm:$0xff] }
 0x1cd   : > { %1353 = vmax.xlane.f32.xlu2 %v1352_v56  ;;  %v1511_v56 = vld [vmem:[#allocation6 + $0xf0] sm:$0xff] }
 0x1ce   : > { %v1433_v3 = vsel %vm1351_vm4, %v1429_v2, -inf }
 0x1cf   : > { %v1341_v57 = vpop.f32.mrf.mxu2 }
 0x1d0   : > { %v1345_v58 = vmul.f32 0.25, %v1341_v57  ;;  %v1493_v57 = vld [vmem:[#allocation6 + $0x60] sm:$0xff] }
 0x1d2   : > { %v1350_v61 = vadd.f32 %v1347_v52, %v1345_v58  ;;  %v1495_v52 = vld [vmem:[#allocation6 + $0x70] sm:$0xff]  ;;  %v1492_v58 = vld [vmem:[#allocation6 + $0x58] sm:$0xff] }
 0x1d3   : > { %1518 = vmatpush.msra.mxu2 %v1495_v52 }
 0x1d4   : > { %v1355_v63 = vsel %vm1351_vm4, %v1350_v61, -inf }
 0x1d5   : > { %1356 = vmax.xlane.f32.xlu0 %v1355_v63  ;;  %1431 = vmax.xlane.f32.xlu2 %v1430_v0  ;;  %v1489_v0 = vld [vmem:[#allocation6 + $0x40] sm:$0xff] }
 0x1d6   : > { %1519 = vmatpush.msra.mxu2 %v1494_v55 }
 0x1d8   : > { %1520 = vmatpush.msra.mxu2 %v1493_v57 }
 0x1da   : > { %1521 = vmatpush.msra.mxu2 %v1492_v58 }
 0x1dd   : > { %1434 = vmax.xlane.f32.xlu2 %v1433_v3 }
 0x22c   : > { %v1230_v4 = vpop.xlane.xlu1 %1229 }
 0x22d   : > { %v1231_v5 = vsub.f32 %v1226_v35, %v1230_v4  ;;  %v1506_v4 = vld [vmem:[#allocation6 + $0xc8] sm:$0xff] }
 0x22f   : > { %v1232_v7 = vmul.f32 1.442695, %v1231_v5 }
 0x231   : > { %3703 = vpow2.f32 %v1232_v7  ;;  %v1488_v7 = vld [vmem:[#allocation6 + $0x38] sm:$0xff] }
 0x234   : > { %v1286_v8 = vpop.xlane.xlu2 %1285 }
 0x235   : > { %v1287_v9 = vsub.f32 %v1283_v39, %v1286_v8  ;;  %v1505_v8 = vld [vmem:[#allocation6 + $0xc0] sm:$0xff] }
 0x237   : > { %v3704_v10 = vpop.eup %3703  ;;  %v1288_v11 = vmul.f32 1.442695, %v1287_v9  ;;  %v1487_v9 = vld [vmem:[#allocation6 + $0x30] sm:$0xff] }
 0x238   : > { %v1234_v12 = vsel %vm1227_vm2, %v3704_v10, 0.0 }
 0x239   : > { %3705 = vpow2.f32 %v1288_v11  ;;  %1235 = vadd.xlane.f32.xlu2 %v1234_v12  ;;  %v1486_v11 = vld [vmem:[#allocation6 + $0x28] sm:$0xff]  ;;  %v1503_v12 = vld [vmem:[#allocation6 + $0xb0] sm:$0xff] }
 0x23f   : > { %v3706_v13 = vpop.eup %3705 }
 0x240   : > { %v1354_v14 = vpop.xlane.xlu2 %1353  ;;  %v1290_v15 = vsel %vm1227_vm2, %v3706_v13, 0.0 }
 0x241   : > { %v1358_v16 = vsub.f32 %v1349_v54, %v1354_v14  ;;  %1291 = vadd.xlane.f32.xlu2 %v1290_v15  ;;  %v1512_v54 = vld [vmem:[#allocation6 + $0xf8] sm:$0xff]  ;;  %v1485_v14 = vld [vmem:[#allocation6 + $0x20] sm:$0xff] }
 0x243   : > { %v1360_v17 = vmul.f32 1.442695, %v1358_v16 }
 0x245   : > { %3707 = vpow2.f32 %v1360_v17 }
 0x248   : > { %v1357_v18 = vpop.xlane.xlu0 %1356  ;;  %v1432_v19 = vpop.xlane.xlu2 %1431 }
 0x249   : > { %v1359_v20 = vsub.f32 %v1350_v61, %v1357_v18  ;;  %v1436_v21 = vsub.f32 %v1428_v59, %v1432_v19  ;;  %v1491_v59 = vld [vmem:[#allocation6 + $0x50] sm:$0xff]  ;;  %v1490_v61 = vld [vmem:[#allocation6 + $0x48] sm:$0xff] }
 0x24a   : > { %1522 = vmatpush.msra.mxu2 %v1491_v59  ;;  %v1502_v18 = vld [vmem:[#allocation6 + $0xa8] sm:$0xff] }
 0x24b   : > { %v3708_v24 = vpop.eup %3707  ;;  %v1362_v25 = vmul.f32 1.442695, %v1359_v20  ;;  %v1438_v26 = vmul.f32 1.442695, %v1436_v21  ;;  %v1484_v20 = vld [vmem:[#allocation6 + $0x18] sm:$0xff]  ;;  %v1483_v21 = vld [vmem:[#allocation6 + $0x10] sm:$0xff] }
 0x24c   : > { %v1364_v27 = vsel %vm1351_vm4, %v3708_v24, 0.0  ;;  %1523 = vmatpush.msra.mxu2 %v1490_v61 }
 0x24d   : > { %3709 = vpow2.f32 %v1362_v25  ;;  %1365 = vadd.xlane.f32.xlu2 %v1364_v27  ;;  %v1481_v27 = vld [vmem:[#allocation6] sm:$0xff] }
 0x24e   : > { %3711 = vpow2.f32 %v1438_v26  ;;  %1524 = vmatpush.msra.mxu2 %v1489_v0  ;;  %v1666_v0 = vld [vmem:[%s6006_s13 + $0x70] sm:$0xff] }
 0x250   : > { %v1435_v28 = vpop.xlane.xlu2 %1434  ;;  %1525 = vmatpush.msra.mxu2 %v1488_v7  ;;  %v1661_v7 = vld [vmem:[%s6006_s13 + $0x48] sm:$0xff] }
 0x251   : > { %v1437_v29 = vsub.f32 %v1429_v2, %v1435_v28  ;;  %v1501_v28 = vld [vmem:[#allocation6 + $0xa0] sm:$0xff] }
 0x252   : > { %1526 = vmatpush.msra.mxu2 %v1487_v9  ;;  %v1659_v9 = vld [vmem:[%s6006_s13 + $0x38] sm:$0xff] }
 0x253   : > { %v4188_v30 = vpop.eup %3709  ;;  %v1440_v31 = vmul.f32 1.442695, %v1437_v29  ;;  %v1500_v29 = vld [vmem:[#allocation6 + $0x98] sm:$0xff] }
 0x254   : > { %v4190_v32 = vpop.eup %3711  ;;  %v1367_v33 = vsel %vm1351_vm4, %v4188_v30, 0.0  ;;  %1527 = vmatpush.msra.mxu2 %v1486_v11  ;;  %v1657_v11 = vld [vmem:[%s6006_s13 + $0x28] sm:$0xff] }
 0x255   : > { %3713 = vpow2.f32 %v1440_v31  ;;  %1368 = vadd.xlane.f32.xlu1 %v1367_v33  ;;  %v1442_v34 = vsel %vm1351_vm4, %v4190_v32, 0.0  ;;  %v1498_v31 = vld [vmem:[#allocation6 + $0x88] sm:$0xff] }
 0x256   : > { %1443 = vadd.xlane.f32.xlu2 %v1442_v34  ;;  %1528 = vmatpush.msra.mxu2 %v1485_v14  ;;  %v1654_v14 = vld [vmem:[%s6006_s13 + $0x10] sm:$0xff] }
 0x258   : > { %1529 = vmatpush.msra.mxu2 %v1484_v20 }
 0x25a   : > { %1530 = vmatpush.msra.mxu2 %v1483_v21 }
 0x25b   : > { %v4196_v35 = vpop.eup %3713 }
 0x25c   : > { %v1445_v36 = vsel %vm1351_vm4, %v4196_v35, 0.0 }
 0x25d   : > { %1446 = vadd.xlane.f32.xlu0 %v1445_v36 }
 0x2ac   : > { %v1236_v37 = vpop.xlane.xlu2 %1235 }
 0x2ad   : > { %3715 = vrcp.f32 %v1236_v37 }
 0x2b3   : > { %v3716_v38 = vpop.eup %3715 }
 0x2b4   : > { %v1292_v39 = vpop.xlane.xlu2 %1291  ;;  %v1238_v44 = vmul.f32 %v3716_v38, %v3704_v10  ;;  %v1504_v10 = vld [vmem:[#allocation6 + $0xb8] sm:$0xff] }
 0x2b5   : > { %3717 = vrcp.f32 %v1292_v39  ;;  %v3696_v39 = vld [vmem:[%s6003_s10] ss:$0 sm:$0xff] }
 0x2b6   : > { %2512 = vmatmul.msk.f32.vlgmr.msrb.gmra.mxu3 %vm1227_vm2, %v1238_v44 }
 0x2b7   : > { %1394 = vmatpush.msrb.mxu3 %v1171_v48 }
 0x2b9   : > { %1395 = vmatpush.msrb.mxu3 %v4162_v23  ;;  %v1509_v23 = vld [vmem:[#allocation6 + $0xe0] sm:$0xff] }
 0x2bb   : > { %v3718_v50 = vpop.eup %3717 }
 0x2bc   : > { %v1294_v53 = vmul.f32 %v3718_v50, %v3706_v13 }
 0x2be   : > { %2513 = vmatmul.msk.f32.vlgmr.msra.gmra.mxu3 %vm1227_vm2, %v1294_v53 }
 0x2bf   : > { %1543 = vmatpush.msra.mxu3 %v1512_v54 }
 0x2c0   : > { %v1366_v6 = vpop.xlane.xlu2 %1365 }
 0x2c1   : > { %3719 = vrcp.f32 %v1366_v6  ;;  %1544 = vmatpush.msra.mxu3 %v1511_v56 }
 0x2c3   : > { %1545 = vmatpush.msra.mxu3 %v1510_v40 }
 0x2c5   : > { %1546 = vmatpush.msra.mxu3 %v1509_v23 }
 0x2c7   : > { %v3720_v63 = vpop.eup %3719  ;;  %1547 = vmatpush.msra.mxu3 %v1508_v60 }
 0x2c8   : > { %v1372_v2 = vmul.f32 %v3720_v63, %v3708_v24  ;;  %v1369_v3 = vpop.xlane.xlu1 %1368  ;;  %v1482_v24 = vld [vmem:[#allocation6 + $0x8] sm:$0xff]  ;;  %v1667_v63 = vld [vmem:[%s6006_s13 + $0x78] sm:$0xff] }
 0x2c9   : > { %v1444_v5 = vpop.xlane.xlu2 %1443  ;;  %3721 = vrcp.f32 %v1369_v3  ;;  %1548 = vmatpush.msra.mxu3 %v1507_v62  ;;  %1531 = vmatpush.msra.mxu2 %v1482_v24  ;;  %v1664_v3 = vld [vmem:[%s6006_s13 + $0x60] sm:$0xff] }
 0x2ca   : > { %3723 = vrcp.f32 %v1444_v5  ;;  %2514 = vmatmul.msk.f32.vlgmr.msrb.gmra.mxu3 %vm1351_vm4, %v1372_v2  ;;  %1672 = vmatpush.msrb.mxu0 %v1667_v63  ;;  %v1665_v2 = vld [vmem:[%s6006_s13 + $0x68] sm:$0xff]  ;;  %v1662_v5 = vld [vmem:[%s6006_s13 + $0x50] sm:$0xff] }
 0x2cb   : > { %1549 = vmatpush.msra.mxu3 %v1506_v4  ;;  %1532 = vmatpush.msra.mxu2 %v1481_v27  ;;  %v1663_v4 = vld [vmem:[%s6006_s13 + $0x58] sm:$0xff] }
 0x2cc   : > { %1673 = vmatpush.msrb.mxu0 %v1666_v0  ;;  %v1712_v0 = vld [vmem:[%s6008_s15 + $0x58] sm:$0xff] }
 0x2cd   : > { %1550 = vmatpush.msra.mxu3 %v1505_v8  ;;  %v1660_v8 = vld [vmem:[%s6006_s13 + $0x40] sm:$0xff] }
 0x2ce   : > { %1674 = vmatpush.msrb.mxu0 %v1665_v2 }
 0x2cf   : > { %v3722_v13 = vpop.eup %3721  ;;  %1551 = vmatpush.msra.mxu3 %v1504_v10  ;;  %v1658_v10 = vld [vmem:[%s6006_s13 + $0x30] sm:$0xff] }
 0x2d0   : > { %v3724_v15 = vpop.eup %3723  ;;  %v1447_v16 = vpop.xlane.xlu0 %1446  ;;  %v1373_v17 = vmul.f32 %v3722_v13, %v4188_v30  ;;  %v1499_v30 = vld [vmem:[#allocation6 + $0x90] sm:$0xff]  ;;  %1675 = vmatpush.msrb.mxu0 %v1664_v3  ;;  %v1655_v13 = vld [vmem:[%s6006_s13 + $0x18] sm:$0xff] }
 0x2d1   : > { %v1450_v19 = vmul.f32 %v3724_v15, %v4190_v32  ;;  %3725 = vrcp.f32 %v1447_v16  ;;  %1552 = vmatpush.msra.mxu3 %v1503_v12  ;;  %v1497_v32 = vld [vmem:[#allocation6 + $0x80] sm:$0xff]  ;;  %v1653_v15 = vld [vmem:[%s6006_s13 + $0x8] sm:$0xff] }
 0x2d2   : > { %2515 = vmatmul.msk.f32.gmra.mxu3 %vm1351_vm4, %v1373_v17  ;;  %1676 = vmatpush.msrb.mxu0 %v1663_v4  ;;  %v1656_v12 = vld [vmem:[%s6006_s13 + $0x20] sm:$0xff]  ;;  %v1711_v4 = vld [vmem:[%s6008_s15 + $0x50] sm:$0xff] }
 0x2d3   : > { %2516 = vmatmul.msk.f32.vlgmr.msra.gmra.mxu1 %vm1351_vm4, %v1450_v19  ;;  %1553 = vmatpush.msra.mxu3 %v1502_v18  ;;  %v1652_v17 = vld [vmem:[%s6006_s13] sm:$0xff] }
 0x2d4   : > { %1677 = vmatpush.msrb.mxu0 %v1662_v5 }
 0x2d5   : > { %1554 = vmatpush.msra.mxu3 %v1501_v28 }
 0x2d6   : > { %1678 = vmatpush.msrb.mxu0 %v1661_v7  ;;  %v1710_v7 = vld [vmem:[%s6008_s15 + $0x48] sm:$0xff] }
 0x2d7   : > { %v3726_v25 = vpop.eup %3725  ;;  %1555 = vmatpush.msra.mxu3 %v1500_v29 }
 0x2d8   : > { %v1451_v26 = vmul.f32 %v3726_v25, %v4196_v35  ;;  %1679 = vmatpush.msrb.mxu0 %v1660_v8 }
 0x2d9   : > { %1556 = vmatpush.msra.mxu3 %v1499_v30 }
 0x2da   : > { %1680 = vmatpush.msrb.mxu0 %v1659_v9  ;;  %v1709_v9 = vld [vmem:[%s6008_s15 + $0x40] sm:$0xff] }
 0x2db   : > { %2517 = vmatmul.msk.f32.gmra.mxu1 %vm1351_vm4, %v1451_v26  ;;  %1557 = vmatpush.msra.mxu3 %v1498_v31 }
 0x2dc   : > { %1681 = vmatpush.msrb.mxu0 %v1658_v10 }
 0x2dd   : > { %1558 = vmatpush.msra.mxu3 %v1497_v32 }
 0x2de   : > { %1682 = vmatpush.msrb.mxu0 %v1657_v11 }
 0x2e0   : > { %1683 = vmatpush.msrb.mxu0 %v1656_v12  ;;  %v1708_v12 = vld [vmem:[%s6008_s15 + $0x38] sm:$0xff] }
 0x2e2   : > { %1684 = vmatpush.msrb.mxu0 %v1655_v13 }
 0x2e4   : > { %1685 = vmatpush.msrb.mxu0 %v1654_v14 }
 0x2e6   : > { %1686 = vmatpush.msrb.mxu0 %v1653_v15 }
 0x2e8   : > { %1687 = vmatpush.msrb.mxu0 %v1652_v17 }
 0x339   : > { %v1259_v33 = vpop.f32.mrf.mxu3 }
 0x33a   : > { %1533 = vmatmul.f32.vlgmr.msra.gmra.mxu2 %v1259_v33 }
 0x341   : > { %v1315_v34 = vpop.f32.mrf.mxu3 }
 0x342   : > { %1559 = vmatmul.f32.vlgmr.msra.gmra.mxu3 %v1315_v34 }
 0x34d   : > { %v1397_v35 = vpop.f32.mrf.mxu3 }
 0x34e   : > { %1536 = vmatmul.f32.gmra.mxu2 %v1397_v35 }
 0x350   : > { %v1475_v36 = vpop.f32.mrf.mxu1 }
 0x351   : > { %1562 = vmatmul.f32.gmra.mxu3 %v1475_v36 }
 0x355   : > { %v1400_v37 = vpop.f32.mrf.mxu3 }
 0x356   : > { %1539 = vmatmul.f32.gmra.mxu2 %v1400_v37 }
 0x358   : > { %v1478_v38 = vpop.f32.mrf.mxu1 }
 0x359   : > { %1565 = vmatmul.f32.gmra.mxu3 %v1478_v38 }
 0x3bd   : > { %v1534_v44 = vpop.f32.mrf.mxu2 }
 0x3be   : > { %v1535_v48 = vadd.f32 %v3696_v39, %v1534_v44 }
 0x3c5   : > { %v1560_v50 = vpop.f32.mrf.mxu3 }
 0x3c6   : > { %v1561_v51 = vadd.f32 %v1560_v50, %v1535_v48  ;;  %v1716_v48 = vld [vmem:[%s6008_s15 + $0x78] sm:$0xff]  ;;  %v1715_v50 = vld [vmem:[%s6008_s15 + $0x70] sm:$0xff] }
 0x3c7   : > { %1721 = vmatpush.msrb.mxu1 %v1716_v48 }
 0x3c8   : > { %v4216_v52 = vadd.f32 %v1561_v51, %v4120_v43 }
 0x3c9   : > { %1722 = vmatpush.msrb.mxu1 %v1715_v50 }
 0x3ca   : > { %1574 = vadd.xlane.f32.xlu1 %v4216_v52  ;;  %v1583_v53 = vmul.f32 %v4216_v52, %v4216_v52 }
 0x3cc   : > { %1586 = vadd.xlane.f32.xlu2 %v1583_v53 }
 0x3d1   : > { %v1537_v54 = vpop.f32.mrf.mxu2 }
 0x3d2   : > { %v1538_v55 = vadd.f32 %v3696_v39, %v1537_v54  ;;  %v4297_v54 = vld [vmem:[%s6004_s11] ss:$0 sm:$0xff] }
 0x3d4   : > { %v1563_v56 = vpop.f32.mrf.mxu3 }
 0x3d5   : > { %v1564_v57 = vadd.f32 %v1563_v56, %v1538_v55 }
 0x3d7   : > { %v4222_v6 = vadd.f32 %v1564_v57, %v4134_v46 }
 0x3d9   : > { %1576 = vadd.xlane.f32.xlu0 %v4222_v6  ;;  %v1540_v40 = vpop.f32.mrf.mxu2  ;;  %v1584_v58 = vmul.f32 %v4222_v6, %v4222_v6 }
 0x3da   : > { %v1541_v23 = vadd.f32 %v3696_v39, %v1540_v40  ;;  %v1714_v40 = vld [vmem:[%s6008_s15 + $0x68] sm:$0xff] }
 0x3db   : > { %1588 = vadd.xlane.f32.xlu1 %v1584_v58  ;;  %1723 = vmatpush.msrb.mxu1 %v1714_v40 }
 0x3dc   : > { %v1566_v59 = vpop.f32.mrf.mxu3 }
 0x3dd   : > { %v1567_v60 = vadd.f32 %v1566_v59, %v1541_v23  ;;  %v1713_v59 = vld [vmem:[%s6008_s15 + $0x60] sm:$0xff] }
 0x3de   : > { %1724 = vmatpush.msrb.mxu1 %v1713_v59 }
 0x3df   : > { %v4228_v61 = vadd.f32 %v1567_v60, %v4143_v49 }
 0x3e0   : > { %1725 = vmatpush.msrb.mxu1 %v1712_v0 }
 0x3e1   : > { %1578 = vadd.xlane.f32.xlu2 %v4228_v61  ;;  %v1585_v62 = vmul.f32 %v4228_v61, %v4228_v61 }
 0x3e2   : > { %1726 = vmatpush.msrb.mxu1 %v1711_v4 }
 0x3e3   : > { %1590 = vadd.xlane.f32.xlu0 %v1585_v62 }
 0x3e4   : > { %1727 = vmatpush.msrb.mxu1 %v1710_v7 }
 0x3e6   : > { %1728 = vmatpush.msrb.mxu1 %v1709_v9 }
 0x3e8   : > { %1729 = vmatpush.msrb.mxu1 %v1708_v12 }
 0x43d   : > { %v1575_v16 = vpop.xlane.xlu1 %1574 }
 0x43e   : > { %v1580_v18 = vmul.f32 0.03125, %v1575_v16  ;;  %v1707_v16 = vld [vmem:[%s6008_s15 + $0x30] sm:$0xff] }
 0x43f   : > { %v1587_v19 = vpop.xlane.xlu2 %1586  ;;  %1730 = vmatpush.msrb.mxu1 %v1707_v16 }
 0x440   : > { %v1595_v20 = vmul.f32 %v1580_v18, %v1580_v18  ;;  %v1592_v21 = vmul.f32 0.03125, %v1587_v19  ;;  %v1601_v51 = vsub.f32 %v4216_v52, %v1580_v18  ;;  %v3698_v52 = vld [vmem:[%s6005_s12] ss:$0 sm:$0xff] }
 0x442   : > { %v1598_v24 = vsub.f32 %v1592_v21, %v1595_v20  ;;  %v1706_v20 = vld [vmem:[%s6008_s15 + $0x28] sm:$0xff] }
 0x443   : > { %1731 = vmatpush.msrb.mxu1 %v1706_v20 }
 0x444   : > { %v1604_v25 = vadd.f32 1e-05, %v1598_v24 }
 0x446   : > { %3727 = vrsqrt.f32 %v1604_v25  ;;  %vm1613_vm6 = vweird.f32 %v1604_v25 }
 0x44c   : > { %v3728_v26 = vpop.eup %3727  ;;  %v1577_v27 = vpop.xlane.xlu0 %1576 }
 0x44d   : > { %v1608_v28 = vmul.f32 %v3728_v26, %v1604_v25  ;;  %v4281_v29 = vmul.f32 0.03125, %v1577_v27  ;;  %vm1614_vm5 = vweird.f32 %v3728_v26  ;;  %v1704_v27 = vld [vmem:[%s6008_s15 + $0x18] sm:$0xff] }
 0x44e   : > { %v1589_v30 = vpop.xlane.xlu1 %1588  ;;  %vm1615_vm7 = vmor %vm1613_vm6, %vm1614_vm5 }
 0x44f   : > { %v1609_v31 = vmul.f32 %v3728_v26, %v1608_v28  ;;  %v1596_v32 = vmul.f32 %v4281_v29, %v4281_v29  ;;  %v1593_v33 = vmul.f32 0.03125, %v1589_v30  ;;  %v1602_v15 = vsub.f32 %v4222_v6, %v4281_v29  ;;  %v1705_v6 = vld [vmem:[%s6008_s15 + $0x20] sm:$0xff] }
 0x450   : > { %1732 = vmatpush.msrb.mxu1 %v1705_v6 }
 0x451   : > { %v1610_v34 = vmul.f32 0.5, %v1609_v31  ;;  %v1599_v35 = vsub.f32 %v1593_v33, %v1596_v32 }
 0x452   : > { %1733 = vmatpush.msrb.mxu1 %v1704_v27 }
 0x453   : > { %v1611_v36 = vsub.f32 1.5, %v1610_v34  ;;  %v1605_v37 = vadd.f32 1e-05, %v1599_v35  ;;  %v1703_v34 = vld [vmem:[%s6008_s15 + $0x10] sm:$0xff]  ;;  %v1702_v35 = vld [vmem:[%s6008_s15 + $0x8] sm:$0xff] }
 0x454   : > { %v1579_v38 = vpop.xlane.xlu2 %1578  ;;  %1734 = vmatpush.msrb.mxu1 %v1703_v34 }
 0x455   : > { %v1612_v39 = vmul.f32 %v3728_v26, %v1611_v36  ;;  %3729 = vrsqrt.f32 %v1605_v37  ;;  %v4285_v44 = vmul.f32 0.03125, %v1579_v38  ;;  %vm1623_vm9 = vweird.f32 %v1605_v37  ;;  %v3699_v36 = vld [vmem:[%s6007_s14] ss:$0 sm:$0xff] }
 0x456   : > { %v1591_v53 = vpop.xlane.xlu0 %1590  ;;  %1735 = vmatpush.msrb.mxu1 %v1702_v35 }
 0x457   : > { %v1616_v55 = vsel %vm1615_vm7, %v3728_v26, %v1612_v39  ;;  %v1597_v56 = vmul.f32 %v4285_v44, %v4285_v44  ;;  %v1594_v57 = vmul.f32 0.03125, %v1591_v53  ;;  %v1603_v29 = vsub.f32 %v4228_v61, %v4285_v44  ;;  %v1701_v61 = vld [vmem:[%s6008_s15] sm:$0xff] }
 0x458   : > { %v1637_v58 = vmul.f32 %v1616_v55, %v1601_v51  ;;  %1736 = vmatpush.msrb.mxu1 %v1701_v61 }
 0x459   : > { %v1600_v23 = vsub.f32 %v1594_v57, %v1597_v56  ;;  %v3700_v56 = vld [vmem:[%s6009_s16] ss:$0 sm:$0xff] }
 0x45a   : > { %v1643_v60 = vmul.f32 %v4297_v54, %v1637_v58 }
 0x45b   : > { %v3730_v62 = vpop.eup %3729  ;;  %v1606_v63 = vadd.f32 1e-05, %v1600_v23 }
 0x45c   : > { %v1618_v2 = vmul.f32 %v3730_v62, %v1605_v37  ;;  %v4314_v3 = vadd.f32 %v3698_v52, %v1643_v60  ;;  %vm1624_vm8 = vweird.f32 %v3730_v62 }
 0x45d   : > { %3731 = vrsqrt.f32 %v1606_v63  ;;  %vm1625_vm10 = vmor %vm1623_vm9, %vm1624_vm8  ;;  %vm1633_vm12 = vweird.f32 %v1606_v63 }
 0x45e   : > { %v1619_v5 = vmul.f32 %v3730_v62, %v1618_v2  ;;  %1688 = vmatmul.f32.vlgmr.msrb.gmra.mxu0 %v4314_v3 }
 0x460   : > { %v1620_v8 = vmul.f32 0.5, %v1619_v5 }
 0x462   : > { %v1621_v10 = vsub.f32 1.5, %v1620_v8 }
 0x463   : > { %v3732_v11 = vpop.eup %3731 }
 0x464   : > { %v1628_v13 = vmul.f32 %v3732_v11, %v1606_v63  ;;  %v1622_v14 = vmul.f32 %v3730_v62, %v1621_v10  ;;  %vm1634_vm11 = vweird.f32 %v3732_v11 }
 0x465   : > { %vm1635_vm13 = vmor %vm1633_vm12, %vm1634_vm11 }
 0x466   : > { %v1629_v17 = vmul.f32 %v3732_v11, %v1628_v13  ;;  %v1626_v18 = vsel %vm1625_vm10, %v3730_v62, %v1622_v14 }
 0x467   : > { %v1638_v19 = vmul.f32 %v1626_v18, %v1602_v15 }
 0x468   : > { %v1630_v21 = vmul.f32 0.5, %v1629_v17 }
 0x469   : > { %v1644_v24 = vmul.f32 %v4297_v54, %v1638_v19 }
 0x46a   : > { %v1631_v25 = vsub.f32 1.5, %v1630_v21 }
 0x46b   : > { %v1650_v26 = vadd.f32 %v3698_v52, %v1644_v24 }
 0x46c   : > { %v1632_v28 = vmul.f32 %v3732_v11, %v1631_v25 }
 0x46d   : > { %1691 = vmatmul.f32.gmra.mxu0 %v1650_v26 }
 0x46e   : > { %v1636_v30 = vsel %vm1635_vm13, %v3732_v11, %v1632_v28 }
 0x46f   : > { %v1639_v31 = vmul.f32 %v1636_v30, %v1603_v29 }
 0x471   : > { %v1645_v32 = vmul.f32 %v4297_v54, %v1639_v31 }
 0x473   : > { %v1651_v33 = vadd.f32 %v3698_v52, %v1645_v32 }
 0x475   : > { %1694 = vmatmul.f32.gmra.mxu0 %v1651_v33 }
 0x4db   : > { %v1689_v37 = vpop.f32.mrf.mxu0 }
 0x4dc   : > { %v1690_v38 = vadd.f32 %v3699_v36, %v1689_v37 }
 0x4de   : > { %v1698_v39 = vmax.f32 %v1690_v38, 0.0 }
 0x4e0   : > { %1737 = vmatmul.f32.vlgmr.msrb.gmra.mxu1 %v1698_v39 }
 0x4ea   : > { %v1692_v44 = vpop.f32.mrf.mxu0 }
 0x4eb   : > { %v1693_v48 = vadd.f32 %v3699_v36, %v1692_v44 }
 0x4ed   : > { %v1699_v50 = vmax.f32 %v1693_v48, 0.0  ;;  %v3702_v48 = vld [vmem:[%s6011_s18] ss:$0 sm:$0xff] }
 0x4ef   : > { %1740 = vmatmul.f32.gmra.mxu1 %v1699_v50 }
 0x4f2   : > { %v1695_v51 = vpop.f32.mrf.mxu0 }
 0x4f3   : > { %v1696_v53 = vadd.f32 %v3699_v36, %v1695_v51  ;;  %v3701_v36 = vld [vmem:[%s6010_s17] ss:$0 sm:$0xff] }
 0x4f5   : > { %v1700_v54 = vmax.f32 %v1696_v53, 0.0 }
 0x4f7   : > { %1743 = vmatmul.f32.gmra.mxu1 %v1700_v54 }
 0x55d   : > { %v1738_v55 = vpop.f32.mrf.mxu1 }
 0x55e   : > { %v1739_v58 = vadd.f32 %v3700_v56, %v1738_v55 }
 0x560   : > { %v4366_v23 = vadd.f32 %v1739_v58, %v4314_v3 }
 0x562   : > { %v1761_v63 = vmul.f32 %v4366_v23, %v4366_v23 }
 0x56c   : > { %v1741_v57 = vpop.f32.mrf.mxu1 }
 0x56d   : > { %v1742_v40 = vadd.f32 %v3700_v56, %v1741_v57 }
 0x56f   : > { %v4362_v52 = vadd.f32 %v1742_v40, %v1650_v26 }
 0x571   : > { %1754 = vadd.xlane.f32.xlu0 %v4362_v52  ;;  %v1762_v2 = vmul.f32 %v4362_v52, %v4362_v52 }
 0x574   : > { %v1744_v59 = vpop.f32.mrf.mxu1 }
 0x575   : > { %v1745_v60 = vadd.f32 %v3700_v56, %v1744_v59  ;;  %v1836_v56 = vstv %s1835_s23  ;;  %s2522_s23 = sld [smem:[#allocation8 + $0x5]] }
 0x577   : > { %v1749_v62 = vadd.f32 %v1745_v60, %v1651_v33  ;;  %v1831_v60 = vstv %s4373_s4  ;;  %s6059_s4 = sld [smem:[#allocation19_spill]] }
 0x579   : > { %1764 = vadd.xlane.f32.xlu0 %v1761_v63  ;;  %1756 = vadd.xlane.f32.xlu1 %v1749_v62  ;;  %v1763_v0 = vmul.f32 %v1749_v62, %v1749_v62  ;;  %v1834_v63 = vmul.f32 %v1831_v60, %v4143_v49  ;;  %v1833_v49 = vmul.f32 %v1831_v60, %v4134_v46 }
 0x57b   : > { %1768 = vadd.xlane.f32.xlu2 %v1763_v0 }
 0x57d   : > { %s905_s28 = scalar_lea.vmem %s6059_s4, %s4094_s6  ;;  %s2520_s6 = sld [smem:[#allocation8 + $0x3]] }
 0x581   : > { %1766 = vadd.xlane.f32.xlu1 %v1762_v2 }
 0x583   : > { %1752 = vadd.xlane.f32.xlu2 %v4366_v23 }
 0x5e4   : > { %v1755_v4 = vpop.xlane.xlu0 %1754 }
 0x5e5   : > { %v1759_v10 = vmul.f32 0.03125, %v1755_v4 }
 0x5e7   : > { %v1774_v14 = vmul.f32 %v1759_v10, %v1759_v10  ;;  %v1780_v57 = vsub.f32 %v4362_v52, %v1759_v10 }
 0x5ec   : > { %v1757_v5 = vpop.xlane.xlu1 %1756  ;;  %v1765_v16 = vpop.xlane.xlu0 %1764 }
 0x5ed   : > { %v1760_v3 = vmul.f32 0.03125, %v1757_v5  ;;  %v1770_v20 = vmul.f32 0.03125, %v1765_v16 }
 0x5ee   : > { %v1769_v7 = vpop.xlane.xlu2 %1768 }
 0x5ef   : > { %v1775_v8 = vmul.f32 %v1760_v3, %v1760_v3  ;;  %v1772_v9 = vmul.f32 0.03125, %v1769_v7  ;;  %v1781_v61 = vsub.f32 %v1749_v62, %v1760_v3 }
 0x5f1   : > { %v1778_v11 = vsub.f32 %v1772_v9, %v1775_v8 }
 0x5f3   : > { %v1784_v12 = vadd.f32 1e-05, %v1778_v11 }
 0x5f4   : > { %v1767_v13 = vpop.xlane.xlu1 %1766 }
 0x5f5   : > { %3733 = vrsqrt.f32 %v1784_v12  ;;  %v1771_v15 = vmul.f32 0.03125, %v1767_v13  ;;  %vm1811_vm15 = vweird.f32 %v1784_v12 }
 0x5f6   : > { %v1753_v17 = vpop.xlane.xlu2 %1752 }
 0x5f7   : > { %v1777_v18 = vsub.f32 %v1771_v15, %v1774_v14  ;;  %v1758_v19 = vmul.f32 0.03125, %v1753_v17  ;;  %v1832_v15 = vmul.f32 %v1831_v60, %v4120_v43  ;;  %v1972_v43 = vld [vmem:[%s6012_s19 + $0x10] sm:$0xff] }
 0x5f9   : > { %v1783_v21 = vadd.f32 1e-05, %v1777_v18  ;;  %v1773_v24 = vmul.f32 %v1758_v19, %v1758_v19  ;;  %v1779_v4 = vsub.f32 %v4366_v23, %v1758_v19  ;;  %v1973_v19 = vld [vmem:[%s6012_s19 + $0x18] sm:$0xff] }
 0x5fb   : > { %v3734_v6 = vpop.eup %3733  ;;  %3735 = vrsqrt.f32 %v1783_v21  ;;  %v1776_v25 = vsub.f32 %v1770_v20, %v1773_v24  ;;  %vm1801_vm5 = vweird.f32 %v1783_v21  ;;  %v1982_v20 = vld [vmem:[%s6013_s20 + $0x8] sm:$0xff]  ;;  %v1976_v24 = vld [vmem:[%s6012_s19 + $0x30] sm:$0xff] }
 0x5fc   : > { %v1806_v26 = vmul.f32 %v3734_v6, %v1784_v12  ;;  %vm1812_vm14 = vweird.f32 %v3734_v6 }
 0x5fd   : > { %v1782_v27 = vadd.f32 1e-05, %v1776_v25  ;;  %vm1813_vm1 = vmor %vm1811_vm15, %vm1812_vm14  ;;  %v1985_v25 = vld [vmem:[%s6013_s20 + $0x20] sm:$0xff] }
 0x5fe   : > { %v1807_v28 = vmul.f32 %v3734_v6, %v1806_v26  ;;  %v1978_v26 = vld [vmem:[%s6012_s19 + $0x40] sm:$0xff] }
 0x5ff   : > { %3737 = vrsqrt.f32 %v1782_v27  ;;  %vm1791_vm8 = vweird.f32 %v1782_v27 }
 0x600   : > { %v1808_v29 = vmul.f32 0.5, %v1807_v28  ;;  %v1987_v28 = vld [vmem:[%s6013_s20 + $0x30] sm:$0xff] }
 0x601   : > { %v3736_v30 = vpop.eup %3735 }
 0x602   : > { %v1809_v31 = vsub.f32 1.5, %v1808_v29  ;;  %v1796_v32 = vmul.f32 %v3736_v30, %v1783_v21  ;;  %vm1802_vm2 = vweird.f32 %v3736_v30  ;;  %v1975_v21 = vld [vmem:[%s6012_s19 + $0x28] sm:$0xff]  ;;  %v1988_v29 = vld [vmem:[%s6013_s20 + $0x38] sm:$0xff] }
 0x603   : > { %vm1803_vm6 = vmor %vm1801_vm5, %vm1802_vm2 }
 0x604   : > { %v1810_v33 = vmul.f32 %v3734_v6, %v1809_v31  ;;  %v1797_v34 = vmul.f32 %v3736_v30, %v1796_v32  ;;  %v1991_v31 = vld [vmem:[%s6013_s20 + $0x50] sm:$0xff]  ;;  %v1971_v32 = vld [vmem:[%s6012_s19 + $0x8] sm:$0xff] }
 0x605   : > { %v3738_v35 = vpop.eup %3737 }
 0x606   : > { %v1814_v37 = vsel %vm1813_vm1, %v3734_v6, %v1810_v33  ;;  %v1798_v38 = vmul.f32 0.5, %v1797_v34  ;;  %v1786_v39 = vmul.f32 %v3738_v35, %v1782_v27  ;;  %vm1792_vm7 = vweird.f32 %v3738_v35  ;;  %v1984_v6 = vld [vmem:[%s6013_s20 + $0x18] sm:$0xff]  ;;  %v1979_v27 = vld [vmem:[%s6012_s19 + $0x48] sm:$0xff]  ;;  %v1981_v33 = vld [vmem:[%s6013_s20] sm:$0xff] }
 0x607   : > { %v1817_v44 = vmul.f32 %v1814_v37, %v1781_v61  ;;  %vm1793_vm9 = vmor %vm1791_vm8, %vm1792_vm7  ;;  %v1983_v34 = vld [vmem:[%s6013_s20 + $0x10] sm:$0xff]  ;;  %v1977_v61 = vld [vmem:[%s6012_s19 + $0x38] sm:$0xff] }
 0x608   : > { %v1799_v50 = vsub.f32 1.5, %v1798_v38  ;;  %v1787_v51 = vmul.f32 %v3738_v35, %v1786_v39  ;;  %v1986_v39 = vld [vmem:[%s6013_s20 + $0x28] sm:$0xff] }
 0x609   : > { %v1823_v53 = vmul.f32 %v3701_v36, %v1817_v44 }
 0x60a   : > { %v1800_v54 = vmul.f32 %v3736_v30, %v1799_v50  ;;  %v1788_v55 = vmul.f32 0.5, %v1787_v51 }
 0x60b   : > { %v1829_v40 = vadd.f32 %v3702_v48, %v1823_v53 }
 0x60c   : > { %v1804_v58 = vsel %vm1803_vm6, %v3736_v30, %v1800_v54  ;;  %v1789_v59 = vsub.f32 1.5, %v1788_v55  ;;  %v1989_v30 = vld [vmem:[%s6013_s20 + $0x40] sm:$0xff] }
 0x60d   : > { %v1816_v62 = vmul.f32 %v1804_v58, %v1780_v57  ;;  %v1839_v0 = vmul.f32 %v1836_v56, %v1829_v40  ;;  %v1980_v40 = vld [vmem:[%s6012_s19 + $0x50] sm:$0xff] }
 0x60e   : > { %v1790_v2 = vmul.f32 %v3738_v35, %v1789_v59 }
 0x60f   : > { %v1842_v5 = vadd.f32 %v1839_v0, %v1834_v63  ;;  %v1822_v3 = vmul.f32 %v3701_v36, %v1816_v62 }
 0x610   : > { %v1794_v7 = vsel %vm1793_vm9, %v3738_v35, %v1790_v2 }
 0x611   : > { %v1815_v8 = vmul.f32 %v1794_v7, %v1779_v4  ;;  %v4387_v52 = vmul.f32 %v1842_v5, %v4140_v47  ;;  %v1828_v9 = vadd.f32 %v3702_v48, %v1822_v3 }
 0x613   : > { %v1821_v10 = vmul.f32 %v3701_v36, %v1815_v8  ;;  %v1862_v11 = vmul.f32 %v4387_v52, %v4387_v52  ;;  %v1838_v12 = vmul.f32 %v1836_v56, %v1828_v9  ;;  %v1990_v8 = vld [vmem:[%s6013_s20 + $0x48] sm:$0xff] }
 0x615   : > { %v1827_v13 = vadd.f32 %v3702_v48, %v1821_v10  ;;  %1865 = vadd.xlane.f32.xlu1 %v1862_v11  ;;  %v1841_v14 = vadd.f32 %v1838_v12, %v1833_v49 }
 0x617   : > { %v4393_v23 = vmul.f32 %v1841_v14, %v4131_v45  ;;  %v1837_v16 = vmul.f32 %v1836_v56, %v1827_v13  ;;  %v1970_v45 = vld [vmem:[%s6012_s19] sm:$0xff] }
 0x619   : > { %v1861_v47 = vmul.f32 %v4393_v23, %v4393_v23  ;;  %v1840_v17 = vadd.f32 %v1837_v16, %v1832_v15 }
 0x61b   : > { %1863 = vadd.xlane.f32.xlu2 %v1861_v47  ;;  %v4399_v18 = vmul.f32 %v1840_v17, %v4117_v42  ;;  %v1974_v42 = vld [vmem:[%s6012_s19 + $0x20] sm:$0xff] }
 0x61d   : > { %v1846_v46 = vmul.f32 %v4399_v18, %v4399_v18 }
 0x61f   : > { %1847 = vadd.xlane.f32.xlu0 %v1846_v46 }
 0x62e   : > { %2040 = vperm.xlu1 %3694, %v1970_v45  }
 0x633   : > { %2050 = vperm.xlu0 %3693, %v1972_v43   ;;  %2045 = vperm.xlu2 %3695, %v1971_v32  }
 0x636   : > { %2055 = vperm.xlu1 %3694, %v1973_v19  }
 0x63b   : > { %2060 = vperm.xlu0 %3693, %v1974_v42   ;;  %2128 = vperm.xlu2 %3695, %v1981_v33  }
 0x63e   : > { %2133 = vperm.xlu1 %3694, %v1982_v20  }
 0x643   : > { %2065 = vperm.xlu0 %3693, %v1975_v21   ;;  %2138 = vperm.xlu2 %3695, %v1983_v34  }
 0x646   : > { %2070 = vperm.xlu1 %3694, %v1976_v24  }
 0x64b   : > { %2143 = vperm.xlu0 %3693, %v1984_v6   ;;  %2075 = vperm.xlu2 %3695, %v1977_v61  }
 0x64e   : > { %2148 = vperm.xlu1 %3694, %v1985_v25  }
 0x653   : > { %2080 = vperm.xlu0 %3693, %v1978_v26   ;;  %2153 = vperm.xlu2 %3695, %v1986_v39  }
 0x656   : > { %2085 = vperm.xlu1 %3694, %v1979_v27  }
 0x65b   : > { %2158 = vperm.xlu0 %3693, %v1987_v28   ;;  %2090 = vperm.xlu2 %3695, %v1980_v40  }
 0x65e   : > { %2163 = vperm.xlu1 %3694, %v1988_v29  }
 0x663   : > { %2168 = vperm.xlu0 %3693, %v1989_v30   ;;  %2173 = vperm.xlu2 %3695, %v1990_v8  }
 0x666   : > { %2178 = vperm.xlu1 %3694, %v1991_v31  }
 0x688   : > { %v1866_v35 = vpop.xlane.xlu1 %1865 }
 0x689   : > { %v1868_v36 = vadd.f32 1e-26, %v1866_v35 }
 0x68b   : > { %3739 = vrsqrt.f32 %v1868_v36  ;;  %vm1885_vm11 = vweird.f32 %v1868_v36 }
 0x68e   : > { %v1864_v37 = vpop.xlane.xlu2 %1863 }
 0x68f   : > { %v1867_v38 = vadd.f32 1e-26, %v1864_v37 }
 0x691   : > { %v3740_v44 = vpop.eup %3739  ;;  %3741 = vrsqrt.f32 %v1867_v38  ;;  %vm1875_vm14 = vweird.f32 %v1867_v38 }
 0x692   : > { %v1880_v48 = vmul.f32 %v3740_v44, %v1868_v36  ;;  %v1848_v50 = vpop.xlane.xlu0 %1847  ;;  %vm1886_vm10 = vweird.f32 %v3740_v44 }
 0x693   : > { %v1849_v51 = vadd.f32 1e-26, %v1848_v50  ;;  %vm1887_vm12 = vmor %vm1885_vm11, %vm1886_vm10 }
 0x694   : > { %v1881_v53 = vmul.f32 %v3740_v44, %v1880_v48 }
 0x695   : > { %3743 = vrsqrt.f32 %v1849_v51  ;;  %vm1856_vm2 = vweird.f32 %v1849_v51 }
 0x696   : > { %v1882_v54 = vmul.f32 0.5, %v1881_v53  ;;  %v2046_v15 = vpop.permute.xlu2 %2045 }
 0x697   : > { %v3742_v55 = vpop.eup %3741 }
 0x698   : > { %v1883_v56 = vsub.f32 1.5, %v1882_v54  ;;  %v1870_v57 = vmul.f32 %v3742_v55, %v1867_v38  ;;  %vm1876_vm13 = vweird.f32 %v3742_v55 }
 0x699   : > { %vm1877_vm15 = vmor %vm1875_vm14, %vm1876_vm13 }
 0x69a   : > { %v1884_v58 = vmul.f32 %v3740_v44, %v1883_v56  ;;  %v1871_v59 = vmul.f32 %v3742_v55, %v1870_v57 }
 0x69b   : > { %v3744_v60 = vpop.eup %3743 }
 0x69c   : > { %v1888_v62 = vsel %vm1887_vm12, %v3740_v44, %v1884_v58  ;;  %v1872_v63 = vmul.f32 0.5, %v1871_v59  ;;  %v1851_v0 = vmul.f32 %v3744_v60, %v1849_v51  ;;  %vm1857_vm1 = vweird.f32 %v3744_v60 }
 0x69d   : > { %v1890_v2 = vmul.f32 %v1888_v62, %v4387_v52  ;;  %vm1858_vm5 = vmor %vm1856_vm2, %vm1857_vm1 }
 0x69e   : > { %v1873_v4 = vsub.f32 1.5, %v1872_v63  ;;  %v1852_v5 = vmul.f32 %v3744_v60, %v1851_v0  ;;  %v2129_v17 = vpop.permute.xlu2 %2128 }
 0x69f   : > { %2028 = vmatpush.xpose.msrb.mxu2 %v1890_v2 }
 0x6a0   : > { %v1853_v3 = vmul.f32 0.5, %v1852_v5  ;;  %v1874_v7 = vmul.f32 %v3742_v55, %v1873_v4  ;;  %v2041_v13 = vpop.permute.xlu1 %2040 }
 0x6a2   : > { %v1854_v9 = vsub.f32 1.5, %v1853_v3  ;;  %v1878_v10 = vsel %vm1877_vm15, %v3742_v55, %v1874_v7 }
 0x6a3   : > { %v1889_v11 = vmul.f32 %v1878_v10, %v4393_v23  ;;  %v2034_v23 = vsel %vm1319_vm3, 1, %v3898_v1 }
 0x6a4   : > { %v1855_v49 = vmul.f32 %v3744_v60, %v1854_v9  ;;  %v2035_v21 = vperm.slane %v2034_v23, 0 }
 0x6a5   : > { %2029 = vmatpush.xpose.msrb.mxu2 %v1889_v11  ;;  %v2051_v14 = vpop.permute.xlu0 %2050 }
 0x6a6   : > { %v1859_v52 = vsel %vm1858_vm5, %v3744_v60, %v1855_v49  ;;  %v2139_v43 = vpop.permute.xlu2 %2138  ;;  %vm2036_vm6 = vcmp.eq.s32.totalorder %v2035_v21, 1 }
 0x6a7   : > { %v1860_v12 = vmul.f32 %v1859_v52, %v4399_v18 }
 0x6a8   : > { %v2056_v16 = vpop.permute.xlu1 %2055 }
 0x6a9   : > { %2030 = vmatmul.f32.vlgmr.msrb.gmra.mxu2 %v1860_v12 }
 0x6ad   : > { %v2061_v47 = vpop.permute.xlu0 %2060 }
 0x6ae   : > { %v2076_v20 = vpop.permute.xlu2 %2075 }
 0x6b0   : > { %v2134_v46 = vpop.permute.xlu1 %2133 }
 0x6b5   : > { %v2066_v45 = vpop.permute.xlu0 %2065 }
 0x6b6   : > { %v2154_v30 = vpop.permute.xlu2 %2153 }
 0x6b8   : > { %v2071_v19 = vpop.permute.xlu1 %2070 }
 0x6bd   : > { %v2144_v42 = vpop.permute.xlu0 %2143 }
 0x6be   : > { %v2091_v7 = vpop.permute.xlu2 %2090 }
 0x6c0   : > { %v2149_v24 = vpop.permute.xlu1 %2148 }
 0x6c5   : > { %v2081_v18 = vpop.permute.xlu0 %2080 }
 0x6c8   : > { %v2086_v41 = vpop.permute.xlu1 %2085 }
 0x6cd   : > { %v2159_v40 = vpop.permute.xlu0 %2158 }
 0x6d0   : > { %v2164_v11 = vpop.permute.xlu1 %2163 }
 0x72c   : > { %v2031_v6 = vpop.f32.mrf.mxu2 }
 0x72d   : > { %v2037_v25 = vsel %vm2036_vm6, %v2031_v6, 10000.0 }
 0x72e   : > { %v2094_v26 = vsub.f32 %v2037_v25, %v2046_v15  ;;  %v2093_v27 = vsub.f32 %v2037_v25, %v2041_v13  ;;  %v2095_v28 = vsub.f32 %v2037_v25, %v2051_v14  ;;  %v2097_v29 = vsub.f32 %v2037_v25, %v2061_v47 }
 0x72f   : > { %v2098_v31 = vsub.f32 %v2037_v25, %v2066_v45  ;;  %v2096_v32 = vsub.f32 %v2037_v25, %v2056_v16  ;;  %v2100_v38 = vsub.f32 %v2037_v25, %v2076_v20  ;;  %v2099_v53 = vsub.f32 %v2037_v25, %v2071_v19 }
 0x730   : > { %v2105_v33 = vsub.f32 0.0, %v2094_v26  ;;  %v2104_v34 = vsub.f32 0.0, %v2093_v27  ;;  %v2106_v35 = vsub.f32 0.0, %v2095_v28  ;;  %v2108_v61 = vsub.f32 0.0, %v2097_v29 }
 0x731   : > { %v2109_v36 = vsub.f32 0.0, %v2098_v31  ;;  %v2107_v37 = vsub.f32 0.0, %v2096_v32  ;;  %v2111_v59 = vsub.f32 0.0, %v2100_v38  ;;  %v2101_v0 = vsub.f32 %v2037_v25, %v2081_v18 }
 0x732   : > { %v2116_v39 = vmul.f32 %v2105_v33, %v2094_v26  ;;  %v2115_v44 = vmul.f32 %v2104_v34, %v2093_v27  ;;  %v2117_v48 = vmul.f32 %v2106_v35, %v2095_v28  ;;  %v2119_v50 = vmul.f32 %v2108_v61, %v2097_v29  ;;  %v2179_v29 = vpop.permute.xlu1 %2178 }
 0x733   : > { %v2118_v51 = vmul.f32 %v2107_v37, %v2096_v32  ;;  %v2120_v57 = vmul.f32 %v2109_v36, %v2098_v31  ;;  %v2110_v4 = vsub.f32 0.0, %v2099_v53  ;;  %v2112_v3 = vsub.f32 0.0, %v2101_v0  ;;  %v2174_v31 = vpop.permute.xlu2 %2173 }
 0x734   : > { %v2182_v54 = vmul.f32 %v2134_v46, %v2116_v39  ;;  %v2181_v55 = vmul.f32 %v2129_v17, %v2115_v44  ;;  %v2183_v56 = vmul.f32 %v2139_v43, %v2117_v48  ;;  %v2185_v58 = vmul.f32 %v2149_v24, %v2119_v50  ;;  %v2169_v46 = vpop.permute.xlu0 %2168 }
 0x735   : > { %v2184_v2 = vmul.f32 %v2144_v42, %v2118_v51  ;;  %v2186_v5 = vmul.f32 %v2154_v30, %v2120_v57  ;;  %v2122_v9 = vmul.f32 %v2111_v59, %v2100_v38  ;;  %v2103_v10 = vsub.f32 %v2037_v25, %v2091_v7 }
 0x736   : > { %v2194_v60 = vmul.f32 1.442695, %v2182_v54  ;;  %v2192_v62 = vmul.f32 1.442695, %v2181_v55  ;;  %v2196_v63 = vmul.f32 1.442695, %v2183_v56  ;;  %v2121_v52 = vmul.f32 %v2110_v4, %v2099_v53 }
 0x737   : > { %v2200_v8 = vmul.f32 1.442695, %v2185_v58  ;;  %v2198_v49 = vmul.f32 1.442695, %v2184_v2  ;;  %v2102_v12 = vsub.f32 %v2037_v25, %v2086_v41  ;;  %v2202_v13 = vmul.f32 1.442695, %v2186_v5 }
 0x738   : > { %3745 = vpow2.f32 %v2194_v60  ;;  %v2123_v14 = vmul.f32 %v2112_v3, %v2101_v0  ;;  %v2188_v16 = vmul.f32 %v2164_v11, %v2122_v9  ;;  %v2114_v47 = vsub.f32 0.0, %v2103_v10  ;;  %v1911_v56 = vld [vmem:[%s905_s28] sm:$0xff]  ;;  %s4563_s28 = sld [smem:[#allocation8 + $0x1]] }
 0x739   : > { %3747 = vpow2.f32 %v2192_v62  ;;  %v2187_v43 = vmul.f32 %v2159_v40, %v2121_v52  ;;  %v2113_v19 = vsub.f32 0.0, %v2102_v12  ;;  %v2527_v57 = vmul.f32 -0.5, %v1911_v56 }
 0x73a   : > { %3749 = vpow2.f32 %v2196_v63  ;;  %v2189_v20 = vmul.f32 %v2169_v46, %v2123_v14  ;;  %v2206_v24 = vmul.f32 1.442695, %v2188_v16  ;;  %v2125_v18 = vmul.f32 %v2114_v47, %v2103_v10 }
 0x73b   : > { %3751 = vpow2.f32 %v2200_v8  ;;  %v2204_v6 = vmul.f32 1.442695, %v2187_v43  ;;  %v2124_v25 = vmul.f32 %v2113_v19, %v2102_v12  ;;  %v1914_v40 = vmul.f32 1.442695, %v2527_v57  ;;  %v1992_v43 = vld [vmem:[%s6014_s21] sm:$0xff] }
 0x73c   : > { %3753 = vpow2.f32 %v2198_v49  ;;  %v2208_v27 = vmul.f32 1.442695, %v2189_v20  ;;  %v2191_v32 = vmul.f32 %v2179_v29, %v2125_v18  ;;  %v1905_v62 = vrot.slane %v4111_v22, 4  ;;  %v1993_v20 = vld [vmem:[%s6014_s21 + $0x8] sm:$0xff] }
 0x73d   : > { %3755 = vpow2.f32 %v2202_v13  ;;  %v2190_v34 = vmul.f32 %v2174_v31, %v2124_v25  ;;  %v1942_v12 = vstv %s2521_s9  ;;  %v1940_v13 = vstv %s2520_s6  ;;  %s4573_s9 = sld [smem:[#allocation8]] }
 0x73e   : > { %v3746_v15 = vpop.eup %3745  ;;  %3757 = vpow2.f32 %v2206_v24  ;;  %v2212_v41 = vmul.f32 1.442695, %v2191_v32  ;;  %v1906_v0 = vadd.f32 %v1905_v62, %v4111_v22  ;;  %v1945_v47 = vstv %s2522_s23  ;;  %s4601_s6 = sld [smem:[#allocation8 + $0x2]] }
 0x73f   : > { %v3748_v17 = vpop.eup %3747  ;;  %v2217_v45 = vsel %vm1351_vm4, %v3746_v15, 0.0  ;;  %3759 = vpow2.f32 %v2204_v6  ;;  %v2210_v36 = vmul.f32 1.442695, %v2190_v34  ;;  %v1962_v46 = vstv %s2523_s27 }
 0x740   : > { %v3750_v42 = vpop.eup %3749  ;;  %2218 = vadd.xlane.f32.xlu2 %v2217_v45  ;;  %v2214_v23 = vsel %vm1351_vm4, %v3748_v17, 0.0  ;;  %3761 = vpow2.f32 %v2208_v27  ;;  %v1907_v4 = vrot.slane %v1906_v0, 2  ;;  %v1964_v45 = vstv %s2524_s5 }
 0x741   : > { %2215 = vadd.xlane.f32.xlu0 %v2214_v23  ;;  %v2220_v21 = vsel %vm1351_vm4, %v3750_v42, 0.0  ;;  %v3752_v26 = vpop.eup %3751  ;;  %3763 = vpow2.f32 %v2212_v41  ;;  %v1967_v23 = vstv %s2525_s26 }
 0x742   : > { %2221 = vadd.xlane.f32.xlu1 %v2220_v21  ;;  %v3754_v28 = vpop.eup %3753  ;;  %v2226_v33 = vsel %vm1351_vm4, %v3752_v26, 0.0  ;;  %3765 = vpow2.f32 %v2210_v36  ;;  %v1908_v3 = vadd.f32 %v1907_v4, %v1906_v0 }
 0x743   : > { %v3756_v30 = vpop.eup %3755  ;;  %v2223_v35 = vsel %vm1351_vm4, %v3754_v28, 0.0  ;;  %3767 = vpow2.f32 %v1914_v40 }
 0x744   : > { %v2229_v61 = vsel %vm1351_vm4, %v3756_v30, 0.0  ;;  %v3758_v37 = vpop.eup %3757  ;;  %v1909_v10 = vrot.slane %v1908_v3, 1  ;;  %v4512_v30 = vld [vmem:[%s4101_s0] sm:$0xff] }
 0x745   : > { %v3760_v38 = vpop.eup %3759  ;;  %v2235_v44 = vsel %vm1351_vm4, %v3758_v37, 0.0 }
 0x746   : > { %v3762_v39 = vpop.eup %3761  ;;  %v2232_v48 = vsel %vm1351_vm4, %v3760_v38, 0.0  ;;  %v4492_v52 = vadd.f32 %v1909_v10, %v1908_v3  ;;  %v1994_v38 = vld [vmem:[%s6014_s21 + $0x10] sm:$0xff] }
 0x747   : > { %v2238_v50 = vsel %vm1351_vm4, %v3762_v39, 0.0  ;;  %v3764_v51 = vpop.eup %3763 }
 0x748   : > { %2227 = vadd.xlane.f32.xlu2 %v2226_v33  ;;  %v3766_v53 = vpop.eup %3765  ;;  %v2244_v54 = vsel %vm1351_vm4, %v3764_v51, 0.0  ;;  %v1943_v14 = vmul.f32 %v1942_v12, %v4492_v52  ;;  %v1965_v42 = vmul.f32 %v1964_v45, %v4492_v52 }
 0x749   : > { %2224 = vadd.xlane.f32.xlu0 %v2223_v35  ;;  %v2241_v55 = vsel %vm1351_vm4, %v3766_v53, 0.0  ;;  %v3768_v58 = vpop.eup %3767 }
 0x74a   : > { %2230 = vadd.xlane.f32.xlu1 %v2229_v61  ;;  %v1916_v59 = vadd.f32 1.0, %v3768_v58 }
 0x74c   : > { %3769 = vrcp.f32 %v1916_v59  ;;  %vm1922_vm3 = vweird.f32 %v1916_v59  ;;  %v1928_v7 = vand.u32 2147483648, %v1916_v59  ;;  %v1926_v9 = vand.u32 2147483647, %v1916_v59 }
 0x74e   : > { %v1929_v11 = vor.u32 1.1754944e-38, %v1928_v7  ;;  %vm1927_vm8 = vcmp.eq.f32.partialorder %v1926_v9, 8.507059e+37 }
 0x750   : > { %2236 = vadd.xlane.f32.xlu2 %v2235_v44 }
 0x751   : > { %2233 = vadd.xlane.f32.xlu0 %v2232_v48 }
 0x752   : > { %2239 = vadd.xlane.f32.xlu1 %v2238_v50  ;;  %v3770_v60 = vpop.eup %3769 }
 0x753   : > { %v1918_v63 = vmul.f32 %v3770_v60, %v1916_v59  ;;  %vm1923_vm4 = vweird.f32 %v3770_v60 }
 0x754   : > { %vm1924_vm7 = vmor %vm1922_vm3, %vm1923_vm4 }
 0x755   : > { %v1919_v2 = vsub.f32 1.0, %v1918_v63 }
 0x757   : > { %v1920_v5 = vmul.f32 %v3770_v60, %v1919_v2 }
 0x758   : > { %2245 = vadd.xlane.f32.xlu2 %v2244_v54 }
 0x759   : > { %2242 = vadd.xlane.f32.xlu0 %v2241_v55  ;;  %v1921_v8 = vadd.f32 %v3770_v60, %v1920_v5 }
 0x75b   : > { %v1925_v49 = vsel %vm1924_vm7, %v3770_v60, %v1921_v8 }
 0x75c   : > { %v4494_v22 = vsel %vm1927_vm8, %v1929_v11, %v1925_v49  ;;  %v1995_v11 = vld [vmem:[%s6014_s21 + $0x18] sm:$0xff] }
 0x75d   : > { %v1941_v15 = vmul.f32 %v1940_v13, %v4494_v22  ;;  %v1963_v19 = vmul.f32 %v1962_v46, %v4494_v22 }
 0x75f   : > { %v1944_v16 = vadd.f32 %v1943_v14, %v1941_v15  ;;  %v1966_v18 = vadd.f32 %v1965_v42, %v1963_v19 }
 0x761   : > { %v1946_v17 = vadd.f32 %v1945_v47, %v1944_v16  ;;  %v1968_v25 = vadd.f32 %v1967_v23, %v1966_v18 }
 0x763   : > { %3771 = vrcp.f32 %v1946_v17  ;;  %v1969_v31 = vmul.f32 %v4512_v30, %v1968_v25  ;;  %vm1952_vm10 = vweird.f32 %v1946_v17  ;;  %v1958_v57 = vand.u32 2147483648, %v1946_v17 }
 0x764   : > { %v1956_v60 = vand.u32 2147483647, %v1946_v17 }
 0x765   : > { %v2332_v34 = vsel %vm6020_vm0, %v1969_v31, 0.0  ;;  %v1959_v4 = vor.u32 1.1754944e-38, %v1958_v57 }
 0x766   : > { %2333 = vadd.xlane.f32.xlu0 %v2332_v34  ;;  %vm1957_vm13 = vcmp.eq.f32.partialorder %v1956_v60, 8.507059e+37  ;;  %v1932_v60 = vstv %s4573_s9 }
 0x769   : > { %v3772_v28 = vpop.eup %3771 }
 0x76a   : > { %v1948_v33 = vmul.f32 %v3772_v28, %v1946_v17  ;;  %vm1953_vm11 = vweird.f32 %v3772_v28 }
 0x76b   : > { %vm4537_vm12 = vmor %vm1952_vm10, %vm1953_vm11 }
 0x76c   : > { %v1949_v36 = vsub.f32 1.0, %v1948_v33 }
 0x76e   : > { %v1950_v48 = vmul.f32 %v3772_v28, %v1949_v36 }
 0x770   : > { %v1951_v56 = vadd.f32 %v3772_v28, %v1950_v48  ;;  %v1934_v48 = vstv %s4563_s28  ;;  %s908_s28 = scalar_lea.vmem %s6018_s25, %s6233_s1 }
 0x772   : > { %v1955_v2 = vsel %vm4537_vm12, %v3772_v28, %v1951_v56 }
 0x773   : > { %v4558_v13 = vsel %vm1957_vm13, %v1959_v4, %v1955_v2 }
 0x774   : > { %v2585_v19 = vceil.f32 %v4558_v13  ;;  %vm2584_vm15 = vcmp.lt.s32.totalorder %v4558_v13, 0  ;;  %vm6026_vm6 = vcmp.lt.f32.partialorder %v4558_v13, 0 }
 0x7b3   : > { %v2219_v21 = vpop.xlane.xlu2 %2218 }
 0x7b4   : > { %v2216_v24 = vpop.xlane.xlu0 %2215  ;;  %v2248_v26 = vmul.f32 %v2219_v21, %v1993_v20  ;;  %v2586_v20 = vfloor.f32 %v4558_v13 }
 0x7b5   : > { %v2247_v6 = vmul.f32 %v2216_v24, %v1992_v43  ;;  %v2222_v39 = vpop.xlane.xlu1 %2221  ;;  %v4570_v43 = vand.u32 2147483647, %v4558_v13 }
 0x7b6   : > { %v4515_v32 = vmax.f32 %v2248_v26, 1e-10  ;;  %v2249_v51 = vmul.f32 %v2222_v39, %v1994_v38 }
 0x7b7   : > { %v4506_v27 = vmax.f32 %v2247_v6, 1e-10  ;;  %v2592_v33 = vfloor.f32 %v4570_v43  ;;  %vm6021_vm2 = vcmp.eq.f32.partialorder %v4570_v43, 2139095040  ;;  %vm2590_vm8 = vcmp.lt.f32.partialorder %v4570_v43, 1266679808 }
 0x7b8   : > { %v4520_v41 = vand.u32 2147483647, %v4515_v32  ;;  %v4535_v58 = vmax.f32 %v2249_v51, 1e-10 }
 0x7b9   : > { %v4509_v29 = vand.u32 2147483647, %v4506_v27 }
 0x7ba   : > { %v2639_v50 = vand.u32 8388607, %v4520_v41  ;;  %v4548_v7 = vand.u32 2147483647, %v4535_v58  ;;  %v2635_v2 = vand.u32 2139095040, %v4520_v41 }
 0x7bb   : > { %v2538_v35 = vand.u32 8388607, %v4509_v29  ;;  %v2534_v18 = vand.u32 2139095040, %v4509_v29  ;;  %vm2603_vm12 = vcmp.gt.f32.partialorder %v4509_v29, 1065353216  ;;  %vm2569_vm0 = vcmp.eq.f32.partialorder %v4509_v29, 1.0 }
 0x7bc   : > { %v2640_v54 = vor.u32 8388608, %v2639_v50  ;;  %v2225_v49 = vpop.xlane.xlu0 %2224  ;;  %v2740_v47 = vand.u32 8388607, %v4548_v7 }
 0x7bd   : > { %v2539_v61 = vor.u32 8388608, %v2538_v35  ;;  %v2250_v17 = vmul.f32 %v2225_v49, %v1995_v11  ;;  %v2228_v49 = vpop.xlane.xlu2 %2227 }
 0x7be   : > { %v2642_v62 = vand.u32 8388607, %v2640_v54  ;;  %v2741_v42 = vor.u32 8388608, %v2740_v47 }
 0x7bf   : > { %v2541_v37 = vand.u32 8388607, %v2539_v61  ;;  %v4580_v26 = vmax.f32 %v2250_v17, 1e-10  ;;  %v2587_v61 = vsel %vm2584_vm15, %v2585_v19, %v2586_v20  ;;  %v3900_v19 = vmov 2139095040   ;;  %vm4681_vm15 = vmxor %vm6026_vm6, %vm2603_vm12 }
 0x7c0   : > { %v4543_v0 = vor.u32 1065353216, %v2642_v62  ;;  %v2743_v25 = vand.u32 8388607, %v2741_v42  ;;  %vm2588_vm5 = vcmp.ne.f32.partialorder %v4558_v13, %v2587_v61 }
 0x7c1   : > { %v4525_v44 = vor.u32 1065353216, %v2541_v37  ;;  %v2535_v37 = vshrl.u32 %v2534_v18, 23  ;;  %vm4620_vm3 = vmor %vm2588_vm5, %vm6021_vm2  ;;  %vm2616_vm5 = vcmp.eq.f32.partialorder %v4506_v27, 3212836864  ;;  %vm2805_vm2 = vcmp.gt.f32.partialorder %v4548_v7, 1065353216 }
 0x7c2   : > { %vm2644_vm14 = vcmp.ge.f32.partialorder %v4543_v0, 1.4142135  ;;  %v2645_v8 = vmul.f32 0.5, %v4543_v0  ;;  %v4583_v35 = vor.u32 1065353216, %v2743_v25  ;;  %vm2596_vm7 = vmneg %vm4620_vm3 }
 0x7c3   : > { %vm2543_vm9 = vcmp.ge.f32.partialorder %v4525_v44, 1.4142135  ;;  %v2544_v53 = vmul.f32 0.5, %v4525_v44  ;;  %v2631_v62 = vadd.s32 4294967169, %v2535_v37 }
 0x7c4   : > { %v2646_v12 = vsel %vm2644_vm14, %v2645_v8, %v4543_v0  ;;  %vm2745_vm1 = vcmp.ge.f32.partialorder %v4583_v35, 1.4142135  ;;  %v2746_v39 = vmul.f32 0.5, %v4583_v35  ;;  %v1996_v8 = vld [vmem:[%s6014_s21 + $0x20] sm:$0xff] }
 0x7c5   : > { %v2545_v55 = vsel %vm2543_vm9, %v2544_v53, %v4525_v44  ;;  %v4560_v15 = vadd.f32 -1.0, %v2646_v12  ;;  %v4591_v53 = vand.u32 2147483647, %v4580_v26  ;;  %v1933_v12 = vmul.f32 %v1932_v60, %v4494_v22 }
 0x7c6   : > { %v4533_v40 = vadd.f32 -1.0, %v2545_v55  ;;  %v2593_v55 = vcvt.f32.s32 %v2592_v33  ;;  %v2747_v56 = vsel %vm2745_vm1, %v2746_v39, %v4583_v35  ;;  %v2546_v17 = vadd.s32 1, %v2631_v62 }
 0x7c7   : > { %v4567_v45 = vmul.f32 %v4560_v15, %v4560_v15  ;;  %v4599_v59 = vadd.f32 -1.0, %v2747_v56  ;;  %v2841_v11 = vand.u32 8388607, %v4591_v53  ;;  %v4629_v22 = vsel %vm6026_vm6, 0, %v3900_v19  ;;  %v2231_v56 = vpop.xlane.xlu1 %2230 }
 0x7c8   : > { %v2549_v63 = vmul.f32 %v4533_v40, %v4533_v40  ;;  %v2251_v18 = vmul.f32 %v2228_v49, %v1996_v8  ;;  %v2620_v61 = vxor.u32 2147483648, %v4629_v22  ;;  %v2237_v49 = vpop.xlane.xlu2 %2236 }
 0x7c9   : > { %v2651_v21 = vmul.f32 0.12621109, %v4567_v45  ;;  %v2653_v24 = vmul.f32 -0.20706727, %v4567_v45  ;;  %v2842_v42 = vor.u32 8388608, %v2841_v11 }
 0x7ca   : > { %v2550_v5 = vmul.f32 0.12621109, %v2549_v63  ;;  %v2552_v3 = vmul.f32 -0.20706727, %v2549_v63 }
 0x7cb   : > { %v2652_v28 = vadd.f32 0.21545328, %v2651_v21  ;;  %v2654_v34 = vadd.f32 -0.23896284, %v2653_v24  ;;  %v2844_v25 = vand.u32 8388607, %v2842_v42 }
 0x7cc   : > { %v2551_v9 = vadd.f32 0.21545328, %v2550_v5  ;;  %v2553_v10 = vadd.f32 -0.23896284, %v2552_v3  ;;  %v4608_v5 = vmul.f32 %v4599_v59, %v4599_v59  ;;  %v1935_v3 = vmul.f32 %v1934_v48, %v4492_v52  ;;  %v1999_v42 = vld [vmem:[%s6014_s21 + $0x38] sm:$0xff] }
 0x7cd   : > { %v2655_v36 = vmul.f32 %v2652_v28, %v4567_v45  ;;  %v2657_v51 = vmul.f32 %v2654_v34, %v4567_v45  ;;  %v1937_v34 = vstv %s4601_s6  ;;  %v4640_v37 = vor.u32 1065353216, %v2844_v25 }
 0x7ce   : > { %v2554_v14 = vmul.f32 %v2551_v9, %v2549_v63  ;;  %v2556_v16 = vmul.f32 %v2553_v10, %v2549_v63  ;;  %v2594_v10 = vand.u32 1, %v2593_v55  ;;  %v2754_v47 = vmul.f32 -0.20706727, %v4608_v5 }
 0x7cf   : > { %v2656_v50 = vadd.f32 0.28795174, %v2655_v36  ;;  %v2658_v4 = vadd.f32 -0.3607037, %v2657_v51  ;;  %v1936_v28 = vadd.f32 %v1935_v3, %v1933_v12  ;;  %vm2846_vm11 = vcmp.ge.f32.partialorder %v4640_v37, 1.4142135 }
 0x7d0   : > { %v2555_v46 = vadd.f32 0.28795174, %v2554_v14  ;;  %v2557_v6 = vadd.f32 -0.3607037, %v2556_v16  ;;  %v2752_v16 = vmul.f32 0.12621109, %v4608_v5 }
 0x7d1   : > { %v2659_v57 = vmul.f32 %v2656_v50, %v4567_v45  ;;  %v2661_v20 = vmul.f32 %v2658_v4, %v4567_v45  ;;  %v2755_v24 = vadd.f32 -0.23896284, %v2754_v47  ;;  %vm2595_vm4 = vcmp.eq.s32.totalorder %v2594_v10, 1  ;;  %v2013_v14 = vld [vmem:[%s6015_s22 + $0x50] sm:$0xff] }
 0x7d2   : > { %v2558_v23 = vmul.f32 %v2555_v46, %v2549_v63  ;;  %v2560_v38 = vmul.f32 %v2557_v6, %v2549_v63  ;;  %v2753_v21 = vadd.f32 0.21545328, %v2752_v16  ;;  %vm4644_vm10 = vmand %vm2595_vm4, %vm2596_vm7  ;;  %v2847_v55 = vmul.f32 0.5, %v4640_v37 }
 0x7d3   : > { %v2660_v52 = vadd.f32 0.48090908, %v2659_v57  ;;  %v2758_v36 = vmul.f32 %v2755_v24, %v4608_v5  ;;  %v2662_v50 = vadd.f32 -0.72134733, %v2661_v20  ;;  %v1938_v57 = vadd.f32 %v1937_v34, %v1936_v28  ;;  %vm4663_vm13 = vmand %vm2590_vm8, %vm4644_vm10 }
 0x7d4   : > { %v2559_v31 = vadd.f32 0.48090908, %v2558_v23  ;;  %v2636_v23 = vshrl.u32 %v2635_v2, 23  ;;  %v2756_v33 = vmul.f32 %v2753_v21, %v4608_v5  ;;  %v2848_v4 = vsel %vm2846_vm11, %v2847_v55, %v4640_v37 }
 0x7d5   : > { %v2759_v2 = vadd.f32 -0.3607037, %v2758_v36  ;;  %v2665_v8 = vmul.f32 %v4560_v15, %v2662_v50  ;;  %v4672_v10 = vadd.f32 -1.0, %v2848_v4  ;;  %vm2570_vm4 = vcmp.eq.f32.partialorder %v4509_v29, 0.0  ;;  %v2240_v50 = vpop.xlane.xlu1 %2239 }
 0x7d6   : > { %v2562_v54 = vmul.f32 %v2559_v31, %v2549_v63  ;;  %v2561_v63 = vadd.f32 -0.72134733, %v2560_v38  ;;  %v2663_v31 = vmul.f32 %v2660_v52, %v4567_v45  ;;  %v2547_v38 = vsel %vm2543_vm9, %v2546_v17, %v2631_v62  ;;  %v1997_v62 = vld [vmem:[%s6014_s21 + $0x28] sm:$0xff] }
 0x7d7   : > { %v2732_v48 = vadd.s32 4294967169, %v2636_v23  ;;  %v2757_v51 = vadd.f32 0.28795174, %v2756_v33  ;;  %v4648_v45 = vmax.f32 %v2251_v18, 1e-10  ;;  %vm2600_vm9 = vcmp.eq.f32.partialorder %v4506_v27, 0 }
 0x7d8   : > { %v2563_v9 = vadd.f32 1.442695, %v2562_v54  ;;  %v2564_v46 = vmul.f32 %v4533_v40, %v2561_v63  ;;  %v2664_v44 = vadd.f32 1.442695, %v2663_v31  ;;  %v2567_v63 = vcvt.s32.f32 %v2547_v38  ;;  %vm4707_vm8 = vmand %vm6026_vm6, %vm2600_vm9  ;;  %v1998_v38 = vld [vmem:[%s6014_s21 + $0x30] sm:$0xff] }
 0x7d9   : > { %v2760_v60 = vmul.f32 %v2757_v51, %v4608_v5  ;;  %v2647_v3 = vadd.s32 1, %v2732_v48  ;;  %v4675_v11 = vand.u32 2147483647, %v4648_v45  ;;  %v2252_v47 = vmul.f32 %v2231_v56, %v1997_v62  ;;  %vm2614_vm12 = vmor %vm4707_vm8, %vm4681_vm15 }
 0x7da   : > { %v2565_v6 = vadd.f32 %v2564_v46, %v2563_v9  ;;  %v2736_v9 = vand.u32 2139095040, %v4548_v7  ;;  %v4688_v17 = vsel %vm4663_vm13, %v2620_v61, %v4629_v22  ;;  %v2666_v46 = vadd.f32 %v2665_v8, %v2664_v44 }
 0x7db   : > { %v2761_v16 = vadd.f32 0.48090908, %v2760_v60  ;;  %v4692_v19 = vmul.f32 %v4672_v10, %v4672_v10  ;;  %v4699_v23 = vmul.f32 %v4512_v30, %v1938_v57  ;;  %vm2599_vm7 = vcmp.lt.f32.partialorder %v4506_v27, 0 }
 0x7dc   : > { %v2566_v54 = vmul.f32 %v4533_v40, %v2565_v6  ;;  %v2762_v21 = vmul.f32 %v2759_v2, %v4608_v5  ;;  %vm2572_vm10 = vweird.f32 %v4509_v29  ;;  %v2648_v30 = vsel %vm2644_vm14, %v2647_v3, %v2732_v48  ;;  %v2234_v6 = vpop.xlane.xlu0 %2233 }
 0x7dd   : > { %v2737_v24 = vshrl.u32 %v2736_v9, 23  ;;  %v2853_v18 = vmul.f32 0.12621109, %v4692_v19  ;;  %v2764_v28 = vmul.f32 %v2761_v16, %v4608_v5  ;;  %v2855_v31 = vmul.f32 -0.20706727, %v4692_v19  ;;  %v2002_v9 = vld [vmem:[%s6014_s21 + $0x50] sm:$0xff] }
 0x7de   : > { %v2568_v12 = vadd.f32 %v2567_v63, %v2566_v54  ;;  %v2942_v33 = vand.u32 8388607, %v4675_v11  ;;  %v4724_v34 = vmax.f32 %v2252_v47, 1e-10  ;;  %v2254_v61 = vmul.f32 %v2237_v49, %v1999_v42  ;;  %v2246_v49 = vpop.xlane.xlu2 %2245 }
 0x7df   : > { %v2667_v0 = vmul.f32 %v4560_v15, %v2666_v46  ;;  %v2854_v36 = vadd.f32 0.21545328, %v2853_v18  ;;  %vm2571_vm14 = vcmp.lt.f32.partialorder %v4509_v29, 0.0  ;;  %v2615_v5 = vsel %vm2614_vm12, 2139095040, %v3898_v1  ;;  %v2000_v15 = vld [vmem:[%s6014_s21 + $0x40] sm:$0xff] }
 0x7e0   : > { %v2573_v25 = vsel %vm2572_vm10, %v4509_v29, %v2568_v12  ;;  %v2763_v39 = vadd.f32 -0.72134733, %v2762_v21  ;;  %v2943_v48 = vor.u32 8388608, %v2942_v33  ;;  %v2668_v54 = vcvt.s32.f32 %v2648_v30 }
 0x7e1   : > { %v2574_v51 = vsel %vm2571_vm14, nan, %v2573_v25  ;;  %v2833_v55 = vadd.s32 4294967169, %v2737_v24  ;;  %v2857_v56 = vmul.f32 %v2854_v36, %v4692_v19  ;;  %v4746_v57 = vsel %vm2599_vm7, %v4688_v17, %v4629_v22 }
 0x7e2   : > { %v2765_v44 = vadd.f32 1.442695, %v2764_v28  ;;  %v2856_v60 = vadd.f32 -0.23896284, %v2855_v31  ;;  %v2945_v62 = vand.u32 8388607, %v2943_v48  ;;  %v2253_v4 = vmul.f32 %v2234_v6, %v1998_v38 }
 0x7e3   : > { %v4749_v63 = vand.u32 2147483647, %v4724_v34  ;;  %v4751_v2 = vmax.f32 %v2254_v61, 1e-10  ;;  %v2669_v3 = vadd.f32 %v2668_v54, %v2667_v0  ;;  %vm6022_vm15 = vcmp.eq.f32.partialorder %v4515_v32, 0  ;;  %v2001_v28 = vld [vmem:[%s6014_s21 + $0x48] sm:$0xff] }
 0x7e4   : > { %v2255_v8 = vmul.f32 %v2240_v50, %v2000_v15  ;;  %v2766_v12 = vmul.f32 %v4599_v59, %v2763_v39  ;;  %v2858_v52 = vadd.f32 0.28795174, %v2857_v56  ;;  %v4758_v16 = vor.u32 1065353216, %v2945_v62  ;;  %v2243_v31 = vpop.xlane.xlu0 %2242 }
 0x7e5   : > { %v2575_v47 = vsel %vm2570_vm4, -inf, %v2574_v51  ;;  %v4764_v46 = vsel %vm2616_vm5, 1065353216, %v2615_v5  ;;  %vm2671_vm8 = vcmp.eq.f32.partialorder %v4520_v41, 0.0  ;;  %v2748_v42 = vadd.s32 1, %v2833_v55 }
 0x7e6   : > { %vm2672_vm10 = vcmp.lt.f32.partialorder %v4520_v41, 0.0  ;;  %vm2673_vm12 = vweird.f32 %v4520_v41  ;;  %v2767_v20 = vadd.f32 %v2766_v12, %v2765_v44  ;;  %v2859_v21 = vmul.f32 %v2856_v60, %v4692_v19 }
 0x7e7   : > { %v4771_v30 = vand.u32 2147483647, %v4751_v2  ;;  %v4773_v24 = vmax.f32 %v2253_v4, 1e-10  ;;  %v2257_v18 = vmul.f32 %v2246_v49, %v2002_v9  ;;  %vm2670_vm4 = vcmp.eq.f32.partialorder %v4520_v41, 1.0 }
 0x7e8   : > { %v2674_v6 = vsel %vm2673_vm12, %v4520_v41, %v2669_v3  ;;  %v4777_v25 = vmax.f32 %v2255_v8, 1e-10  ;;  %v2576_v33 = vsel %vm2569_vm0, 0.0, %v2575_v47  ;;  %v2861_v61 = vmul.f32 %v2858_v52, %v4692_v19 }
 0x7e9   : > { %vm2947_vm5 = vcmp.ge.f32.partialorder %v4758_v16, 1.4142135  ;;  %vm2700_vm14 = vcmp.lt.f32.partialorder %v4515_v32, 0  ;;  %v2749_v0 = vsel %vm2745_vm1, %v2748_v42, %v2833_v55  ;;  %v2837_v36 = vand.u32 2139095040, %v4591_v53 }
 0x7ea   : > { %v2948_v38 = vmul.f32 0.5, %v4758_v16  ;;  %v2675_v5 = vsel %vm2672_vm10, nan, %v2674_v6  ;;  %vm2704_vm12 = vcmp.gt.f32.partialorder %v4520_v41, 1065353216  ;;  %v2768_v39 = vmul.f32 %v4599_v59, %v2767_v20 }
 0x7eb   : > { %v2860_v48 = vadd.f32 -0.3607037, %v2859_v21  ;;  %vm6023_vm0 = vcmp.eq.f32.partialorder %v4535_v58, 0  ;;  %v4796_v15 = vmax.f32 %v2257_v18, 1e-10  ;;  %v2256_v50 = vmul.f32 %v2243_v31, %v2001_v28  ;;  %vm4814_vm1 = vmxor %vm6026_vm6, %vm2704_vm12 }
 0x7ec   : > { %v2577_v35 = vmul.f32 %v2576_v33, %v4558_v13  ;;  %v2949_v51 = vsel %vm2947_vm5, %v2948_v38, %v4758_v16  ;;  %v4803_v54 = vand.u32 2147483647, %v4773_v24  ;;  %v2769_v55 = vcvt.s32.f32 %v2749_v0 }
 0x7ed   : > { %v2862_v56 = vadd.f32 0.48090908, %v2861_v61  ;;  %v4805_v44 = vadd.f32 -1.0, %v2949_v51  ;;  %v4808_v59 = vand.u32 2147483647, %v4777_v25  ;;  %v2676_v60 = vsel %vm2671_vm8, -inf, %v2675_v5  ;;  %vm4843_vm8 = vmand %vm6026_vm6, %vm6022_vm15 }
 0x7ee   : > { %v4822_v4 = vsel %vm2700_vm14, %v4688_v17, %v4629_v22  ;;  %v2838_v3 = vshrl.u32 %v2837_v36, 23  ;;  %v4827_v8 = vsel %vm6026_vm6, 2139095040, %v3898_v1  ;;  %v2770_v9 = vadd.f32 %v2769_v55, %v2768_v39  ;;  %vm2715_vm10 = vmor %vm4843_vm8, %vm4814_vm1 }
 0x7ef   : > { %v2863_v49 = vmul.f32 %v2860_v48, %v4692_v19  ;;  %v4832_v12 = vmul.f32 %v4805_v44, %v4805_v44  ;;  %v4835_v52 = vand.u32 2147483647, %v4796_v15  ;;  %v4837_v47 = vmax.f32 %v2256_v50, 1e-10  ;;  %vm4867_vm8 = vmxor %vm6026_vm6, %vm2805_vm2 }
 0x7f0   : > { %3773 = vpow2.f32 %v2577_v35  ;;  %v2938_v20 = vand.u32 2139095040, %v4675_v11  ;;  %v2677_v21 = vsel %vm2670_vm4, 0.0, %v2676_v60  ;;  %v2865_v18 = vmul.f32 %v2862_v56, %v4692_v19  ;;  %vm4881_vm2 = vmand %vm6026_vm6, %vm6023_vm0 }
 0x7f1   : > { %v2954_v6 = vmul.f32 0.12621109, %v4832_v12  ;;  %v2956_v28 = vmul.f32 -0.20706727, %v4832_v12  ;;  %vm2774_vm12 = vweird.f32 %v4548_v7  ;;  %v2934_v31 = vadd.s32 4294967169, %v2838_v3  ;;  %vm4898_vm0 = vmand %vm2599_vm7, %vm4620_vm3 }
 0x7f2   : > { %v3043_v33 = vand.u32 8388607, %v4749_v63  ;;  %v2775_v61 = vsel %vm2774_vm12, %v4548_v7, %v2770_v9  ;;  %v2864_v0 = vadd.f32 -0.72134733, %v2863_v49  ;;  %v2678_v5 = vmul.f32 %v2677_v21, %v4558_v13 }
 0x7f3   : > { %v2955_v36 = vadd.f32 0.21545328, %v2954_v6  ;;  %v2957_v38 = vadd.f32 -0.23896284, %v2956_v28  ;;  %v2716_v19 = vsel %vm2715_vm10, 2139095040, %v3898_v1  ;;  %v2939_v39 = vshrl.u32 %v2938_v20, 23 }
 0x7f4   : > { %v3044_v48 = vor.u32 8388608, %v3043_v33  ;;  %vm2717_vm4 = vcmp.eq.f32.partialorder %v4515_v32, 3212836864  ;;  %vm2773_vm1 = vcmp.lt.f32.partialorder %v4548_v7, 0.0  ;;  %v2866_v35 = vadd.f32 1.442695, %v2865_v18 }
 0x7f5   : > { %v2958_v51 = vmul.f32 %v2955_v36, %v4832_v12  ;;  %v2960_v55 = vmul.f32 %v2957_v38, %v4832_v12  ;;  %v4874_v60 = vand.u32 2147483647, %v4837_v47  ;;  %vm2771_vm10 = vcmp.eq.f32.partialorder %v4548_v7, 1.0 }
 0x7f6   : > { %v3774_v56 = vpop.eup %3773  ;;  %v2776_v62 = vsel %vm2773_vm1, nan, %v2775_v61  ;;  %v3046_v3 = vand.u32 8388607, %v3044_v48  ;;  %v2849_v49 = vadd.s32 1, %v2934_v31  ;;  %v2867_v42 = vmul.f32 %v4672_v10, %v2864_v0  ;;  %vm2816_vm1 = vmor %vm4881_vm2, %vm4867_vm8 }
 0x7f7   : > { %v2959_v20 = vadd.f32 0.28795174, %v2958_v51  ;;  %v2961_v21 = vadd.f32 -0.3607037, %v2960_v55  ;;  %vm2602_vm12 = vcmp.lt.s32.totalorder %v4506_v27, 0  ;;  %3775 = vpow2.f32 %v2678_v5 }
 0x7f8   : > { %vm2772_vm15 = vcmp.eq.f32.partialorder %v4548_v7, 0.0  ;;  %v3035_v18 = vadd.s32 4294967169, %v2939_v39  ;;  %v4892_v6 = vor.u32 1065353216, %v3046_v3  ;;  %v2868_v61 = vadd.f32 %v2867_v42, %v2866_v35 }
 0x7f9   : > { %v2777_v33 = vsel %vm2772_vm15, -inf, %v2776_v62  ;;  %v2962_v0 = vmul.f32 %v2959_v20, %v4832_v12  ;;  %v2964_v36 = vmul.f32 %v2961_v21, %v4832_v12  ;;  %v2606_v38 = vsel %vm4898_vm0, 2143289344, %v3774_v56  ;;  %vm4953_vm0 = vmand %vm2700_vm14, %vm4620_vm3 }
 0x7fa   : > { %vm2801_vm8 = vcmp.lt.f32.partialorder %v4535_v58, 0  ;;  %vm6024_vm2 = vcmp.ge.f32.partialorder %v4892_v6, 1.4142135  ;;  %v3049_v5 = vmul.f32 0.5, %v4892_v6  ;;  %v2817_v39 = vsel %vm2816_vm1, 2139095040, %v3898_v1 }
 0x7fb   : > { %v2850_v48 = vsel %vm2846_vm11, %v2849_v49, %v2934_v31  ;;  %v2963_v50 = vadd.f32 0.48090908, %v2962_v0  ;;  %v2965_v35 = vadd.f32 -0.72134733, %v2964_v36  ;;  %v2778_v51 = vsel %vm2771_vm10, 0.0, %v2777_v33  ;;  %vm2609_vm10 = vmand %vm2602_vm12, %vm4663_vm13 }
 0x7fc   : > { %vm2818_vm7 = vcmp.eq.f32.partialorder %v4535_v58, 3212836864  ;;  %v2950_v55 = vadd.s32 1, %v3035_v18  ;;  %v3050_v56 = vsel %vm6024_vm2, %v3049_v5, %v4892_v6  ;;  %v2608_v62 = vsel %vm2600_vm9, %v4827_v8, %v2606_v38 }
 0x7fd   : > { %v2869_v3 = vmul.f32 %v4672_v10, %v2868_v61  ;;  %v2966_v37 = vmul.f32 %v2963_v50, %v4832_v12  ;;  %v4923_v31 = vadd.f32 -1.0, %v3050_v56  ;;  %v3776_v9 = vpop.eup %3775  ;;  %v4927_v49 = vsel %vm2717_vm4, 1065353216, %v2716_v19 }
 0x7fe   : > { %v4929_v42 = vsel %vm2818_vm7, 1065353216, %v2817_v39  ;;  %v4935_v20 = vsel %vm2801_vm8, %v4688_v17, %v4629_v22  ;;  %v2870_v21 = vcvt.s32.f32 %v2850_v48  ;;  %vm2703_vm11 = vcmp.lt.s32.totalorder %v4515_v32, 0 }
 0x7ff   : > { %v2779_v10 = vmul.f32 %v2778_v51, %v4558_v13  ;;  %v2967_v12 = vadd.f32 1.442695, %v2966_v37  ;;  %v2968_v28 = vmul.f32 %v4805_v44, %v2965_v35  ;;  %v4942_v19 = vmul.f32 %v4923_v31, %v4923_v31 }
 0x800   : > { %v2610_v33 = vxor.u32 2147483648, %v2608_v62  ;;  %vm2875_vm9 = vweird.f32 %v4591_v53  ;;  %v2951_v61 = vsel %vm2947_vm5, %v2950_v55, %v3035_v18  ;;  %v3144_v0 = vand.u32 8388607, %v4803_v54 }
 0x801   : > { %vm2604_vm15 = vcmp.eq.f32.partialorder %v4509_v29, 2139095040  ;;  %v2871_v38 = vadd.f32 %v2870_v21, %v2869_v3  ;;  %v2969_v5 = vadd.f32 %v2968_v28, %v2967_v12  ;;  %v3055_v39 = vmul.f32 0.12621109, %v4942_v19 }
 0x802   : > { %v3057_v48 = vmul.f32 -0.20706727, %v4942_v19  ;;  %vm2624_vm5 = vcmp.ne.f32.partialorder %v4506_v27, %v4506_v27  ;;  %vm4963_vm4 = vcmp.ne.f32.partialorder %v4558_v13, %v4558_v13  ;;  %v2707_v18 = vsel %vm4953_vm0, 2143289344, %v3776_v9 }
 0x803   : > { %vm2906_vm14 = vcmp.gt.f32.partialorder %v4591_v53, 1065353216  ;;  %v3039_v50 = vand.u32 2139095040, %v4749_v63  ;;  %v3145_v35 = vor.u32 8388608, %v3144_v0  ;;  %3777 = vpow2.f32 %v2779_v10 }
 0x804   : > { %v2970_v51 = vmul.f32 %v4805_v44, %v2969_v5  ;;  %v3056_v55 = vadd.f32 0.21545328, %v3055_v39  ;;  %v3058_v56 = vadd.f32 -0.23896284, %v3057_v48  ;;  %v2611_v3 = vsel %vm2609_vm10, %v2610_v33, %v2608_v62  ;;  %vm4990_vm0 = vmxor %vm6026_vm6, %vm2906_vm14 }
 0x805   : > { %vm6025_vm1 = vcmp.eq.f32.partialorder %v4580_v26, 0  ;;  %v2971_v37 = vcvt.s32.f32 %v2951_v61  ;;  %v3147_v9 = vand.u32 8388607, %v3145_v35  ;;  %vm6086_vm7 = vcmp.eq.f32.partialorder %v4515_v32, 0 }
 0x806   : > { %v2709_v21 = vsel %vm6086_vm7, %v4827_v8, %v2707_v18  ;;  %v2876_v12 = vsel %vm2875_vm9, %v4591_v53, %v2871_v38  ;;  %v3059_v28 = vmul.f32 %v3056_v55, %v4942_v19  ;;  %v3061_v10 = vmul.f32 %v3058_v56, %v4942_v19  ;;  %vm5006_vm14 = vmand %vm6026_vm6, %vm6025_vm1 }
 0x807   : > { %v2972_v62 = vadd.f32 %v2971_v37, %v2970_v51  ;;  %v3040_v33 = vshrl.u32 %v3039_v50, 23  ;;  %v4994_v61 = vor.u32 1065353216, %v3147_v9  ;;  %vm6089_vm9 = vcmp.eq.f32.partialorder %v4570_v43, 2139095040  ;;  %vm2710_vm1 = vmand %vm2703_vm11, %vm4663_vm13 }
 0x808   : > { %v2618_v0 = vsel %vm6089_vm9, %v4764_v46, %v2611_v3  ;;  %vm2874_vm10 = vcmp.lt.f32.partialorder %v4591_v53, 0.0  ;;  %v3060_v36 = vadd.f32 0.28795174, %v3059_v28  ;;  %v3062_v38 = vadd.f32 -0.3607037, %v3061_v10  ;;  %vm5036_vm7 = vmand %vm2801_vm8, %vm4620_vm3 }
 0x809   : > { %v2711_v5 = vxor.u32 2147483648, %v2709_v21  ;;  %v2877_v39 = vsel %vm2874_vm10, nan, %v2876_v12  ;;  %vm6027_vm9 = vcmp.ge.f32.partialorder %v4994_v61, 1.4142135  ;;  %v3150_v46 = vmul.f32 0.5, %v4994_v61  ;;  %v3778_v18 = vpop.eup %3777  ;;  %vm2917_vm10 = vmor %vm5006_vm14, %vm4990_vm0 }
 0x80a   : > { %vm2873_vm12 = vcmp.eq.f32.partialorder %v4591_v53, 0.0  ;;  %vm2976_vm2 = vweird.f32 %v4675_v11  ;;  %v3063_v50 = vmul.f32 %v3060_v36, %v4942_v19  ;;  %v3065_v35 = vmul.f32 %v3062_v38, %v4942_v19 }
 0x80b   : > { %v2623_v51 = vsel %vm2604_vm15, %v4746_v57, %v2618_v0  ;;  %v2977_v55 = vsel %vm2976_vm2, %v4675_v11, %v2972_v62  ;;  %v3136_v56 = vadd.s32 4294967169, %v3040_v33  ;;  %v3151_v3 = vsel %vm6027_vm9, %v3150_v46, %v4994_v61 }
 0x80c   : > { %vm2705_vm6 = vcmp.eq.f32.partialorder %v4520_v41, 2139095040  ;;  %v2878_v57 = vsel %vm2873_vm12, -inf, %v2877_v39  ;;  %vm2902_vm11 = vcmp.lt.f32.partialorder %v4580_v26, 0  ;;  %v3064_v37 = vadd.f32 0.48090908, %v3063_v50 }
 0x80d   : > { %v3066_v9 = vadd.f32 -0.72134733, %v3065_v35  ;;  %v5041_v12 = vadd.f32 -1.0, %v3151_v3  ;;  %v2712_v28 = vsel %vm2710_vm1, %v2711_v5, %v2709_v21  ;;  %vm2725_vm2 = vcmp.ne.f32.partialorder %v4515_v32, %v4515_v32  ;;  %vm5061_vm1 = vmor %vm2624_vm5, %vm4963_vm4 }
 0x80e   : > { %v2808_v10 = vsel %vm5036_vm7, 2143289344, %v3778_v18  ;;  %v2918_v62 = vsel %vm2917_vm10, 2139095040, %v3898_v1  ;;  %vm2975_vm8 = vcmp.lt.f32.partialorder %v4675_v11, 0.0  ;;  %vm2804_vm15 = vcmp.lt.s32.totalorder %v4535_v58, 0 }
 0x80f   : > { %vm6029_vm12 = vcmp.eq.f32.partialorder %v4558_v13, 1065353216  ;;  %v2978_v33 = vsel %vm2975_vm8, nan, %v2977_v55  ;;  %v3067_v44 = vmul.f32 %v3064_v37, %v4942_v19  ;;  %v3140_v0 = vand.u32 2139095040, %v4803_v54 }
 0x810   : > { %v5069_v36 = vmul.f32 %v5041_v12, %v5041_v12  ;;  %v2627_v38 = vsel %vm5061_vm1, 2143289344, %v2623_v51  ;;  %vm6096_vm0 = vcmp.eq.f32.partialorder %v4591_v53, 1.0  ;;  %vm2919_vm5 = vcmp.eq.f32.partialorder %v4580_v26, 3212836864 }
 0x811   : > { %v2879_v5 = vsel %vm6096_vm0, 0.0, %v2878_v57  ;;  %vm2974_vm7 = vcmp.eq.f32.partialorder %v4675_v11, 0.0  ;;  %v3051_v39 = vadd.s32 1, %v3136_v56  ;;  %vm2702_vm14 = vcmp.eq.f32.partialorder %v4515_v32, 1065353216 }
 0x812   : > { %v3068_v19 = vadd.f32 1.442695, %v3067_v44  ;;  %v3069_v48 = vmul.f32 %v4923_v31, %v3066_v9  ;;  %v3156_v46 = vmul.f32 0.12621109, %v5069_v36  ;;  %v3158_v18 = vmul.f32 -0.20706727, %v5069_v36 }
 0x813   : > { %vm6097_vm10 = vcmp.eq.f32.partialorder %v4570_v43, 2139095040  ;;  %vm6098_vm8 = vcmp.eq.f32.partialorder %v4535_v58, 0  ;;  %v2979_v51 = vsel %vm2974_vm7, -inf, %v2978_v33  ;;  %v3245_v55 = vand.u32 8388607, %v4771_v30 }
 0x814   : > { %v2719_v50 = vsel %vm6097_vm10, %v4927_v49, %v2712_v28  ;;  %v2810_v35 = vsel %vm6098_vm8, %v4827_v8, %v2808_v10  ;;  %v3070_v3 = vadd.f32 %v3069_v48, %v3068_v19  ;;  %v3141_v29 = vshrl.u32 %v3140_v0, 23 }
 0x815   : > { %v3157_v57 = vadd.f32 0.21545328, %v3156_v46  ;;  %v3159_v37 = vadd.f32 -0.23896284, %v3158_v18  ;;  %v2880_v9 = vmul.f32 %v2879_v5, %v4558_v13  ;;  %vm2973_vm1 = vcmp.eq.f32.partialorder %v4675_v11, 1.0 }
 0x816   : > { %vm6099_vm0 = vcmp.ge.f32.partialorder %v4892_v6, 1.4142135  ;;  %v3246_v44 = vor.u32 8388608, %v3245_v55  ;;  %vm6100_vm10 = vcmp.eq.f32.partialorder %v4558_v13, 0  ;;  %vm6101_vm9 = vcmp.eq.f32.partialorder %v4506_v27, 1065353216 }
 0x817   : > { %v3052_v21 = vsel %vm6099_vm0, %v3051_v39, %v3136_v56  ;;  %vm2628_vm8 = vmor %vm6101_vm9, %vm6100_vm10  ;;  %v2980_v49 = vsel %vm2973_vm1, 0.0, %v2979_v51  ;;  %v3071_v28 = vmul.f32 %v4923_v31, %v3070_v3  ;;  %v3160_v10 = vmul.f32 %v3157_v57, %v5069_v36 }
 0x818   : > { %v3162_v33 = vmul.f32 %v3159_v37, %v5069_v36  ;;  %v2629_v0 = vsel %vm2628_vm8, 1065353216, %v2627_v38  ;;  %v2724_v5 = vsel %vm2705_vm6, %v4822_v4, %v2719_v50  ;;  %v2812_v6 = vxor.u32 2147483648, %v2810_v35  ;;  %vm5116_vm6 = vmor %vm2725_vm2, %vm4963_vm4 }
 0x819   : > { %v3248_v56 = vand.u32 8388607, %v3246_v44  ;;  %v3072_v39 = vcvt.s32.f32 %v3052_v21  ;;  %v3237_v19 = vadd.s32 4294967169, %v3141_v29  ;;  %v3161_v48 = vadd.f32 0.28795174, %v3160_v10  ;;  %vm2811_vm2 = vmand %vm2804_vm15, %vm4663_vm13 }
 0x81a   : > { %v3163_v46 = vadd.f32 -0.3607037, %v3162_v33  ;;  %3779 = vpow2.f32 %v2880_v9  ;;  %v5106_v31 = vsel %vm2902_vm11, %v4688_v17, %v4629_v22  ;;  %v2981_v18 = vmul.f32 %v2980_v49, %v4558_v13  ;;  %vm6104_vm1 = vmmov %vm6100_vm10 }
 0x81b   : > { %v5109_v38 = vor.u32 1065353216, %v3248_v56  ;;  %vm2806_vm9 = vcmp.eq.f32.partialorder %v4548_v7, 2139095040  ;;  %v5123_v4 = vsel %vm2919_vm5, 1065353216, %v2918_v62  ;;  %v3073_v50 = vadd.f32 %v3072_v39, %v3071_v28  ;;  %vm2729_vm0 = vmor %vm2702_vm14, %vm6104_vm1 }
 0x81c   : > { %v3164_v51 = vmul.f32 %v3161_v48, %v5069_v36  ;;  %v3166_v55 = vmul.f32 %v3163_v46, %v5069_v36  ;;  %v5130_v3 = vsel %vm6029_vm12, %v4506_v27, %v2629_v0  ;;  %v2728_v29 = vsel %vm5116_vm6, 2143289344, %v2724_v5 }
 0x81d   : > { %vm2826_vm5 = vcmp.ne.f32.partialorder %v4535_v58, %v4535_v58  ;;  %vm6028_vm7 = vcmp.ge.f32.partialorder %v5109_v38, 1.4142135  ;;  %v3251_v62 = vmul.f32 0.5, %v5109_v38  ;;  %v2813_v57 = vsel %vm2811_vm2, %v2812_v6, %v2810_v35 }
 0x81e   : > { %v3152_v37 = vadd.s32 1, %v3237_v19  ;;  %v3165_v9 = vadd.f32 0.48090908, %v3164_v51  ;;  %v3167_v27 = vadd.f32 -0.72134733, %v3166_v55  ;;  %3781 = vpow2.f32 %v2981_v18 }
 0x81f   : > { %vm3007_vm10 = vcmp.gt.f32.partialorder %v4675_v11, 1065353216  ;;  %vm3077_vm15 = vweird.f32 %v4749_v63  ;;  %v3252_v21 = vsel %vm6028_vm7, %v3251_v62, %v5109_v38  ;;  %v2730_v44 = vsel %vm2729_vm0, 1065353216, %v2728_v29 }
 0x820   : > { %vm2803_vm8 = vcmp.eq.f32.partialorder %v4535_v58, 1065353216  ;;  %vm3003_vm6 = vcmp.lt.f32.partialorder %v4648_v45, 0  ;;  %v3078_v35 = vsel %vm3077_vm15, %v4749_v63, %v3073_v50  ;;  %v3168_v49 = vmul.f32 %v3165_v9, %v5069_v36  ;;  %v3780_v28 = vpop.eup %3779 }
 0x821   : > { %vm6105_vm14 = vcmp.eq.f32.partialorder %v4570_v43, 2139095040  ;;  %vm3004_vm2 = vcmp.eq.f32.partialorder %v4648_v45, 0  ;;  %vm3076_vm1 = vcmp.lt.f32.partialorder %v4749_v63, 0.0  ;;  %v5160_v33 = vadd.f32 -1.0, %v3252_v21 }
 0x822   : > { %v2820_v10 = vsel %vm6105_vm14, %v4929_v42, %v2813_v57  ;;  %vm6106_vm0 = vcmp.lt.f32.partialorder %v4558_v13, 0  ;;  %vm6109_vm15 = vcmp.ge.f32.partialorder %v4994_v61, 1.4142135  ;;  %v3169_v5 = vadd.f32 1.442695, %v3168_v49 }
 0x823   : > { %vm5164_vm7 = vmxor %vm6106_vm0, %vm3007_vm10  ;;  %v3153_v36 = vsel %vm6109_vm15, %v3152_v37, %v3237_v19  ;;  %v3170_v6 = vmul.f32 %v5041_v12, %v3167_v27  ;;  %v3241_v42 = vand.u32 2139095040, %v4771_v30  ;;  %v5175_v56 = vsel %vm6029_vm12, %v4515_v32, %v2730_v44 }
 0x824   : > { %vm2905_vm14 = vcmp.lt.s32.totalorder %v4580_v26, 0  ;;  %vm5182_vm10 = vmand %vm2902_vm11, %vm4620_vm3  ;;  %vm3020_vm0 = vcmp.eq.f32.partialorder %v4648_v45, 3212836864  ;;  %v3079_v61 = vsel %vm3076_vm1, nan, %v3078_v35  ;;  %v5189_v19 = vmul.f32 %v5160_v33, %v5160_v33  ;;  %v3782_v41 = vpop.eup %3781 }
 0x825   : > { %v2909_v32 = vsel %vm5182_vm10, 2143289344, %v3780_v28  ;;  %vm6112_vm15 = vcmp.lt.f32.partialorder %v4558_v13, 0  ;;  %v5205_v46 = vsel %vm3003_vm6, %v4688_v17, %v4629_v22  ;;  %vm3075_vm11 = vcmp.eq.f32.partialorder %v4749_v63, 0.0 }
 0x826   : > { %vm5197_vm12 = vmand %vm6112_vm15, %vm3004_vm2  ;;  %v3171_v18 = vadd.f32 %v3170_v6, %v3169_v5  ;;  %v2825_v50 = vsel %vm2806_vm9, %v4935_v20, %v2820_v10  ;;  %v3173_v51 = vcvt.s32.f32 %v3153_v36  ;;  %v3257_v55 = vmul.f32 0.12621109, %v5189_v19 }
 0x827   : > { %vm3018_vm1 = vmor %vm5197_vm12, %vm5164_vm7  ;;  %v3259_v29 = vmul.f32 -0.20706727, %v5189_v19  ;;  %v3080_v62 = vsel %vm3075_vm11, -inf, %v3079_v61  ;;  %v3242_v37 = vshrl.u32 %v3241_v42, 23  ;;  %v3346_v9 = vand.u32 8388607, %v4808_v59 }
 0x828   : > { %v3172_v57 = vmul.f32 %v5041_v12, %v3171_v18  ;;  %vm6115_vm9 = vcmp.eq.f32.partialorder %v4580_v26, 0  ;;  %vm5227_vm15 = vmand %vm3003_vm6, %vm4620_vm3  ;;  %vm3074_vm10 = vcmp.eq.f32.partialorder %v4749_v63, 1.0  ;;  %v3258_v27 = vadd.f32 0.21545328, %v3257_v55 }
 0x829   : > { %v2911_v7 = vsel %vm6115_vm9, %v4827_v8, %v2909_v32  ;;  %v3260_v21 = vadd.f32 -0.23896284, %v3259_v29  ;;  %vm5237_vm11 = vmor %vm2826_vm5, %vm4963_vm4  ;;  %v3010_v44 = vsel %vm5227_vm15, 2143289344, %v3782_v41  ;;  %v3019_v35 = vsel %vm3018_vm1, 2139095040, %v3898_v1 }
 0x82a   : > { %v3174_v49 = vadd.f32 %v3173_v51, %v3172_v57  ;;  %v3347_v28 = vor.u32 8388608, %v3346_v9  ;;  %v2829_v10 = vsel %vm5237_vm11, 2143289344, %v2825_v50  ;;  %v3081_v36 = vsel %vm3074_vm10, 0.0, %v3080_v62  ;;  %vm2912_vm10 = vmand %vm2905_vm14, %vm4663_vm13 }
 0x82b   : > { %v3261_v5 = vmul.f32 %v3258_v27, %v5189_v19  ;;  %v3263_v6 = vmul.f32 %v3260_v21, %v5189_v19  ;;  %v2913_v42 = vxor.u32 2147483648, %v2911_v7  ;;  %vm3178_vm5 = vweird.f32 %v4803_v54 }
 0x82c   : > { %v3338_v39 = vadd.s32 4294967169, %v3242_v37  ;;  %v3349_v61 = vand.u32 8388607, %v3347_v28  ;;  %vm6120_vm6 = vcmp.eq.f32.partialorder %v4558_v13, 0  ;;  %v3012_v0 = vsel %vm3004_vm2, %v4827_v8, %v3010_v44 }
 0x82d   : > { %vm2830_vm12 = vmor %vm2803_vm8, %vm6120_vm6  ;;  %v3179_v32 = vsel %vm3178_vm5, %v4803_v54, %v3174_v49  ;;  %v3262_v48 = vadd.f32 0.28795174, %v3261_v5  ;;  %v3264_v18 = vadd.f32 -0.3607037, %v3263_v6  ;;  %vm2907_vm7 = vcmp.eq.f32.partialorder %v4591_v53, 2139095040 }
 0x82e   : > { %v2831_v41 = vsel %vm2830_vm12, 1065353216, %v2829_v10  ;;  %vm2927_vm1 = vcmp.ne.f32.partialorder %v4580_v26, %v4580_v26  ;;  %v3021_v50 = vsel %vm3020_vm0, 1065353216, %v3019_v35  ;;  %v3082_v51 = vmul.f32 %v3081_v36, %v4558_v13 }
 0x82f   : > { %v5268_v55 = vor.u32 1065353216, %v3349_v61  ;;  %vm3108_vm8 = vcmp.gt.f32.partialorder %v4749_v63, 1065353216  ;;  %vm3177_vm2 = vcmp.lt.f32.partialorder %v4803_v54, 0.0  ;;  %v3265_v29 = vmul.f32 %v3262_v48, %v5189_v19 }
 0x830   : > { %v3267_v62 = vmul.f32 %v3264_v18, %v5189_v19  ;;  %v3014_v57 = vxor.u32 2147483648, %v3012_v0  ;;  %v3180_v37 = vsel %vm3177_vm2, nan, %v3179_v32  ;;  %v2914_v20 = vsel %vm2912_vm10, %v2913_v42, %v2911_v7 }
 0x831   : > { %vm6030_vm0 = vcmp.ge.f32.partialorder %v5268_v55, 1.4142135  ;;  %v3352_v9 = vmul.f32 0.5, %v5268_v55  ;;  %v3253_v27 = vadd.s32 1, %v3338_v39  ;;  %v3266_v21 = vadd.f32 0.48090908, %v3265_v29 }
 0x832   : > { %v3268_v12 = vadd.f32 -0.72134733, %v3267_v62  ;;  %3783 = vpow2.f32 %v3082_v51  ;;  %vm3104_vm15 = vcmp.lt.f32.partialorder %v4724_v34, 0  ;;  %vm3176_vm11 = vcmp.eq.f32.partialorder %v4803_v54, 0.0 }
 0x833   : > { %v3353_v44 = vsel %vm6030_vm0, %v3352_v9, %v5268_v55  ;;  %vm3008_vm14 = vcmp.eq.f32.partialorder %v4675_v11, 2139095040  ;;  %vm6121_vm5 = vcmp.lt.s32.totalorder %v4648_v45, 0  ;;  %vm3105_vm12 = vcmp.eq.f32.partialorder %v4724_v34, 0 }
 0x834   : > { %vm3013_vm6 = vmand %vm6121_vm5, %vm4663_vm13  ;;  %v3181_v7 = vsel %vm3176_vm11, -inf, %v3180_v37  ;;  %v3269_v35 = vmul.f32 %v3266_v21, %v5189_v19  ;;  %v5293_v49 = vadd.f32 -1.0, %v3353_v44  ;;  %vm6122_vm2 = vcmp.eq.f32.partialorder %v4570_v43, 2139095040 }
 0x835   : > { %v2921_v28 = vsel %vm6122_vm2, %v5123_v4, %v2914_v20  ;;  %v3015_v10 = vsel %vm3013_vm6, %v3014_v57, %v3012_v0  ;;  %vm3028_vm10 = vcmp.ne.f32.partialorder %v4648_v45, %v4648_v45  ;;  %vm6123_vm0 = vcmp.lt.f32.partialorder %v4558_v13, 0 }
 0x836   : > { %vm5304_vm5 = vmxor %vm6123_vm0, %vm3108_vm8  ;;  %vm3175_vm11 = vcmp.eq.f32.partialorder %v4803_v54, 1.0  ;;  %v3342_v19 = vand.u32 2139095040, %v4808_v59  ;;  %vm6126_vm9 = vcmp.ge.f32.partialorder %v5109_v38, 1.4142135  ;;  %v3270_v4 = vadd.f32 1.442695, %v3269_v35 }
 0x837   : > { %v3254_v5 = vsel %vm6126_vm9, %v3253_v27, %v3338_v39  ;;  %v3271_v6 = vmul.f32 %v5160_v33, %v3268_v12  ;;  %v5315_v42 = vmul.f32 %v5293_v49, %v5293_v49  ;;  %vm6127_vm8 = vcmp.eq.f32.partialorder %v4558_v13, 1065353216  ;;  %vm5326_vm6 = vmand %vm6123_vm0, %vm3105_vm12 }
 0x838   : > { %v5320_v61 = vsel %vm6127_vm8, %v4535_v58, %v2831_v41  ;;  %v5334_v38 = vsel %vm3104_vm15, %v4688_v17, %v4629_v22  ;;  %v3182_v39 = vsel %vm3175_vm11, 0.0, %v3181_v7  ;;  %v3447_v32 = vand.u32 8388607, %v4874_v60  ;;  %vm3119_vm9 = vmor %vm5326_vm6, %vm5304_vm5  ;;  %v3784_v51 = vpop.eup %3783 }
 0x839   : > { %v2926_v58 = vsel %vm2907_vm7, %v5106_v31, %v2921_v28  ;;  %vm3121_vm2 = vcmp.eq.f32.partialorder %v4724_v34, 3212836864  ;;  %v3272_v48 = vadd.f32 %v3271_v6, %v3270_v4  ;;  %v3358_v18 = vmul.f32 0.12621109, %v5315_v42  ;;  %vm5355_vm7 = vmor %vm2927_vm1, %vm4963_vm4 }
 0x83a   : > { %v3360_v41 = vmul.f32 -0.20706727, %v5315_v42  ;;  %vm3005_vm11 = vcmp.eq.f32.partialorder %v4648_v45, 1065353216  ;;  %vm6130_vm8 = vcmp.eq.f32.partialorder %v4570_v43, 2139095040  ;;  %v3274_v53 = vcvt.s32.f32 %v3254_v5 }
 0x83b   : > { %v3022_v29 = vsel %vm6130_vm8, %v3021_v50, %v3015_v10  ;;  %v3343_v31 = vshrl.u32 %v3342_v19, 23  ;;  %v3448_v62 = vor.u32 8388608, %v3447_v32  ;;  %vm3107_vm0 = vcmp.lt.s32.totalorder %v4724_v34, 0  ;;  %vm5368_vm8 = vmand %vm3104_vm15, %vm4620_vm3 }
 0x83c   : > { %v3183_v37 = vmul.f32 %v3182_v39, %v4558_v13  ;;  %v3273_v9 = vmul.f32 %v5160_v33, %v3272_v48  ;;  %v3359_v20 = vadd.f32 0.21545328, %v3358_v18  ;;  %v3361_v50 = vadd.f32 -0.23896284, %v3360_v41 }
 0x83d   : > { %v2930_v27 = vsel %vm5355_vm7, 2143289344, %v2926_v58  ;;  %v3120_v33 = vsel %vm3119_vm9, 2139095040, %v3898_v1  ;;  %vm3209_vm1 = vcmp.gt.f32.partialorder %v4803_v54, 1065353216  ;;  %v3450_v12 = vand.u32 8388607, %v3448_v62 }
 0x83e   : > { %v3111_v44 = vsel %vm5368_vm8, 2143289344, %v3784_v51  ;;  %v3275_v7 = vadd.f32 %v3274_v53, %v3273_v9  ;;  %v3362_v35 = vmul.f32 %v3359_v20, %v5315_v42  ;;  %v3364_v28 = vmul.f32 %v3361_v50, %v5315_v42 }
 0x83f   : > { %v3027_v10 = vsel %vm3008_vm14, %v5205_v46, %v3022_v29  ;;  %vm6032_vm15 = vcmp.eq.f32.partialorder %v4773_v24, 0  ;;  %vm3279_vm5 = vweird.f32 %v4771_v30  ;;  %v5388_v36 = vor.u32 1065353216, %v3450_v12 }
 0x840   : > { %vm6135_vm6 = vcmp.eq.f32.partialorder %v4558_v13, 0  ;;  %vm6136_vm9 = vcmp.eq.f32.partialorder %v4580_v26, 1065353216  ;;  %3785 = vpow2.f32 %v3183_v37  ;;  %v3439_v19 = vadd.s32 4294967169, %v3343_v31 }
 0x841   : > { %vm2931_vm7 = vmor %vm6136_vm9, %vm6135_vm6  ;;  %v3363_v5 = vadd.f32 0.28795174, %v3362_v35  ;;  %v3365_v4 = vadd.f32 -0.3607037, %v3364_v28  ;;  %v3113_v11 = vsel %vm3105_vm12, %v4827_v8, %v3111_v44  ;;  %vm6137_vm14 = vcmp.lt.f32.partialorder %v4558_v13, 0 }
 0x842   : > { %vm5401_vm8 = vmxor %vm6137_vm14, %vm3209_vm1  ;;  %v3280_v6 = vsel %vm3279_vm5, %v4771_v30, %v3275_v7  ;;  %vm6031_vm6 = vcmp.ge.f32.partialorder %v5388_v36, 1.4142135  ;;  %v3453_v0 = vmul.f32 0.5, %v5388_v36  ;;  %v2932_v39 = vsel %vm2931_vm7, 1065353216, %v2930_v27 }
 0x843   : > { %vm5413_vm12 = vmor %vm3028_vm10, %vm4963_vm4  ;;  %vm3205_vm1 = vcmp.lt.f32.partialorder %v4773_v24, 0  ;;  %v3366_v58 = vmul.f32 %v3363_v5, %v5315_v42  ;;  %v3368_v48 = vmul.f32 %v3365_v4, %v5315_v42  ;;  %v3122_v41 = vsel %vm3121_vm2, 1065353216, %v3120_v33 }
 0x844   : > { %v3031_v18 = vsel %vm5413_vm12, 2143289344, %v3027_v10  ;;  %vm6142_vm5 = vmmov %vm6137_vm14  ;;  %vm3278_vm9 = vcmp.lt.f32.partialorder %v4771_v30, 0.0  ;;  %v3454_v29 = vsel %vm6031_vm6, %v3453_v0, %v5388_v36  ;;  %v3115_v53 = vxor.u32 2147483648, %v3113_v11 }
 0x845   : > { %vm5428_vm10 = vmand %vm6142_vm5, %vm6032_vm15  ;;  %v3281_v31 = vsel %vm3278_vm9, nan, %v3280_v6  ;;  %v3367_v62 = vadd.f32 0.48090908, %v3366_v58  ;;  %v3369_v57 = vadd.f32 -0.72134733, %v3368_v48  ;;  %vm6145_vm7 = vcmp.eq.f32.partialorder %v4558_v13, 1065353216 }
 0x846   : > { %vm3220_vm2 = vmor %vm5428_vm10, %vm5401_vm8  ;;  %v5443_v37 = vsel %vm6145_vm7, %v4580_v26, %v2932_v39  ;;  %v5449_v9 = vsel %vm3205_vm1, %v4688_v17, %v4629_v22  ;;  %v3354_v20 = vadd.s32 1, %v3439_v19  ;;  %v5451_v50 = vadd.f32 -1.0, %v3454_v29  ;;  %v3786_v27 = vpop.eup %3785 }
 0x847   : > { %vm6146_vm14 = vcmp.eq.f32.partialorder %v4558_v13, 0  ;;  %vm3276_vm5 = vcmp.eq.f32.partialorder %v4771_v30, 1.0  ;;  %vm3277_vm9 = vcmp.eq.f32.partialorder %v4771_v30, 0.0  ;;  %v3370_v26 = vmul.f32 %v3367_v62, %v5315_v42  ;;  %vm3114_vm6 = vmand %vm3107_vm0, %vm4663_vm13 }
 0x848   : > { %vm3032_vm12 = vmor %vm3005_vm11, %vm6146_vm14  ;;  %v3443_v21 = vand.u32 2139095040, %v4874_v60  ;;  %vm3109_vm7 = vcmp.eq.f32.partialorder %v4749_v63, 2139095040  ;;  %vm3208_vm15 = vcmp.lt.s32.totalorder %v4773_v24, 0  ;;  %v5475_v42 = vsel %vm3220_vm2, 2139095040, %v3898_v1 }
 0x849   : > { %v5461_v33 = vsel %vm3032_vm12, 1065353216, %v3031_v18  ;;  %v3282_v12 = vsel %vm3277_vm9, -inf, %v3281_v31  ;;  %v5479_v44 = vmul.f32 %v5451_v50, %v5451_v50  ;;  %v3116_v7 = vsel %vm3114_vm6, %v3115_v53, %v3113_v11  ;;  %vm5485_vm11 = vmand %vm3205_vm1, %vm4620_vm3 }
 0x84a   : > { %vm6033_vm0 = vcmp.eq.f32.partialorder %v4751_v2, 0  ;;  %v3371_v28 = vadd.f32 1.442695, %v3370_v26  ;;  %v3372_v10 = vmul.f32 %v5293_v49, %v3369_v57  ;;  %vm3129_vm8 = vcmp.ne.f32.partialorder %v4724_v34, %v4724_v34 }
 0x84b   : > { %v3212_v5 = vsel %vm5485_vm11, 2143289344, %v3786_v27  ;;  %vm6149_vm6 = vcmp.ge.f32.partialorder %v5268_v55, 1.4142135  ;;  %v3459_v11 = vmul.f32 0.12621109, %v5479_v44  ;;  %v3283_v6 = vsel %vm3276_vm5, 0.0, %v3282_v12 }
 0x84c   : > { %v3355_v4 = vsel %vm6149_vm6, %v3354_v20, %v3439_v19  ;;  %v3461_v46 = vmul.f32 -0.20706727, %v5479_v44  ;;  %v3373_v0 = vadd.f32 %v3372_v10, %v3371_v28  ;;  %v3444_v39 = vshrl.u32 %v3443_v21, 23 }
 0x84d   : > { %v3548_v32 = vand.u32 8388607, %v4835_v52  ;;  %vm3222_vm1 = vcmp.eq.f32.partialorder %v4773_v24, 3212836864  ;;  %vm3310_vm2 = vcmp.gt.f32.partialorder %v4771_v30, 1065353216  ;;  %vm3377_vm14 = vcmp.eq.f32.partialorder %v4808_v59, 1.0 }
 0x84e   : > { %v3460_v55 = vadd.f32 0.21545328, %v3459_v11  ;;  %v3462_v19 = vadd.f32 -0.23896284, %v3461_v46  ;;  %vm6150_vm9 = vcmp.eq.f32.partialorder %v4773_v24, 0  ;;  %v3374_v48 = vmul.f32 %v5293_v49, %v3373_v0 }
 0x84f   : > { %v3214_v58 = vsel %vm6150_vm9, %v4827_v8, %v3212_v5  ;;  %v3375_v18 = vcvt.s32.f32 %v3355_v4  ;;  %v3549_v51 = vor.u32 8388608, %v3548_v32  ;;  %vm6151_vm5 = vcmp.eq.f32.partialorder %v4570_v43, 2139095040 }
 0x850   : > { %v3123_v29 = vsel %vm6151_vm5, %v3122_v41, %v3116_v7  ;;  %v3284_v53 = vmul.f32 %v3283_v6, %v4558_v13  ;;  %v3463_v31 = vmul.f32 %v3460_v55, %v5479_v44  ;;  %v3465_v62 = vmul.f32 %v3462_v19, %v5479_v44 }
 0x851   : > { %vm6152_vm11 = vcmp.lt.f32.partialorder %v4558_v13, 0  ;;  %v3376_v20 = vadd.f32 %v3375_v18, %v3374_v48  ;;  %vm3378_vm9 = vcmp.eq.f32.partialorder %v4808_v59, 0.0  ;;  %v3540_v49 = vadd.s32 4294967169, %v3444_v39 }
 0x852   : > { %vm5518_vm6 = vmxor %vm6152_vm11, %vm3310_vm2  ;;  %v3551_v27 = vand.u32 8388607, %v3549_v51  ;;  %v3216_v26 = vxor.u32 2147483648, %v3214_v58  ;;  %vm3380_vm5 = vweird.f32 %v4808_v59  ;;  %v3464_v41 = vadd.f32 0.28795174, %v3463_v31 }
 0x853   : > { %v3466_v21 = vadd.f32 -0.3607037, %v3465_v62  ;;  %v3128_v12 = vsel %vm3109_vm7, %v5334_v38, %v3123_v29  ;;  %vm6155_vm2 = vmmov %vm6152_vm11  ;;  %vm3379_vm12 = vcmp.lt.f32.partialorder %v4808_v59, 0.0  ;;  %v3381_v35 = vsel %vm3380_vm5, %v4808_v59, %v3376_v20 }
 0x854   : > { %vm5531_vm11 = vmand %vm6155_vm2, %vm6033_vm0  ;;  %v5537_v28 = vor.u32 1065353216, %v3551_v27  ;;  %vm3210_vm10 = vcmp.eq.f32.partialorder %v4803_v54, 2139095040  ;;  %3787 = vpow2.f32 %v3284_v53  ;;  %v3382_v63 = vsel %vm3379_vm12, nan, %v3381_v35 }
 0x855   : > { %vm3321_vm7 = vmor %vm5531_vm11, %vm5518_vm6  ;;  %v3467_v38 = vmul.f32 %v3464_v41, %v5479_v44  ;;  %v3469_v10 = vmul.f32 %v3466_v21, %v5479_v44  ;;  %vm3230_vm2 = vcmp.ne.f32.partialorder %v4773_v24, %v4773_v24  ;;  %v3383_v5 = vsel %vm3378_vm9, -inf, %v3382_v63 }
 0x856   : > { %vm3215_vm5 = vmand %vm3208_vm15, %vm4663_vm13  ;;  %v3455_v4 = vadd.s32 1, %v3540_v49  ;;  %vm6034_vm0 = vcmp.ge.f32.partialorder %v5537_v28, 1.4142135  ;;  %v3554_v11 = vmul.f32 0.5, %v5537_v28  ;;  %v3384_v6 = vsel %vm3377_vm14, 0.0, %v3383_v5 }
 0x857   : > { %v3217_v46 = vsel %vm3215_vm5, %v3216_v26, %v3214_v58  ;;  %v3468_v0 = vadd.f32 0.48090908, %v3467_v38  ;;  %v3470_v39 = vadd.f32 -0.72134733, %v3469_v10  ;;  %vm6158_vm15 = vcmp.eq.f32.partialorder %v4558_v13, 1065353216  ;;  %vm5569_vm12 = vmor %vm3129_vm8, %vm4963_vm4 }
 0x858   : > { %v5562_v32 = vsel %vm6158_vm15, %v4648_v45, %v5461_v33  ;;  %v3223_v19 = vsel %vm3222_vm1, 1065353216, %v5475_v42  ;;  %v3322_v45 = vsel %vm3321_vm7, 2139095040, %v3898_v1  ;;  %v3555_v33 = vsel %vm6034_vm0, %v3554_v11, %v5537_v28 }
 0x859   : > { %v3132_v58 = vsel %vm5569_vm12, 2143289344, %v3128_v12  ;;  %vm3207_vm8 = vcmp.eq.f32.partialorder %v4773_v24, 1065353216  ;;  %v3385_v48 = vmul.f32 %v3384_v6, %v4558_v13  ;;  %v3471_v42 = vmul.f32 %v3468_v0, %v5479_v44 }
 0x85a   : > { %v5590_v18 = vadd.f32 -1.0, %v3555_v33  ;;  %vm6161_vm1 = vcmp.eq.f32.partialorder %v4570_v43, 2139095040  ;;  %vm3323_vm14 = vcmp.eq.f32.partialorder %v4751_v2, 3212836864  ;;  %vm6162_vm6 = vcmp.lt.f32.partialorder %v4751_v2, 0  ;;  %v3788_v31 = vpop.eup %3787 }
 0x85b   : > { %v3224_v51 = vsel %vm6161_vm1, %v3223_v19, %v3217_v46  ;;  %v5599_v29 = vsel %vm6162_vm6, %v4688_v17, %v4629_v22  ;;  %vm6163_vm9 = vcmp.ge.f32.partialorder %v5388_v36, 1.4142135  ;;  %vm6164_vm11 = vcmp.eq.f32.partialorder %v4558_v13, 0 }
 0x85c   : > { %v3456_v53 = vsel %vm6163_vm9, %v3455_v4, %v3540_v49  ;;  %vm6165_vm7 = vcmp.eq.f32.partialorder %v4724_v34, 1065353216  ;;  %vm3309_vm15 = vcmp.lt.s32.totalorder %v4751_v2, 0  ;;  %v3472_v44 = vadd.f32 1.442695, %v3471_v42  ;;  %vm5622_vm9 = vmand %vm6162_vm6, %vm4620_vm3 }
 0x85d   : > { %vm3133_vm5 = vmor %vm6165_vm7, %vm6164_vm11  ;;  %v3473_v62 = vmul.f32 %v5451_v50, %v3470_v39  ;;  %v3544_v57 = vand.u32 2139095040, %v4835_v52  ;;  %v5612_v20 = vmul.f32 %v5590_v18, %v5590_v18  ;;  %v5614_v36 = vsel %vm3323_vm14, 1065353216, %v3322_v45 }
 0x85e   : > { %v3134_v27 = vsel %vm3133_vm5, 1065353216, %v3132_v58  ;;  %vm3407_vm12 = vcmp.lt.f32.partialorder %v4777_v25, 0  ;;  %vm3411_vm1 = vcmp.gt.f32.partialorder %v4808_v59, 1065353216  ;;  %3789 = vpow2.f32 %v3385_v48 }
 0x85f   : > { %v3474_v26 = vadd.f32 %v3473_v62, %v3472_v44  ;;  %v3560_v41 = vmul.f32 0.12621109, %v5612_v20  ;;  %v3562_v21 = vmul.f32 -0.20706727, %v5612_v20  ;;  %v3229_v12 = vsel %vm3210_vm10, %v5449_v9, %v3224_v51 }
 0x860   : > { %v3313_v7 = vsel %vm5622_vm9, 2143289344, %v3788_v31  ;;  %vm6035_vm14 = vcmp.eq.f32.partialorder %v4777_v25, 0  ;;  %v3476_v35 = vcvt.s32.f32 %v3456_v53  ;;  %v3545_v38 = vshrl.u32 %v3544_v57, 23 }
 0x861   : > { %v3475_v63 = vmul.f32 %v5451_v50, %v3474_v26  ;;  %v3561_v10 = vadd.f32 0.21545328, %v3560_v41  ;;  %v3563_v5 = vadd.f32 -0.23896284, %v3562_v21  ;;  %vm6168_vm11 = vcmp.eq.f32.partialorder %v4558_v13, 1065353216  ;;  %v2004_v50 = vld [vmem:[%s6015_s22 + $0x8] sm:$0xff] }
 0x862   : > { %v5638_v4 = vsel %vm6168_vm11, %v4724_v34, %v3134_v27  ;;  %vm6169_vm10 = vcmp.lt.f32.partialorder %v4558_v13, 0  ;;  %v5653_v9 = vsel %vm3407_vm12, %v4688_v17, %v4629_v22  ;;  %vm3479_vm6 = vcmp.eq.f32.partialorder %v4874_v60, 0.0  ;;  %v2003_v34 = vld [vmem:[%s6015_s22] sm:$0xff]  ;;  %v2005_v41 = vld [vmem:[%s6015_s22 + $0x10] sm:$0xff] }
 0x863   : > { %vm5644_vm7 = vmxor %vm6169_vm10, %vm3411_vm1  ;;  %vm6174_vm9 = vcmp.eq.f32.partialorder %v4751_v2, 0  ;;  %v3477_v6 = vadd.f32 %v3476_v35, %v3475_v63  ;;  %v3564_v0 = vmul.f32 %v3561_v10, %v5612_v20  ;;  %v3566_v39 = vmul.f32 %v3563_v5, %v5612_v20  ;;  %v2006_v35 = vld [vmem:[%s6015_s22 + $0x18] sm:$0xff] }
 0x864   : > { %vm5667_vm1 = vmor %vm3230_vm2, %vm4963_vm4  ;;  %v3315_v46 = vsel %vm6174_vm9, %v4827_v8, %v3313_v7  ;;  %vm3481_vm9 = vweird.f32 %v4874_v60  ;;  %vm3512_vm0 = vcmp.gt.f32.partialorder %v4874_v60, 1065353216  ;;  %v3790_v45 = vpop.eup %3789  ;;  %v3641_v58 = vadd.s32 4294967169, %v3545_v38 }
 0x865   : > { %v3233_v55 = vsel %vm5667_vm1, 2143289344, %v3229_v12  ;;  %vm6175_vm11 = vmmov %vm6169_vm10  ;;  %vm3480_vm10 = vcmp.lt.f32.partialorder %v4874_v60, 0.0  ;;  %v3482_v33 = vsel %vm3481_vm9, %v4874_v60, %v3477_v6  ;;  %v3565_v48 = vadd.f32 0.28795174, %v3564_v0 }
 0x866   : > { %vm5682_vm2 = vmand %vm6175_vm11, %vm6035_vm14  ;;  %v3567_v42 = vadd.f32 -0.3607037, %v3566_v39  ;;  %vm6178_vm11 = vcmp.eq.f32.partialorder %v4558_v13, 0  ;;  %v3317_v53 = vxor.u32 2147483648, %v3315_v46  ;;  %v3483_v31 = vsel %vm3480_vm10, nan, %v3482_v33 }
 0x867   : > { %vm3422_vm1 = vmor %vm5682_vm2, %vm5644_vm7  ;;  %v2280_v44 = vmul.f32 %v2003_v34, %v4699_v23  ;;  %v2281_v62 = vmul.f32 %v2004_v50, %v4699_v23  ;;  %vm3478_vm5 = vcmp.eq.f32.partialorder %v4874_v60, 1.0  ;;  %v3484_v27 = vsel %vm3479_vm6, -inf, %v3483_v31 }
 0x868   : > { %vm5699_vm14 = vmor %vm3207_vm8, %vm6178_vm11  ;;  %v3568_v49 = vmul.f32 %v3565_v48, %v5612_v20  ;;  %v3570_v26 = vmul.f32 %v3567_v42, %v5612_v20  ;;  %vm3311_vm8 = vcmp.eq.f32.partialorder %v4771_v30, 2139095040  ;;  %vm3331_vm10 = vcmp.ne.f32.partialorder %v4751_v2, %v4751_v2 }
 0x869   : > { %vm5709_vm9 = vmand %vm3407_vm12, %vm4620_vm3  ;;  %v3423_v12 = vsel %vm3422_vm1, 2139095040, %v3898_v1  ;;  %v3485_v7 = vsel %vm3478_vm5, 0.0, %v3484_v27  ;;  %vm6036_vm6 = vcmp.eq.f32.partialorder %v4837_v47, 0  ;;  %v3235_v63 = vsel %vm5699_vm14, 1065353216, %v3233_v55 }
 0x86a   : > { %vm3316_vm12 = vmand %vm3309_vm15, %vm4663_vm13  ;;  %v3414_v21 = vsel %vm5709_vm9, 2143289344, %v3790_v45  ;;  %v3486_v38 = vmul.f32 %v3485_v7, %v4558_v13  ;;  %vm6183_vm15 = vcmp.lt.f32.partialorder %v4558_v13, 0  ;;  %v3569_v5 = vadd.f32 0.48090908, %v3568_v49 }
 0x86b   : > { %vm5747_vm11 = vmxor %vm6183_vm15, %vm3512_vm0  ;;  %v3571_v54 = vadd.f32 -0.72134733, %v3570_v26  ;;  %v3318_v34 = vsel %vm3316_vm12, %v3317_v53, %v3315_v46  ;;  %v3556_v50 = vadd.s32 1, %v3641_v58  ;;  %v2291_v11 = vmul.f32 %v5130_v3, %v2280_v44 }
 0x86c   : > { %v2292_v6 = vmul.f32 %v5175_v56, %v2281_v62  ;;  %vm6186_vm14 = vcmp.eq.f32.partialorder %v4777_v25, 0  ;;  %vm6187_vm7 = vcmp.eq.f32.partialorder %v4777_v25, 3212836864  ;;  %3791 = vpow2.f32 %v3486_v38  ;;  %vm6188_vm0 = vmmov %vm6183_vm15 }
 0x86d   : > { %v3416_v0 = vsel %vm6186_vm14, %v4827_v8, %v3414_v21  ;;  %v3425_v39 = vsel %vm6187_vm7, 1065353216, %v3423_v12  ;;  %vm5762_vm5 = vmand %vm6188_vm0, %vm6036_vm6  ;;  %v3572_v3 = vmul.f32 %v3569_v5, %v5612_v20  ;;  %vm6191_vm2 = vcmp.eq.f32.partialorder %v4558_v13, 1065353216 }
 0x86e   : > { %v5770_v56 = vsel %vm6191_vm2, %v4773_v24, %v3235_v63  ;;  %vm3508_vm1 = vcmp.lt.f32.partialorder %v4837_v47, 0  ;;  %vm3523_vm9 = vmor %vm5762_vm5, %vm5747_vm11  ;;  %v2282_v46 = vmul.f32 %v2005_v41, %v4699_v23  ;;  %v2283_v19 = vmul.f32 %v2006_v35, %v4699_v23 }
 0x86f   : > { %vm6192_vm15 = vcmp.eq.f32.partialorder %v4570_v43, 2139095040  ;;  %vm3511_vm14 = vcmp.lt.s32.totalorder %v4837_v47, 0  ;;  %v3573_v24 = vadd.f32 1.442695, %v3572_v3  ;;  %v3574_v45 = vmul.f32 %v5590_v18, %v3571_v54  ;;  %vm3514_vm11 = vmand %vm3508_vm1, %vm4620_vm3 }
 0x870   : > { %v3325_v20 = vsel %vm6192_vm15, %v5614_v36, %v3318_v34  ;;  %v3418_v33 = vxor.u32 2147483648, %v3416_v0  ;;  %vm6193_vm0 = vcmp.ge.f32.partialorder %v5537_v28, 1.4142135  ;;  %vm6194_vm2 = vcmask 7168   ;;  %v2007_v36 = vld [vmem:[%s6015_s22 + $0x20] sm:$0xff] }
 0x871   : > { %v3557_v48 = vsel %vm6193_vm0, %v3556_v50, %v3641_v58  ;;  %v2302_v42 = vsel %vm6194_vm2, %v2291_v11, 0.0  ;;  %vm6195_vm6 = vmmov %vm6194_vm2  ;;  %vm3412_vm15 = vcmp.eq.f32.partialorder %v4808_v59, 2139095040  ;;  %v3524_v28 = vsel %vm3523_vm9, 2139095040, %v3898_v1 }
 0x872   : > { %v2303_v51 = vsel %vm6195_vm6, %v2292_v6, 0.0  ;;  %vm3525_vm0 = vcmp.eq.f32.partialorder %v4837_v47, 3212836864  ;;  %v3531_v58 = vsel %vm3508_vm1, %v4688_v17, %v4629_v22  ;;  %v3575_v53 = vadd.f32 %v3574_v45, %v3573_v24  ;;  %v3792_v62 = vpop.eup %3791  ;;  %v2010_v24 = vld [vmem:[%s6015_s22 + $0x38] sm:$0xff] }
 0x873   : > { %vm6196_vm6 = vcmp.lt.s32.totalorder %v4777_v25, 0  ;;  %vm3533_vm7 = vcmp.ne.f32.partialorder %v4837_v47, %v4837_v47  ;;  %vm3580_vm12 = vcmp.eq.f32.partialorder %v4835_v52, 0.0  ;;  %v2293_v31 = vmul.f32 %v5320_v61, %v2282_v46  ;;  %v2008_v61 = vld [vmem:[%s6015_s22 + $0x28] sm:$0xff] }
 0x874   : > { %vm3417_vm2 = vmand %vm6196_vm6, %vm4663_vm13  ;;  %v2294_v44 = vmul.f32 %v5443_v37, %v2283_v19  ;;  %v3330_v57 = vsel %vm3311_vm8, %v5599_v29, %v3325_v20  ;;  %v3576_v27 = vmul.f32 %v5590_v18, %v3575_v53  ;;  %v3577_v49 = vcvt.s32.f32 %v3557_v48  ;;  %v2009_v29 = vld [vmem:[%s6015_s22 + $0x30] sm:$0xff] }
 0x875   : > { %v2304_v26 = vadd.f32 %v2303_v51, %v2302_v42  ;;  %v3419_v41 = vsel %vm3417_vm2, %v3418_v33, %v3416_v0  ;;  %v3515_v37 = vsel %vm3514_vm11, 2143289344, %v3792_v62  ;;  %v3526_v21 = vsel %vm3525_vm0, 1065353216, %v3524_v28  ;;  %vm5838_vm8 = vmor %vm3331_vm10, %vm4963_vm4 }
 0x876   : > { %v2284_v30 = vmul.f32 %v2007_v36, %v4699_v23  ;;  %vm6199_vm5 = vcmp.eq.f32.partialorder %v4837_v47, 0  ;;  %v3578_v7 = vadd.f32 %v3577_v49, %v3576_v27  ;;  %vm3581_vm1 = vcmp.lt.f32.partialorder %v4835_v52, 0.0  ;;  %vm3518_vm2 = vmand %vm3511_vm14, %vm4663_vm13 }
 0x877   : > { %v3517_v12 = vsel %vm6199_vm5, %v4827_v8, %v3515_v37  ;;  %vm3582_vm9 = vweird.f32 %v4835_v52  ;;  %v3334_v35 = vsel %vm5838_vm8, 2143289344, %v3330_v57  ;;  %vm6200_vm0 = vcmask 7168  }
 0x878   : > { %v3519_v63 = vxor.u32 2147483648, %v3517_v12  ;;  %v2305_v38 = vsel %vm6200_vm0, %v2293_v31, 0.0  ;;  %vm6201_vm6 = vmmov %vm6200_vm0  ;;  %vm6202_vm10 = vcmp.eq.f32.partialorder %v4570_v43, 2139095040  ;;  %v3583_v54 = vsel %vm3582_vm9, %v4835_v52, %v3578_v7 }
 0x879   : > { %v2307_v10 = vsel %vm6201_vm6, %v2294_v44, 0.0  ;;  %v3426_v5 = vsel %vm6202_vm10, %v3425_v39, %v3419_v41  ;;  %v2285_v34 = vmul.f32 %v2008_v61, %v4699_v23  ;;  %v2306_v50 = vadd.f32 %v2305_v38, %v2304_v26  ;;  %vm6203_vm11 = vmmov %vm6202_vm10 }
 0x87a   : > { %v3520_v11 = vsel %vm3518_vm2, %v3519_v63, %v3517_v12  ;;  %v3584_v6 = vsel %vm3581_vm1, nan, %v3583_v54  ;;  %v2286_v0 = vmul.f32 %v2009_v29, %v4699_v23  ;;  %v2295_v55 = vmul.f32 %v5562_v32, %v2284_v30  ;;  %vm5895_vm10 = vmor %vm3533_vm7, %vm4963_vm4 }
 0x87b   : > { %v3527_v3 = vsel %vm6203_vm11, %v3526_v21, %v3520_v11  ;;  %vm3579_vm8 = vcmp.eq.f32.partialorder %v4835_v52, 1.0  ;;  %v3585_v39 = vsel %vm3580_vm12, -inf, %v3584_v6  ;;  %v2308_v46 = vadd.f32 %v2307_v10, %v2306_v50 }
 0x87c   : > { %vm6204_vm14 = vcmp.eq.f32.partialorder %v4558_v13, 0  ;;  %vm6205_vm5 = vcmp.eq.f32.partialorder %v4751_v2, 1065353216  ;;  %vm3409_vm1 = vcmp.eq.f32.partialorder %v4777_v25, 1065353216  ;;  %v3431_v32 = vsel %vm3412_vm15, %v5653_v9, %v3426_v5 }
 0x87d   : > { %vm3335_vm9 = vmor %vm6205_vm5, %vm6204_vm14  ;;  %vm6206_vm0 = vcmp.eq.f32.partialorder %v4874_v60, 2139095040  ;;  %v3586_v20 = vsel %vm3579_vm8, 0.0, %v3585_v39  ;;  %vm6207_vm12 = vcmp.ne.f32.partialorder %v4777_v25, %v4777_v25  ;;  %vm3510_vm15 = vcmp.eq.f32.partialorder %v4837_v47, 1065353216 }
 0x87e   : > { %v3532_v19 = vsel %vm6206_vm0, %v3531_v58, %v3527_v3  ;;  %v3336_v45 = vsel %vm3335_vm9, 1065353216, %v3334_v35  ;;  %vm5884_vm6 = vmor %vm6207_vm12, %vm4963_vm4  ;;  %v3587_v59 = vmul.f32 %v3586_v20, %v4558_v13  ;;  %vm3613_vm2 = vcmp.gt.f32.partialorder %v4835_v52, 1065353216  ;;  %v2012_v58 = vld [vmem:[%s6015_s22 + $0x48] sm:$0xff] }
 0x87f   : > { %v2296_v9 = vmul.f32 %v5638_v4, %v2285_v34  ;;  %v2297_v48 = vmul.f32 %v5770_v56, %v2286_v0  ;;  %vm6212_vm11 = vcmask 7168   ;;  %v3435_v51 = vsel %vm5884_vm6, 2143289344, %v3431_v32  ;;  %vm6213_vm8 = vmmov %vm6204_vm14  ;;  %v2011_v56 = vld [vmem:[%s6015_s22 + $0x40] sm:$0xff] }
 0x880   : > { %v2309_v42 = vsel %vm6212_vm11, %v2295_v55, 0.0  ;;  %vm3436_vm14 = vmor %vm3409_vm1, %vm6213_vm8  ;;  %v3536_v36 = vsel %vm5895_vm10, 2143289344, %v3532_v19  ;;  %3793 = vpow2.f32 %v3587_v59  ;;  %vm3610_vm9 = vcmp.eq.f32.partialorder %v4796_v15, 0 }
 0x881   : > { %v2310_v28 = vadd.f32 %v2309_v42, %v2308_v46  ;;  %vm6214_vm7 = vmmov %vm6213_vm8  ;;  %v2287_v4 = vmul.f32 %v2010_v24, %v4699_v23  ;;  %vm6215_vm1 = vcmp.eq.f32.partialorder %v4558_v13, 1065353216  ;;  %vm3609_vm0 = vcmp.lt.f32.partialorder %v4796_v15, 0 }
 0x882   : > { %vm3537_vm5 = vmor %vm3510_vm15, %vm6214_vm7  ;;  %v3337_v53 = vsel %vm6215_vm1, %v4751_v2, %v3336_v45  ;;  %vm6216_vm12 = vcmp.lt.f32.partialorder %v4558_v13, 0  ;;  %v3437_v44 = vsel %vm3436_vm14, 1065353216, %v3435_v51  ;;  %v2288_v49 = vmul.f32 %v2011_v56, %v4699_v23 }
 0x883   : > { %vm5929_vm6 = vmxor %vm6216_vm12, %vm3613_vm2  ;;  %v3538_v62 = vsel %vm3537_vm5, 1065353216, %v3536_v36  ;;  %v2289_v26 = vmul.f32 %v2012_v58, %v4699_v23  ;;  %v2298_v61 = vmul.f32 %v3337_v53, %v2287_v4  ;;  %v3632_v40 = vsel %vm3609_vm0, %v4688_v17, %v4629_v22 }
 0x884   : > { %vm6219_vm15 = vmmov %vm6212_vm11  ;;  %v2290_v5 = vmul.f32 %v2013_v14, %v4699_v23  ;;  %v2334_v23 = vpop.xlane.xlu0 %2333 }
 0x885   : > { %v2311_v57 = vsel %vm6219_vm15, %v2296_v9, 0.0  ;;  %vm6220_vm10 = vmmov %vm6212_vm11  ;;  %vm3634_vm15 = vcmp.ne.f32.partialorder %v4796_v15, %v4796_v15  ;;  %v2335_v0 = vrot.slane %v2334_v23, 4 }
 0x886   : > { %v2313_v27 = vsel %vm6220_vm10, %v2297_v48, 0.0  ;;  %vm6221_vm11 = vmmov %vm6216_vm12  ;;  %v2312_v2 = vadd.f32 %v2311_v57, %v2310_v28  ;;  %v3794_v41 = vpop.eup %3793 }
 0x887   : > { %vm3622_vm8 = vmand %vm6221_vm11, %vm3610_vm9  ;;  %vm6225_vm11 = vcmp.eq.f32.partialorder %v4570_v43, 2139095040  ;;  %v2336_v55 = vadd.f32 %v2335_v0, %v2334_v23 }
 0x888   : > { %vm3624_vm7 = vmor %vm3622_vm8, %vm5929_vm6  ;;  %v2314_v30 = vadd.f32 %v2313_v27, %v2312_v2  ;;  %vm3626_vm6 = vcmp.eq.f32.partialorder %v4796_v15, 3212836864 }
 0x889   : > { %vm6222_vm2 = vmmov %vm6215_vm1  ;;  %v3625_v12 = vsel %vm3624_vm7, 2139095040, %v3898_v1  ;;  %v2337_v39 = vrot.slane %v2336_v55, 2 }
 0x88a   : > { %v3438_v37 = vsel %vm6222_vm2, %v4777_v25, %v3437_v44  ;;  %vm6223_vm14 = vmmov %vm6215_vm1  ;;  %vm3612_vm1 = vcmp.lt.s32.totalorder %v4796_v15, 0  ;;  %v3627_v63 = vsel %vm3626_vm6, 1065353216, %v3625_v12  ;;  %vm6228_vm2 = vcmp.eq.f32.partialorder %v4558_v13, 0 }
 0x88b   : > { %v3539_v21 = vsel %vm6223_vm14, %v4837_v47, %v3538_v62  ;;  %vm3615_vm5 = vmand %vm3609_vm0, %vm4620_vm3  ;;  %v2299_v7 = vmul.f32 %v3438_v37, %v2288_v49  ;;  %v2338_v19 = vadd.f32 %v2337_v39, %v2336_v55 }
 0x88c   : > { %v3616_v29 = vsel %vm3615_vm5, 2143289344, %v3794_v41  ;;  %v2300_v35 = vmul.f32 %v3539_v21, %v2289_v26  ;;  %vm6224_vm12 = vmmov %vm6220_vm10  ;;  %vm3614_vm10 = vcmp.eq.f32.partialorder %v4835_v52, 2139095040  ;;  %vm6229_vm5 = vcmp.eq.f32.partialorder %v4558_v13, 1065353216 }
 0x88d   : > { %v3618_v18 = vsel %vm3610_vm9, %v4827_v8, %v3616_v29  ;;  %v2315_v47 = vsel %vm6224_vm12, %v2298_v61, 0.0  ;;  %vm3619_vm3 = vmand %vm3612_vm1, %vm4663_vm13  ;;  %vm3611_vm9 = vcmp.eq.f32.partialorder %v4796_v15, 1065353216  ;;  %v2339_v45 = vrot.slane %v2338_v19, 1 }
 0x88e   : > { %v3620_v25 = vxor.u32 2147483648, %v3618_v18  ;;  %v2316_v8 = vadd.f32 %v2315_v47, %v2314_v30  ;;  %vm3636_vm13 = vmor %vm3634_vm15, %vm4963_vm4  ;;  %vm2345_vm4 = vcmask 0  }
 0x88f   : > { %vm6226_vm8 = vmmov %vm6224_vm12  ;;  %v2340_v33 = vadd.f32 %v2339_v45, %v2338_v19 }
 0x890   : > { %v3621_v1 = vsel %vm3619_vm3, %v3620_v25, %v3618_v18  ;;  %v2317_v54 = vsel %vm6226_vm8, %v2299_v7, 0.0  ;;  %vm6227_vm7 = vmmov %vm6226_vm8 }
 0x891   : > { %v3628_v38 = vsel %vm6225_vm11, %v3627_v63, %v3621_v1  ;;  %v2319_v34 = vsel %vm6227_vm7, %v2300_v35, 0.0  ;;  %vm3638_vm14 = vmor %vm3611_vm9, %vm6228_vm2  ;;  %v2318_v43 = vadd.f32 %v2317_v54, %v2316_v8 }
 0x892   : > { %v3633_v10 = vsel %vm3614_vm10, %v3632_v40, %v3628_v38  ;;  %vm6230_vm0 = vmmov %vm6227_vm7 }
 0x893   : > { %v3637_v50 = vsel %vm3636_vm13, 2143289344, %v3633_v10  ;;  %v2320_v17 = vadd.f32 %v2319_v34, %v2318_v43 }
 0x894   : > { %v3639_v52 = vsel %vm3638_vm14, 1065353216, %v3637_v50 }
 0x895   : > { %v3640_v22 = vsel %vm6229_vm5, %v4796_v15, %v3639_v52 }
 0x896   : > { %v2301_v11 = vmul.f32 %v3640_v22, %v2290_v5 }
 0x898   : > { %v2321_v16 = vsel %vm6230_vm0, %v2301_v11, 0.0 }
 0x899   : > { %v2322_v6 = vadd.f32 %v2321_v16, %v2320_v17 }
 0x89b   : > { %2323 = vadd.xlane.f32.xlu1 %v2322_v6 }
 0x90e   : > { %v2324_v3 = vpop.xlane.xlu1 %2323 }
 0x90f   : > { %v2325_v46 = vrot.slane %v2324_v3, 4 }
 0x911   : > { %v2326_v32 = vadd.f32 %v2325_v46, %v2324_v3 }
 0x913   : > { %v2327_v20 = vrot.slane %v2326_v32, 2 }
 0x915   : > { %v2328_v24 = vadd.f32 %v2327_v20, %v2326_v32 }
 0x917   : > { %v2329_v13 = vrot.slane %v2328_v24, 1 }
 0x919   : > { %v2330_v15 = vadd.f32 %v2329_v13, %v2328_v24 }
 0x91b   : > { %3643 = vpush %v2330_v15 }
 0x91c   : > { %3645 = vpush %v2340_v33 }
 0x94c   : > { %s3644_s7 = spop %3643 }
 0x94d   : > { %s3646_s3 = spop %3645 }
 0x94e   : > { %s2342_s8 = smul.f32 %s3646_s3, %s2526_s30 }
 0x950   : > { %s2343_s9 = ssub.f32 %s3644_s7, %s2342_s8 }
 0x952   : > { %v2344_v59 = vstv %s2343_s9 }
 0x953   : > { %2346 = vst.msk [vmem:[%s908_s28] sm:$0x1] %vm2345_vm4, %v2344_v59 }
 0x954 PF: > { %s6231_s6 = sld [smem:[#allocation12_spill]] }
 0x95a   : > { %s39_s6 = sadd.s32 1, %s6231_s6  }
 0x95b   : > { %p36_p7 = scmp.ge.s32.totalorder %s39_s6, 4  }
 0x95d   :  { %38 = sbr.rel (!%p36_p7) target bundleno = 15 (0xf), region = 182 }
 0x962   :  { %2364 = vsyncpa [#allocation4], 1 }
 0x963   :  { %2366 = vsyncpa [#allocation4 + $0x1], 1 }
 0x964   :  { %2367 = vsyncpa [#allocation7], 1 }
 0x965   :  { %2368 = vsyncpa [#allocation5], 1 }
 0x966   :  { %2370 = vsyncpa [#allocation5 + $0x1], 1 }

</bundles_post_ra>
